<compile_context>
chip_gen: v7x
topology: tpu7x:2x2x1
jax: 0.10.0
libtpu: 0.0.40
codegen_flags: <defaults>
</compile_context>

<pallas_src>
import jax
import jax.numpy as jnp
from jax.experimental import pallas as pl
from jax.experimental.pallas import tpu as pltpu

IGNORE_LABEL = -1

# Per-block VMEM budget (covers double-buffering of the inputs).
_VMEM_BLOCK_BUDGET = 4 << 20


# ----------------------------------------------------------------------------
# Contrast branch: rows = pixels, cols = (class * prototype) logits.
# ----------------------------------------------------------------------------
def _pick_tm(n, c):
    per_row = (c + 1) * 4 * 2                     # logits + target, 2 pipeline bufs
    tm = _VMEM_BLOCK_BUDGET // per_row
    tm = min(tm, 8192)
    tm = min(tm, pl.cdiv(n, 8) * 8)               # no more rows than needed
    tm = max(8, (tm // 8) * 8)
    return tm


def _make_ce_ppd_kernel(n, tm, ignore_index):
    tail = (n % tm) != 0

    def kernel(x_ref, t_ref, out_ref):
        x = x_ref[...]                            # (tm, C) f32
        t = t_ref[...]                            # (tm, 1) i32

        if tail:
            row = (jax.lax.broadcasted_iota(jnp.int32, (tm, 1), 0)
                   + pl.program_id(0) * tm)
            in_bounds = row < n
            t = jnp.where(in_bounds, t, ignore_index)
            x = jnp.where(in_bounds, x, 0.0)      # sanitize OOB rows (no NaN poison)

        valid = (t != ignore_index).astype(jnp.float32)   # (tm, 1)

        # log-sum-exp over the class (lane) axis
        m = jnp.max(x, axis=-1, keepdims=True)
        lse = m + jnp.log(jnp.sum(jnp.exp(x - m), axis=-1, keepdims=True))

        # gather logit at the target class via one-hot compare (VPU friendly)
        col = jax.lax.broadcasted_iota(jnp.int32, x.shape, 1)
        x_t = jnp.sum(jnp.where(col == t, x, 0.0), axis=-1, keepdims=True)

        ce_s = jnp.sum((lse - x_t) * valid)
        ppd_s = jnp.sum(((1.0 - x_t) ** 2) * valid)
        cnt = jnp.sum(valid)

        lane = jax.lax.broadcasted_iota(jnp.int32, (8, 128), 1)
        out_ref[...] = jnp.where(lane == 0, ce_s,
                       jnp.where(lane == 1, ppd_s,
                       jnp.where(lane == 2, cnt, 0.0)))

    return kernel


def _masked_ce_ppd(logits, targets, *, ignore_index=IGNORE_LABEL):
    """Returns (ce_sum, ppd_sum, valid_count) over rows with target != ignore."""
    logits = logits.astype(jnp.float32)
    targets = targets.astype(jnp.int32).reshape(-1, 1)   # matches .long() truncation
    n, c = logits.shape

    tm = _pick_tm(n, c)
    n_tiles = pl.cdiv(n, tm)

    out = pl.pallas_call(
        _make_ce_ppd_kernel(n, tm, ignore_index),
        out_shape=jax.ShapeDtypeStruct((n_tiles, 8, 128), jnp.float32),
        grid=(n_tiles,),
        in_specs=[
            pl.BlockSpec((tm, c), lambda i: (i, 0)),     # last dim == full C (no pad)
            pl.BlockSpec((tm, 1), lambda i: (i, 0)),
        ],
        out_specs=pl.BlockSpec((None, 8, 128), lambda i: (i, 0, 0)),
        compiler_params=pltpu.CompilerParams(
            dimension_semantics=("parallel",)),
    )(logits, targets)

    sums = jnp.sum(out, axis=0)
    return sums[0, 0], sums[0, 1], sums[0, 2]


# ----------------------------------------------------------------------------
# Seg branch: consumes NCHW logits directly (no XLA transpose pass).
# ----------------------------------------------------------------------------
def _pick_th(c, h, w):
    per_row = (c + 1) * w * 4 * 2                 # logits + target rows, 2 bufs
    rows = max(8, _VMEM_BLOCK_BUDGET // per_row)
    if rows >= h:
        return h                                  # full H: legal even if H % 8 != 0
    return max(8, (rows // 8) * 8)


def _make_seg_ce_kernel(num_classes, h, th, ignore_index):
    tail = (h % th) != 0

    def kernel(x_ref, t_ref, out_ref):
        t = t_ref[...]                            # (th, W) i32
        w = t.shape[-1]

        if tail:
            row = (jax.lax.broadcasted_iota(jnp.int32, (th, w), 0)
                   + pl.program_id(1) * th)
            row_ok = row < h
        else:
            row_ok = None

        # per-class slabs (static unroll; C is small, e.g. 4-19)
        xs = []
        for cls in range(num_classes):
            xc = x_ref[cls]                       # (th, W) f32
            if tail:
                xc = jnp.where(row_ok, xc, 0.0)   # sanitize OOB rows
            xs.append(xc)

        m = xs[0]
        for cls in range(1, num_classes):
            m = jnp.maximum(m, xs[cls])

        sumexp = jnp.zeros_like(m)
        x_t = jnp.zeros_like(m)
        for cls in range(num_classes):
            sumexp = sumexp + jnp.exp(xs[cls] - m)
            x_t = x_t + jnp.where(t == cls, xs[cls], 0.0)

        valid = t != ignore_index
        if tail:
            valid = jnp.logical_and(valid, row_ok)
        validf = valid.astype(jnp.float32)

        ce_s = jnp.sum((m + jnp.log(sumexp) - x_t) * validf)
        cnt = jnp.sum(validf)

        lane = jax.lax.broadcasted_iota(jnp.int32, (8, 128), 1)
        out_ref[...] = jnp.where(lane == 0, ce_s,
                       jnp.where(lane == 2, cnt, 0.0))

    return kernel


def _seg_ce_sums(seg, target, *, ignore_index=IGNORE_LABEL):
    """seg: (B, C, H, W) NCHW logits; target: (B, H, W) int labels."""
    seg = seg.astype(jnp.float32)
    target = target.astype(jnp.int32)
    b, c, h, w = seg.shape

    th = _pick_th(c, h, w)
    hn = pl.cdiv(h, th)

    out = pl.pallas_call(
        _make_seg_ce_kernel(c, h, th, ignore_index),
        out_shape=jax.ShapeDtypeStruct((b, hn, 8, 128), jnp.float32),
        grid=(b, hn),
        in_specs=[
            pl.BlockSpec((None, c, th, w), lambda bi, hi: (bi, 0, hi, 0)),
            pl.BlockSpec((None, th, w), lambda bi, hi: (bi, hi, 0)),
        ],
        out_specs=pl.BlockSpec((None, None, 8, 128),
                               lambda bi, hi: (bi, hi, 0, 0)),
        compiler_params=pltpu.CompilerParams(
            dimension_semantics=("parallel", "parallel")),
    )(seg, target)

    sums = jnp.sum(out, axis=(0, 1))
    return sums[0, 0], sums[0, 2]


# ----------------------------------------------------------------------------
# Module-level wrapper
# ----------------------------------------------------------------------------
class PixelPrototypeCELoss:
    """JAX/Pallas port of the ProtoSeg PixelPrototypeCELoss forward pass."""

    def __init__(self, loss_ppc_weight=0.01, loss_ppd_weight=0.001,
                 ignore_index=IGNORE_LABEL, seg_ignore_index=None):
        # deterministic in-script "configer" values (ProtoSeg defaults)
        self.loss_ppc_weight = loss_ppc_weight
        self.loss_ppd_weight = loss_ppd_weight
        self.ignore_index = ignore_index
        # The torch module uses a single ce_ignore_index for both seg CE and
        # PPC/PPD; expose a separate seg ignore label (e.g. 255 for Cityscapes).
        self.seg_ignore_index = (ignore_index if seg_ignore_index is None
                                 else seg_ignore_index)

    def _seg_ce(self, seg, target):
        ce_s, cnt = _seg_ce_sums(seg, target, ignore_index=self.seg_ignore_index)
        return ce_s / jnp.maximum(cnt, 1.0)

    def __call__(self, preds, target):
        if isinstance(preds, dict):
            assert 'seg' in preds and 'logits' in preds and 'target' in preds
            seg = preds['seg']
            contrast_logits = preds['logits']
            contrast_target = preds['target']

            ce_s, ppd_s, cnt = _masked_ce_ppd(
                contrast_logits, contrast_target, ignore_index=self.ignore_index)
            denom = jnp.maximum(cnt, 1.0)
            loss_ppc = ce_s / denom
            loss_ppd = ppd_s / denom

            seg_tgt = jnp.squeeze(target[0], axis=1).astype(jnp.int32)
            loss = self._seg_ce(seg, seg_tgt)
            return (loss
                    + self.loss_ppc_weight * loss_ppc
                    + self.loss_ppd_weight * loss_ppd)

        seg_tgt = jnp.squeeze(target[0], axis=1).astype(jnp.int32)
        return self._seg_ce(preds, seg_tgt)


if __name__ == "__main__":
    key = jax.random.PRNGKey(0)
    k1, k2, k3, k4, k5 = jax.random.split(key, 5)

    B, C, H, W = 2, 4, 16, 16        # seg logits: batch=2, classes=4, 16x16
    num_prototypes = 10
    K = C * num_prototypes           # contrast logits over class*prototype
    N = B * H * W                    # one contrast row per pixel

    seg = jax.random.normal(k1, (B, C, H, W), jnp.float32)
    contrast_logits = jax.random.normal(k2, (N, K), jnp.float32)

    ct = jax.random.randint(k3, (N,), 0, K)
    ignore_mask = jax.random.uniform(k4, (N,)) < 0.1
    contrast_target = jnp.where(ignore_mask, -1, ct).astype(jnp.float32)

    seg_target = jax.random.randint(k5, (B, 1, H, W), 0, C)

    loss_fn = PixelPrototypeCELoss(loss_ppc_weight=0.01, loss_ppd_weight=0.001)
    preds = {'seg': seg, 'logits': contrast_logits, 'target': contrast_target}

    loss = loss_fn(preds, (seg_target,))
    jax.block_until_ready(loss)
    assert jnp.isfinite(loss)
    print("KERNEL_OK")
</pallas_src>

<mosaic_0001>
module attributes {stable_mosaic.version = 11 : i64} {
  func.func @kernel(%arg0: i32, %arg1: memref<512x40xf32, #tpu.memory_space<vmem>>, %arg2: memref<512x1xi32, #tpu.memory_space<vmem>>, %arg3: memref<1x8x128xf32, #tpu.memory_space<vmem>>) attributes {dimension_semantics = [#tpu.dimension_semantics<parallel>], iteration_bounds = array<i64: 1>, scalar_prefetch = 0 : i64, scratch_operands = 0 : i64, tpu.core_type = #tpu.core_type<tc>, window_params = [{transform_indices = @transform_0, window_bounds = array<i64: 512, 40>}, {transform_indices = @transform_1, window_bounds = array<i64: 512, 1>}, {transform_indices = @transform_2, window_bounds = array<i64: 1, 8, 128>}]} {
    %c0 = arith.constant 0 : index
    %c0_0 = arith.constant 0 : index
    %0 = vector.load %arg1[%c0, %c0_0] : memref<512x40xf32, #tpu.memory_space<vmem>>, vector<512x40xf32>
    %c0_1 = arith.constant 0 : index
    %c0_2 = arith.constant 0 : index
    %1 = vector.load %arg2[%c0_1, %c0_2] : memref<512x1xi32, #tpu.memory_space<vmem>>, vector<512x1xi32>
    %c-1_i32 = arith.constant -1 : i32
    %2 = vector.broadcast %c-1_i32 : i32 to vector<512x1xi32>
    %3 = arith.cmpi ne, %1, %2 : vector<512x1xi32>
    %4 = arith.extui %3 : vector<512x1xi1> to vector<512x1xi32>
    %5 = arith.sitofp %4 : vector<512x1xi32> to vector<512x1xf32>
    %cst = arith.constant dense<0xFF800000> : vector<512xf32>
    %6 = vector.multi_reduction <maximumf>, %0, %cst [1] : vector<512x40xf32> to vector<512xf32>
    %7 = vector.shape_cast %6 : vector<512xf32> to vector<512x1xf32>
    %8 = vector.broadcast %7 : vector<512x1xf32> to vector<512x40xf32>
    %9 = arith.subf %0, %8 : vector<512x40xf32>
    %10 = math.exp %9 : vector<512x40xf32>
    %cst_3 = arith.constant dense<0.000000e+00> : vector<512xf32>
    %11 = vector.multi_reduction <add>, %10, %cst_3 [1] : vector<512x40xf32> to vector<512xf32>
    %12 = vector.shape_cast %11 : vector<512xf32> to vector<512x1xf32>
    %13 = math.log %12 : vector<512x1xf32>
    %14 = arith.addf %7, %13 : vector<512x1xf32>
    %15 = tpu.iota {dimensions = array<i32: 1>} : vector<512x40xi32>
    %16 = vector.broadcast %1 : vector<512x1xi32> to vector<512x40xi32>
    %17 = arith.cmpi eq, %15, %16 : vector<512x40xi32>
    %cst_4 = arith.constant 0.000000e+00 : f32
    %18 = vector.broadcast %cst_4 : f32 to vector<512x40xf32>
    %19 = arith.select %17, %0, %18 : vector<512x40xi1>, vector<512x40xf32>
    %cst_5 = arith.constant dense<0.000000e+00> : vector<512xf32>
    %20 = vector.multi_reduction <add>, %19, %cst_5 [1] : vector<512x40xf32> to vector<512xf32>
    %21 = vector.shape_cast %20 : vector<512xf32> to vector<512x1xf32>
    %22 = arith.subf %14, %21 : vector<512x1xf32>
    %23 = arith.mulf %22, %5 : vector<512x1xf32>
    %24 = vector.shape_cast %23 : vector<512x1xf32> to vector<1x512x1xf32>
    %cst_6 = arith.constant dense<0.000000e+00> : vector<1xf32>
    %25 = vector.multi_reduction <add>, %24, %cst_6 [1, 2] : vector<1x512x1xf32> to vector<1xf32>
    %26 = vector.shape_cast %25 : vector<1xf32> to vector<1x1x1xf32>
    %27 = vector.extract %26[0, 0, 0] : f32 from vector<1x1x1xf32>
    %cst_7 = arith.constant 1.000000e+00 : f32
    %28 = vector.broadcast %cst_7 : f32 to vector<512x1xf32>
    %29 = arith.subf %28, %21 : vector<512x1xf32>
    %30 = arith.mulf %29, %29 : vector<512x1xf32>
    %31 = arith.mulf %30, %5 : vector<512x1xf32>
    %32 = vector.shape_cast %31 : vector<512x1xf32> to vector<1x512x1xf32>
    %cst_8 = arith.constant dense<0.000000e+00> : vector<1xf32>
    %33 = vector.multi_reduction <add>, %32, %cst_8 [1, 2] : vector<1x512x1xf32> to vector<1xf32>
    %34 = vector.shape_cast %33 : vector<1xf32> to vector<1x1x1xf32>
    %35 = vector.extract %34[0, 0, 0] : f32 from vector<1x1x1xf32>
    %36 = vector.shape_cast %5 : vector<512x1xf32> to vector<1x512x1xf32>
    %cst_9 = arith.constant dense<0.000000e+00> : vector<1xf32>
    %37 = vector.multi_reduction <add>, %36, %cst_9 [1, 2] : vector<1x512x1xf32> to vector<1xf32>
    %38 = vector.shape_cast %37 : vector<1xf32> to vector<1x1x1xf32>
    %39 = vector.extract %38[0, 0, 0] : f32 from vector<1x1x1xf32>
    %40 = tpu.iota {dimensions = array<i32: 1>} : vector<8x128xi32>
    %c0_i32 = arith.constant 0 : i32
    %41 = vector.broadcast %c0_i32 : i32 to vector<8x128xi32>
    %42 = arith.cmpi eq, %40, %41 : vector<8x128xi32>
    %c1_i32 = arith.constant 1 : i32
    %43 = vector.broadcast %c1_i32 : i32 to vector<8x128xi32>
    %44 = arith.cmpi eq, %40, %43 : vector<8x128xi32>
    %c2_i32 = arith.constant 2 : i32
    %45 = vector.broadcast %c2_i32 : i32 to vector<8x128xi32>
    %46 = arith.cmpi eq, %40, %45 : vector<8x128xi32>
    %cst_10 = arith.constant 0.000000e+00 : f32
    %47 = vector.broadcast %39 : f32 to vector<8x128xf32>
    %48 = vector.broadcast %cst_10 : f32 to vector<8x128xf32>
    %49 = arith.select %46, %47, %48 : vector<8x128xi1>, vector<8x128xf32>
    %50 = vector.broadcast %35 : f32 to vector<8x128xf32>
    %51 = arith.select %44, %50, %49 : vector<8x128xi1>, vector<8x128xf32>
    %52 = vector.broadcast %27 : f32 to vector<8x128xf32>
    %53 = arith.select %42, %52, %51 : vector<8x128xi1>, vector<8x128xf32>
    %c0_11 = arith.constant 0 : index
    %c0_12 = arith.constant 0 : index
    %c0_13 = arith.constant 0 : index
    %54 = vector.load %arg3[%c0_11, %c0_12, %c0_13] : memref<1x8x128xf32, #tpu.memory_space<vmem>>, vector<1x8x128xf32>
    %55 = vector.shape_cast %54 : vector<1x8x128xf32> to vector<8x128xf32>
    %56 = vector.shape_cast %53 : vector<8x128xf32> to vector<1x8x128xf32>
    tpu.vector_store %arg3[%c0_11, %c0_12, %c0_13], %56 {strides = array<i32>} : memref<1x8x128xf32, #tpu.memory_space<vmem>>, vector<1x8x128xf32>,
    return
  }
  func.func @transform_0(%arg0: i32) -> (i32, i32) {
    %c0_i32 = arith.constant 0 : i32
    %c0_i32_0 = arith.constant 0 : i32
    return %arg0, %c0_i32 : i32, i32
  }
  func.func @transform_1(%arg0: i32) -> (i32, i32) {
    %c0_i32 = arith.constant 0 : i32
    %c0_i32_0 = arith.constant 0 : i32
    return %arg0, %c0_i32 : i32, i32
  }
  func.func @transform_2(%arg0: i32) -> (i32, i32, i32) {
    %c0_i32 = arith.constant 0 : i32
    %c0_i32_0 = arith.constant 0 : i32
    %c0_i32_1 = arith.constant 0 : i32
    return %arg0, %c0_i32, %c0_i32_0 : i32, i32, i32
  }
}

</mosaic_0001>

<bundles_post_ra>
// kernel: tpu_custom_call.1
= control target key start
LH: loop header
LB: loop body
LE: loop exit
PB: predicated region body
PF: predicated region fallthrough
CT: control target
= control target key end

     0   :  { %vm332_vm0 = vcmask 326656   ;;  %s5726_s0 = inlined_call_operand.vmem [shape: f32[512,40], index: 0, kind: input, shape index: {}]   ;;  %s5727_s1 = inlined_call_operand.vmem [shape: s32[512,1], index: 1, kind: input, shape index: {}]   ;;  %s5728_s2 = inlined_call_operand.hbm [shape: f32[1,8,128], index: 2, kind: output, shape index: {}]  }
   0x1   :  { %v2832_v0 = vld [vmem:[%s5726_s0] sm:$0xff]  ;;  %v2837_v1 = vld [vmem:[%s5726_s0 + $0x10] sm:$0xff]  ;;  %v2842_v2 = vld [vmem:[%s5726_s0 + $0x8] sm:$0xff] }
   0x2   :  { %v333_v3 = vsel %vm332_vm0, %v2832_v0, -inf  ;;  %v339_v4 = vsel %vm332_vm0, %v2837_v1, -inf  ;;  %v2851_v5 = vld [vmem:[%s5726_s0 + $0x18] sm:$0xff]  ;;  %v336_v6 = vsel %vm332_vm0, %v2842_v2, -inf  ;;  %v2860_v8 = vld [vmem:[%s5726_s0 + $0x20] sm:$0xff]  ;;  %v2865_v9 = vld [vmem:[%s5726_s0 + $0x28] sm:$0xff] }
   0x3   :  { %334 = vmax.xlane.f32.xlu0 %v333_v3  ;;  %340 = vmax.xlane.f32.xlu1 %v339_v4  ;;  %v342_v7 = vsel %vm332_vm0, %v2851_v5, -inf  ;;  %v345_v10 = vsel %vm332_vm0, %v2860_v8, -inf  ;;  %v348_v11 = vsel %vm332_vm0, %v2865_v9, -inf  ;;  %v2874_v12 = vld [vmem:[%s5726_s0 + $0x30] sm:$0xff]  ;;  %v2879_v13 = vld [vmem:[%s5726_s0 + $0x38] sm:$0xff]  ;;  %v2888_v16 = vld [vmem:[%s5726_s0 + $0x40] sm:$0xff] }
   0x4   :  { %v351_v14 = vsel %vm332_vm0, %v2874_v12, -inf  ;;  %v354_v15 = vsel %vm332_vm0, %v2879_v13, -inf  ;;  %v2893_v17 = vld [vmem:[%s5726_s0 + $0x48] sm:$0xff]  ;;  %v357_v18 = vsel %vm332_vm0, %v2888_v16, -inf  ;;  %v2902_v20 = vld [vmem:[%s5726_s0 + $0x50] sm:$0xff]  ;;  %v2907_v21 = vld [vmem:[%s5726_s0 + $0x58] sm:$0xff] }
   0x5   :  { %v360_v19 = vsel %vm332_vm0, %v2893_v17, -inf  ;;  %v363_v22 = vsel %vm332_vm0, %v2902_v20, -inf  ;;  %v366_v23 = vsel %vm332_vm0, %v2907_v21, -inf  ;;  %v2916_v24 = vld [vmem:[%s5726_s0 + $0x60] sm:$0xff]  ;;  %v2921_v25 = vld [vmem:[%s5726_s0 + $0x68] sm:$0xff] }
   0x7   :  { %337 = vmax.xlane.f32.xlu0 %v336_v6  ;;  %343 = vmax.xlane.f32.xlu1 %v342_v7 }
   0xb   :  { %346 = vmax.xlane.f32.xlu0 %v345_v10  ;;  %349 = vmax.xlane.f32.xlu1 %v348_v11 }
   0xf   :  { %352 = vmax.xlane.f32.xlu0 %v351_v14  ;;  %355 = vmax.xlane.f32.xlu1 %v354_v15 }
  0x13   :  { %358 = vmax.xlane.f32.xlu0 %v357_v18  ;;  %361 = vmax.xlane.f32.xlu1 %v360_v19 }
  0x14   :  { %7 = vsyncpa [#allocation3], 0  ;;  %v369_v26 = vsel %vm332_vm0, %v2916_v24, -inf  ;;  %v372_v27 = vsel %vm332_vm0, %v2921_v25, -inf  ;;  %v2930_v28 = vld [vmem:[%s5726_s0 + $0x70] sm:$0xff]  ;;  %v2935_v29 = vld [vmem:[%s5726_s0 + $0x78] sm:$0xff] }
  0x15   :  { %v375_v30 = vsel %vm332_vm0, %v2930_v28, -inf  ;;  %v378_v31 = vsel %vm332_vm0, %v2935_v29, -inf  ;;  %v2944_v32 = vld [vmem:[%s5726_s0 + $0x80] sm:$0xff]  ;;  %v2949_v33 = vld [vmem:[%s5726_s0 + $0x88] sm:$0xff]  ;;  %v2958_v36 = vld [vmem:[%s5726_s0 + $0x90] sm:$0xff]  ;;  %vm1743_vm12 = vcmask 7168  }
  0x16   :  { %v381_v34 = vsel %vm332_vm0, %v2944_v32, -inf  ;;  %v384_v35 = vsel %vm332_vm0, %v2949_v33, -inf  ;;  %v2963_v37 = vld [vmem:[%s5726_s0 + $0x98] sm:$0xff]  ;;  %v387_v38 = vsel %vm332_vm0, %v2958_v36, -inf  ;;  %v2972_v40 = vld [vmem:[%s5726_s0 + $0xa0] sm:$0xff]  ;;  %v2977_v41 = vld [vmem:[%s5726_s0 + $0xa8] sm:$0xff] }
  0x17   :  { %364 = vmax.xlane.f32.xlu0 %v363_v22  ;;  %367 = vmax.xlane.f32.xlu1 %v366_v23  ;;  %v390_v39 = vsel %vm332_vm0, %v2963_v37, -inf  ;;  %v393_v42 = vsel %vm332_vm0, %v2972_v40, -inf  ;;  %v396_v43 = vsel %vm332_vm0, %v2977_v41, -inf  ;;  %v2986_v44 = vld [vmem:[%s5726_s0 + $0xb0] sm:$0xff]  ;;  %v2991_v45 = vld [vmem:[%s5726_s0 + $0xb8] sm:$0xff]  ;;  %v3000_v48 = vld [vmem:[%s5726_s0 + $0xc0] sm:$0xff] }
  0x18   :  { %v399_v46 = vsel %vm332_vm0, %v2986_v44, -inf  ;;  %v402_v47 = vsel %vm332_vm0, %v2991_v45, -inf  ;;  %v3005_v49 = vld [vmem:[%s5726_s0 + $0xc8] sm:$0xff]  ;;  %v405_v50 = vsel %vm332_vm0, %v3000_v48, -inf  ;;  %v3014_v52 = vld [vmem:[%s5726_s0 + $0xd0] sm:$0xff]  ;;  %v3019_v53 = vld [vmem:[%s5726_s0 + $0xd8] sm:$0xff] }
  0x19   :  { %v408_v51 = vsel %vm332_vm0, %v3005_v49, -inf  ;;  %v411_v54 = vsel %vm332_vm0, %v3014_v52, -inf  ;;  %v414_v55 = vsel %vm332_vm0, %v3019_v53, -inf  ;;  %v3028_v56 = vld [vmem:[%s5726_s0 + $0xe0] sm:$0xff]  ;;  %v3033_v57 = vld [vmem:[%s5726_s0 + $0xe8] sm:$0xff]  ;;  %v3042_v60 = vld [vmem:[%s5726_s0 + $0xf0] sm:$0xff] }
  0x1a   :  { %v417_v58 = vsel %vm332_vm0, %v3028_v56, -inf  ;;  %v420_v59 = vsel %vm332_vm0, %v3033_v57, -inf  ;;  %v3047_v61 = vld [vmem:[%s5726_s0 + $0xf8] sm:$0xff]  ;;  %v423_v62 = vsel %vm332_vm0, %v3042_v60, -inf  ;;  %v3056_v3 = vld [vmem:[%s5726_s0 + $0x100] sm:$0xff]  ;;  %v3061_v4 = vld [vmem:[%s5726_s0 + $0x108] sm:$0xff] }
  0x1b   :  { %370 = vmax.xlane.f32.xlu0 %v369_v26  ;;  %373 = vmax.xlane.f32.xlu1 %v372_v27  ;;  %v426_v63 = vsel %vm332_vm0, %v3047_v61, -inf  ;;  %v429_v6 = vsel %vm332_vm0, %v3056_v3, -inf  ;;  %v432_v7 = vsel %vm332_vm0, %v3061_v4, -inf  ;;  %v3070_v10 = vld [vmem:[%s5726_s0 + $0x110] sm:$0xff]  ;;  %v3075_v11 = vld [vmem:[%s5726_s0 + $0x118] sm:$0xff]  ;;  %v3084_v18 = vld [vmem:[%s5726_s0 + $0x120] sm:$0xff] }
  0x1c   :  { %v435_v14 = vsel %vm332_vm0, %v3070_v10, -inf  ;;  %v438_v15 = vsel %vm332_vm0, %v3075_v11, -inf  ;;  %v3089_v19 = vld [vmem:[%s5726_s0 + $0x128] sm:$0xff]  ;;  %v441_v22 = vsel %vm332_vm0, %v3084_v18, -inf  ;;  %v3098_v26 = vld [vmem:[%s5726_s0 + $0x130] sm:$0xff]  ;;  %v3103_v27 = vld [vmem:[%s5726_s0 + $0x138] sm:$0xff] }
  0x1d   :  { %v444_v23 = vsel %vm332_vm0, %v3089_v19, -inf  ;;  %s2813_s22 = smov [#allocation2]  }
  0x1e   :  { %s2360_s23 = sshll.u32 %s2813_s22, 4  ;;  %s2361_s23 = int_to_ptr.vmem [resolvable:$true] %s2360_s23 }
  0x1f   :  { %376 = vmax.xlane.f32.xlu0 %v375_v30  ;;  %379 = vmax.xlane.f32.xlu1 %v378_v31  ;;  %v447_v30 = vsel %vm332_vm0, %v3098_v26, -inf  ;;  %v450_v31 = vsel %vm332_vm0, %v3103_v27, -inf  ;;  %s2787_s24 = scalar_lea.vmem %s2361_s23, 128  ;;  %p2792_p1 = scmp.lt.s32.totalorder %s2361_s23, %s2361_s23 }
  0x20   :  { %p2788_p0 = scmp.ne.s32.totalorder %s2361_s23, %s2787_s24  ;;  %p2793_p2 = scmp.lt.s32.totalorder %s2787_s24, %s2787_s24 }
  0x22   :  { %p2794_p3 = por %p2793_p2, %p2792_p1 }
  0x23   :  { %382 = vmax.xlane.f32.xlu0 %v381_v34  ;;  %385 = vmax.xlane.f32.xlu1 %v384_v35  ;;  %v3112_v34 = vld [vmem:[%s5726_s0 + $0x140] sm:$0xff]  ;;  %v3117_v35 = vld [vmem:[%s5726_s0 + $0x148] sm:$0xff] }
  0x24   :  { %p2795_p4 = pnand %p2794_p3, %p2788_p0 }
  0x27   :  { %388 = vmax.xlane.f32.xlu0 %v387_v38  ;;  %391 = vmax.xlane.f32.xlu1 %v390_v39  ;;  %v453_v38 = vsel %vm332_vm0, %v3112_v34, -inf  ;;  %v456_v39 = vsel %vm332_vm0, %v3117_v35, -inf }
  0x2b   :  { %394 = vmax.xlane.f32.xlu0 %v393_v42  ;;  %397 = vmax.xlane.f32.xlu1 %v396_v43  ;;  %v3126_v42 = vld [vmem:[%s5726_s0 + $0x150] sm:$0xff]  ;;  %v3131_v43 = vld [vmem:[%s5726_s0 + $0x158] sm:$0xff] }
  0x2f   :  { %400 = vmax.xlane.f32.xlu0 %v399_v46  ;;  %403 = vmax.xlane.f32.xlu1 %v402_v47  ;;  %v459_v46 = vsel %vm332_vm0, %v3126_v42, -inf  ;;  %v462_v47 = vsel %vm332_vm0, %v3131_v43, -inf }
  0x33   :  { %406 = vmax.xlane.f32.xlu0 %v405_v50  ;;  %409 = vmax.xlane.f32.xlu1 %v408_v51  ;;  %v3140_v50 = vld [vmem:[%s5726_s0 + $0x160] sm:$0xff]  ;;  %v3145_v51 = vld [vmem:[%s5726_s0 + $0x168] sm:$0xff] }
  0x37   :  { %412 = vmax.xlane.f32.xlu0 %v411_v54  ;;  %415 = vmax.xlane.f32.xlu1 %v414_v55  ;;  %v465_v54 = vsel %vm332_vm0, %v3140_v50, -inf  ;;  %v468_v55 = vsel %vm332_vm0, %v3145_v51, -inf }
  0x3b   :  { %418 = vmax.xlane.f32.xlu0 %v417_v58  ;;  %421 = vmax.xlane.f32.xlu1 %v420_v59  ;;  %v3154_v58 = vld [vmem:[%s5726_s0 + $0x170] sm:$0xff]  ;;  %v3159_v59 = vld [vmem:[%s5726_s0 + $0x178] sm:$0xff] }
  0x3f   :  { %424 = vmax.xlane.f32.xlu0 %v423_v62  ;;  %427 = vmax.xlane.f32.xlu1 %v426_v63  ;;  %v471_v62 = vsel %vm332_vm0, %v3154_v58, -inf  ;;  %v474_v63 = vsel %vm332_vm0, %v3159_v59, -inf }
  0x43   :  { %430 = vmax.xlane.f32.xlu0 %v429_v6  ;;  %433 = vmax.xlane.f32.xlu1 %v432_v7  ;;  %v3168_v6 = vld [vmem:[%s5726_s0 + $0x180] sm:$0xff]  ;;  %v3173_v7 = vld [vmem:[%s5726_s0 + $0x188] sm:$0xff] }
  0x47   :  { %436 = vmax.xlane.f32.xlu0 %v435_v14  ;;  %439 = vmax.xlane.f32.xlu1 %v438_v15  ;;  %v477_v14 = vsel %vm332_vm0, %v3168_v6, -inf  ;;  %v480_v15 = vsel %vm332_vm0, %v3173_v7, -inf }
  0x4b   :  { %442 = vmax.xlane.f32.xlu0 %v441_v22  ;;  %445 = vmax.xlane.f32.xlu1 %v444_v23  ;;  %v3182_v22 = vld [vmem:[%s5726_s0 + $0x190] sm:$0xff]  ;;  %v3187_v23 = vld [vmem:[%s5726_s0 + $0x198] sm:$0xff] }
  0x4f   :  { %448 = vmax.xlane.f32.xlu0 %v447_v30  ;;  %451 = vmax.xlane.f32.xlu1 %v450_v31  ;;  %v483_v30 = vsel %vm332_vm0, %v3182_v22, -inf  ;;  %v486_v31 = vsel %vm332_vm0, %v3187_v23, -inf }
  0x53   :  { %454 = vmax.xlane.f32.xlu0 %v453_v38  ;;  %457 = vmax.xlane.f32.xlu1 %v456_v39  ;;  %v3196_v38 = vld [vmem:[%s5726_s0 + $0x1a0] sm:$0xff]  ;;  %v3201_v39 = vld [vmem:[%s5726_s0 + $0x1a8] sm:$0xff] }
  0x54   :  { %5921 = vst [vmem:[#allocation5_spill] sm:$0xff] %v3196_v38  ;;  %5922 = vst [vmem:[#allocation6_spill] sm:$0xff] %v3201_v39 }
  0x57   :  { %460 = vmax.xlane.f32.xlu0 %v459_v46  ;;  %463 = vmax.xlane.f32.xlu1 %v462_v47  ;;  %v489_v46 = vsel %vm332_vm0, %v3196_v38, -inf  ;;  %v492_v47 = vsel %vm332_vm0, %v3201_v39, -inf }
  0x5b   :  { %466 = vmax.xlane.f32.xlu0 %v465_v54  ;;  %469 = vmax.xlane.f32.xlu1 %v468_v55  ;;  %v3210_v54 = vld [vmem:[%s5726_s0 + $0x1b0] sm:$0xff]  ;;  %v3215_v55 = vld [vmem:[%s5726_s0 + $0x1b8] sm:$0xff] }
  0x5c   :  { %5923 = vst [vmem:[#allocation7_spill] sm:$0xff] %v3210_v54  ;;  %5924 = vst [vmem:[#allocation8_spill] sm:$0xff] %v3215_v55 }
  0x5f   :  { %472 = vmax.xlane.f32.xlu0 %v471_v62  ;;  %475 = vmax.xlane.f32.xlu1 %v474_v63  ;;  %v495_v62 = vsel %vm332_vm0, %v3210_v54, -inf  ;;  %v498_v63 = vsel %vm332_vm0, %v3215_v55, -inf }
  0x63   :  { %478 = vmax.xlane.f32.xlu0 %v477_v14  ;;  %481 = vmax.xlane.f32.xlu1 %v480_v15  ;;  %v3224_v14 = vld [vmem:[%s5726_s0 + $0x1c0] sm:$0xff]  ;;  %v3229_v15 = vld [vmem:[%s5726_s0 + $0x1c8] sm:$0xff] }
  0x64   :  { %5925 = vst [vmem:[#allocation9_spill] sm:$0xff] %v3224_v14  ;;  %5926 = vst [vmem:[#allocation10_spill] sm:$0xff] %v3229_v15 }
  0x67   :  { %484 = vmax.xlane.f32.xlu0 %v483_v30  ;;  %487 = vmax.xlane.f32.xlu1 %v486_v31  ;;  %v501_v30 = vsel %vm332_vm0, %v3224_v14, -inf  ;;  %v504_v31 = vsel %vm332_vm0, %v3229_v15, -inf  ;;  %v3252_v15 = vld [vmem:[%s5726_s0 + $0x1e0] sm:$0xff]  ;;  %v3257_v14 = vld [vmem:[%s5726_s0 + $0x1e8] sm:$0xff] }
  0x68   :  { %5929 = vst [vmem:[#allocation13_spill] sm:$0xff] %v3252_v15  ;;  %5930 = vst [vmem:[#allocation14_spill] sm:$0xff] %v3257_v14 }
  0x6b   :  { %490 = vmax.xlane.f32.xlu0 %v489_v46  ;;  %493 = vmax.xlane.f32.xlu1 %v492_v47  ;;  %v3238_v46 = vld [vmem:[%s5726_s0 + $0x1d0] sm:$0xff]  ;;  %v3243_v47 = vld [vmem:[%s5726_s0 + $0x1d8] sm:$0xff] }
  0x6c   :  { %5927 = vst [vmem:[#allocation11_spill] sm:$0xff] %v3238_v46  ;;  %5928 = vst [vmem:[#allocation12_spill] sm:$0xff] %v3243_v47 }
  0x6f   :  { %496 = vmax.xlane.f32.xlu0 %v495_v62  ;;  %499 = vmax.xlane.f32.xlu1 %v498_v63  ;;  %v507_v62 = vsel %vm332_vm0, %v3238_v46, -inf  ;;  %v510_v63 = vsel %vm332_vm0, %v3243_v47, -inf  ;;  %v3266_v47 = vld [vmem:[%s5726_s0 + $0x1f0] sm:$0xff]  ;;  %v3271_v46 = vld [vmem:[%s5726_s0 + $0x1f8] sm:$0xff] }
  0x70   :  { %5931 = vst [vmem:[#allocation15_spill] sm:$0xff] %v3266_v47  ;;  %5932 = vst [vmem:[#allocation16_spill] sm:$0xff] %v3271_v46 }
  0x73   :  { %502 = vmax.xlane.f32.xlu0 %v501_v30  ;;  %505 = vmax.xlane.f32.xlu1 %v504_v31  ;;  %v513_v30 = vsel %vm332_vm0, %v3252_v15, -inf  ;;  %v516_v31 = vsel %vm332_vm0, %v3257_v14, -inf }
  0x77   :  { %508 = vmax.xlane.f32.xlu0 %v507_v62  ;;  %511 = vmax.xlane.f32.xlu1 %v510_v63  ;;  %v519_v62 = vsel %vm332_vm0, %v3266_v47, -inf  ;;  %v522_v63 = vsel %vm332_vm0, %v3271_v46, -inf }
  0x7b   :  { %514 = vmax.xlane.f32.xlu0 %v513_v30  ;;  %517 = vmax.xlane.f32.xlu1 %v516_v31 }
  0x7f   :  { %520 = vmax.xlane.f32.xlu0 %v519_v62  ;;  %523 = vmax.xlane.f32.xlu1 %v522_v63 }
  0x90   :  { %v3277_v14 = vpop.xlane.xlu0 %334  ;;  %v3279_v15 = vpop.xlane.xlu1 %340 }
  0x91   :  { %5933 = vst [vmem:[#allocation17_spill] sm:$0xff] %v3277_v14  ;;  %v525_v55 = vsub.f32 %v2832_v0, %v3277_v14  ;;  %v527_v54 = vsub.f32 %v2837_v1, %v3279_v15 }
  0x93   :  { %v589_v30 = vmul.f32 1.442695, %v525_v55  ;;  %v593_v31 = vmul.f32 1.442695, %v527_v54 }
  0x94   :  { %v3285_v39 = vpop.xlane.xlu0 %337  ;;  %v3287_v47 = vpop.xlane.xlu1 %343 }
  0x95   :  { %2443 = vpow2.f32 %v589_v30  ;;  %v526_v62 = vsub.f32 %v2842_v2, %v3285_v39  ;;  %v528_v63 = vsub.f32 %v2851_v5, %v3287_v47 }
  0x96   :  { %2445 = vpow2.f32 %v593_v31 }
  0x97   :  { %v591_v46 = vmul.f32 1.442695, %v526_v62  ;;  %v595_v38 = vmul.f32 1.442695, %v528_v63 }
  0x98   :  { %v3293_v0 = vpop.xlane.xlu0 %346  ;;  %v3295_v14 = vpop.xlane.xlu1 %349 }
  0x99   :  { %5934 = vst [vmem:[#allocation18_spill] sm:$0xff] %v3293_v0  ;;  %2447 = vpow2.f32 %v591_v46  ;;  %v529_v1 = vsub.f32 %v2860_v8, %v3293_v0  ;;  %v530_v54 = vsub.f32 %v2865_v9, %v3295_v14 }
  0x9a   :  { %2449 = vpow2.f32 %v595_v38 }
  0x9b   :  { %v597_v55 = vmul.f32 1.442695, %v529_v1  ;;  %v599_v2 = vmul.f32 1.442695, %v530_v54 }
  0x9c   :  { %v3301_v30 = vpop.xlane.xlu0 %352  ;;  %v3303_v5 = vpop.xlane.xlu1 %355 }
  0x9d   :  { %5935 = vst [vmem:[#allocation19_spill] sm:$0xff] %v3301_v30  ;;  %5936 = vst [vmem:[#allocation20_spill] sm:$0xff] %v3303_v5  ;;  %2451 = vpow2.f32 %v597_v55  ;;  %v531_v31 = vsub.f32 %v2874_v12, %v3301_v30  ;;  %v532_v46 = vsub.f32 %v2879_v13, %v3303_v5 }
  0x9e   :  { %2453 = vpow2.f32 %v599_v2 }
  0x9f   :  { %v2444_v62 = vpop.eup %2443  ;;  %v601_v8 = vmul.f32 1.442695, %v531_v31  ;;  %v603_v63 = vmul.f32 1.442695, %v532_v46 }
  0xa0   :  { %v2446_v0 = vpop.eup %2445  ;;  %v3309_v9 = vpop.xlane.xlu0 %358  ;;  %v717_v38 = vsel %vm332_vm0, %v2444_v62, 0.0 }
  0xa1   :  { %5937 = vst [vmem:[#allocation21_spill] sm:$0xff] %v3309_v9  ;;  %v3312_v1 = vpop.xlane.xlu1 %361  ;;  %2455 = vpow2.f32 %v601_v8  ;;  %v533_v54 = vsub.f32 %v2888_v16, %v3309_v9  ;;  %718 = vadd.xlane.f32.xlu0 %v717_v38  ;;  %v723_v13 = vsel %vm332_vm0, %v2446_v0, 0.0  ;;  %v118_v9 = vld [vmem:[%s5727_s1 + $0x150] sm:$0xff] }
  0xa2   :  { %5938 = vst [vmem:[#allocation22_spill] sm:$0xff] %v3312_v1  ;;  %v534_v12 = vsub.f32 %v2893_v17, %v3312_v1  ;;  %2457 = vpow2.f32 %v603_v63  ;;  %v4023_v1 = vld [vmem:[%s5727_s1 + $0x138] sm:$0xff] }
  0xa3   :  { %v2448_v55 = vpop.eup %2447  ;;  %v605_v2 = vmul.f32 1.442695, %v533_v54  ;;  %6062 = vst [vmem:[#allocation122_spill] sm:$0xff] %v4023_v1 }
  0xa4   :  { %v607_v31 = vmul.f32 1.442695, %v534_v12  ;;  %v2450_v46 = vpop.eup %2449  ;;  %v3319_v5 = vpop.xlane.xlu0 %364  ;;  %v720_v62 = vsel %vm332_vm0, %v2448_v55, 0.0 }
  0xa5   :  { %5939 = vst [vmem:[#allocation23_spill] sm:$0xff] %v3319_v5  ;;  %v3322_v30 = vpop.xlane.xlu1 %367  ;;  %2459 = vpow2.f32 %v605_v2  ;;  %v535_v16 = vsub.f32 %v2902_v20, %v3319_v5  ;;  %724 = vadd.xlane.f32.xlu0 %v723_v13  ;;  %721 = vadd.xlane.f32.xlu1 %v720_v62  ;;  %v726_v0 = vsel %vm332_vm0, %v2450_v46, 0.0 }
  0xa6   :  { %5940 = vst [vmem:[#allocation24_spill] sm:$0xff] %v3322_v30  ;;  %v536_v17 = vsub.f32 %v2907_v21, %v3322_v30  ;;  %2461 = vpow2.f32 %v607_v31 }
  0xa7   :  { %v2452_v8 = vpop.eup %2451  ;;  %v609_v63 = vmul.f32 1.442695, %v535_v16 }
  0xa8   :  { %v611_v38 = vmul.f32 1.442695, %v536_v17  ;;  %v2454_v54 = vpop.eup %2453  ;;  %v3329_v12 = vpop.xlane.xlu0 %370  ;;  %v729_v55 = vsel %vm332_vm0, %v2452_v8, 0.0 }
  0xa9   :  { %5941 = vst [vmem:[#allocation25_spill] sm:$0xff] %v3329_v12  ;;  %v3332_v2 = vpop.xlane.xlu1 %373  ;;  %2463 = vpow2.f32 %v609_v63  ;;  %v537_v20 = vsub.f32 %v2916_v24, %v3329_v12  ;;  %727 = vadd.xlane.f32.xlu1 %v726_v0  ;;  %730 = vadd.xlane.f32.xlu0 %v729_v55  ;;  %v732_v13 = vsel %vm332_vm0, %v2454_v54, 0.0 }
  0xaa   :  { %5942 = vst [vmem:[#allocation26_spill] sm:$0xff] %v3332_v2  ;;  %v538_v21 = vsub.f32 %v2921_v25, %v3332_v2  ;;  %2465 = vpow2.f32 %v611_v38 }
  0xab   :  { %v2456_v31 = vpop.eup %2455  ;;  %v613_v46 = vmul.f32 1.442695, %v537_v20 }
  0xac   :  { %v615_v62 = vmul.f32 1.442695, %v538_v21  ;;  %v2458_v16 = vpop.eup %2457  ;;  %v3339_v17 = vpop.xlane.xlu0 %376  ;;  %v735_v8 = vsel %vm332_vm0, %v2456_v31, 0.0 }
  0xad   :  { %5943 = vst [vmem:[#allocation27_spill] sm:$0xff] %v3339_v17  ;;  %v3342_v63 = vpop.xlane.xlu1 %379  ;;  %2467 = vpow2.f32 %v613_v46  ;;  %v539_v24 = vsub.f32 %v2930_v28, %v3339_v17  ;;  %733 = vadd.xlane.f32.xlu1 %v732_v13  ;;  %736 = vadd.xlane.f32.xlu0 %v735_v8  ;;  %v738_v0 = vsel %vm332_vm0, %v2458_v16, 0.0 }
  0xae   :  { %5944 = vst [vmem:[#allocation28_spill] sm:$0xff] %v3342_v63  ;;  %v540_v25 = vsub.f32 %v2935_v29, %v3342_v63  ;;  %2469 = vpow2.f32 %v615_v62  ;;  %v2811_v62 = vmov 0   ;;  %v117_v63 = vld [vmem:[%s5727_s1 + $0x148] sm:$0xff] }
  0xaf   :  { %v2460_v38 = vpop.eup %2459  ;;  %v617_v54 = vmul.f32 1.442695, %v539_v24  ;;  %2442 = vset.pattern.permute.xlu1 %v2811_v62  ;;  %2441 = vset.pattern.permute.xlu0 %v2811_v62 }
  0xb0   :  { %v619_v55 = vmul.f32 1.442695, %v540_v25  ;;  %v2462_v20 = vpop.eup %2461  ;;  %v3349_v21 = vpop.xlane.xlu0 %382  ;;  %v741_v31 = vsel %vm332_vm0, %v2460_v38, 0.0 }
  0xb1   :  { %5945 = vst [vmem:[#allocation29_spill] sm:$0xff] %v3349_v21  ;;  %v3352_v46 = vpop.xlane.xlu1 %385  ;;  %2471 = vpow2.f32 %v617_v54  ;;  %v541_v28 = vsub.f32 %v2944_v32, %v3349_v21  ;;  %739 = vadd.xlane.f32.xlu1 %v738_v0  ;;  %742 = vadd.xlane.f32.xlu0 %v741_v31  ;;  %v744_v13 = vsel %vm332_vm0, %v2462_v20, 0.0  ;;  %v3880_v21 = vld [vmem:[%s5727_s1 + $0x100] sm:$0xff] }
  0xb2   :  { %5946 = vst [vmem:[#allocation30_spill] sm:$0xff] %v3352_v46  ;;  %v542_v29 = vsub.f32 %v2949_v33, %v3352_v46  ;;  %2473 = vpow2.f32 %v619_v55  ;;  %v3874_v46 = vld [vmem:[%s5727_s1 + $0xf0] sm:$0xff] }
  0xb3   :  { %v2464_v16 = vpop.eup %2463  ;;  %v621_v8 = vmul.f32 1.442695, %v541_v28 }
  0xb4   :  { %v623_v24 = vmul.f32 1.442695, %v542_v29  ;;  %v2466_v25 = vpop.eup %2465  ;;  %v3359_v38 = vpop.xlane.xlu0 %388  ;;  %v747_v54 = vsel %vm332_vm0, %v2464_v16, 0.0 }
  0xb5   :  { %5947 = vst [vmem:[#allocation31_spill] sm:$0xff] %v3359_v38  ;;  %v3362_v32 = vpop.xlane.xlu1 %391  ;;  %2475 = vpow2.f32 %v621_v8  ;;  %v543_v33 = vsub.f32 %v2958_v36, %v3359_v38  ;;  %745 = vadd.xlane.f32.xlu1 %v744_v13  ;;  %748 = vadd.xlane.f32.xlu0 %v747_v54  ;;  %v750_v55 = vsel %vm332_vm0, %v2466_v25, 0.0  ;;  %v3868_v38 = vld [vmem:[%s5727_s1 + $0xe0] sm:$0xff] }
  0xb6   :  { %5948 = vst [vmem:[#allocation32_spill] sm:$0xff] %v3362_v32  ;;  %v544_v0 = vsub.f32 %v2963_v37, %v3362_v32  ;;  %2477 = vpow2.f32 %v623_v24  ;;  %v3862_v32 = vld [vmem:[%s5727_s1 + $0xd0] sm:$0xff] }
  0xb7   :  { %v2468_v20 = vpop.eup %2467  ;;  %v625_v31 = vmul.f32 1.442695, %v543_v33 }
  0xb8   :  { %v627_v28 = vmul.f32 1.442695, %v544_v0  ;;  %v2470_v29 = vpop.eup %2469  ;;  %v3369_v62 = vpop.xlane.xlu0 %394  ;;  %v753_v16 = vsel %vm332_vm0, %v2468_v20, 0.0 }
  0xb9   :  { %5949 = vst [vmem:[#allocation33_spill] sm:$0xff] %v3369_v62  ;;  %v3372_v8 = vpop.xlane.xlu1 %397  ;;  %2479 = vpow2.f32 %v625_v31  ;;  %v545_v36 = vsub.f32 %v2972_v40, %v3369_v62  ;;  %751 = vadd.xlane.f32.xlu1 %v750_v55  ;;  %754 = vadd.xlane.f32.xlu0 %v753_v16  ;;  %v756_v13 = vsel %vm332_vm0, %v2470_v29, 0.0 }
  0xba   :  { %5950 = vst [vmem:[#allocation34_spill] sm:$0xff] %v3372_v8  ;;  %v546_v37 = vsub.f32 %v2977_v41, %v3372_v8  ;;  %2481 = vpow2.f32 %v627_v28 }
  0xbb   :  { %v2472_v24 = vpop.eup %2471  ;;  %v629_v25 = vmul.f32 1.442695, %v545_v36 }
  0xbc   :  { %v631_v54 = vmul.f32 1.442695, %v546_v37  ;;  %v2474_v33 = vpop.eup %2473  ;;  %v3379_v0 = vpop.xlane.xlu0 %400  ;;  %v759_v20 = vsel %vm332_vm0, %v2472_v24, 0.0 }
  0xbd   :  { %5951 = vst [vmem:[#allocation35_spill] sm:$0xff] %v3379_v0  ;;  %v3382_v31 = vpop.xlane.xlu1 %403  ;;  %2483 = vpow2.f32 %v629_v25  ;;  %v547_v40 = vsub.f32 %v2986_v44, %v3379_v0  ;;  %757 = vadd.xlane.f32.xlu1 %v756_v13  ;;  %760 = vadd.xlane.f32.xlu0 %v759_v20  ;;  %v762_v55 = vsel %vm332_vm0, %v2474_v33, 0.0 }
  0xbe   :  { %5952 = vst [vmem:[#allocation36_spill] sm:$0xff] %v3382_v31  ;;  %v548_v41 = vsub.f32 %v2991_v45, %v3382_v31  ;;  %2485 = vpow2.f32 %v631_v54 }
  0xbf   :  { %v2476_v28 = vpop.eup %2475  ;;  %v633_v29 = vmul.f32 1.442695, %v547_v40 }
  0xc0   :  { %v635_v16 = vmul.f32 1.442695, %v548_v41  ;;  %v2478_v36 = vpop.eup %2477  ;;  %v3389_v37 = vpop.xlane.xlu0 %406  ;;  %v765_v24 = vsel %vm332_vm0, %v2476_v28, 0.0 }
  0xc1   :  { %5953 = vst [vmem:[#allocation37_spill] sm:$0xff] %v3389_v37  ;;  %v3392_v25 = vpop.xlane.xlu1 %409  ;;  %2487 = vpow2.f32 %v633_v29  ;;  %v549_v44 = vsub.f32 %v3000_v48, %v3389_v37  ;;  %763 = vadd.xlane.f32.xlu1 %v762_v55  ;;  %766 = vadd.xlane.f32.xlu0 %v765_v24  ;;  %v768_v13 = vsel %vm332_vm0, %v2478_v36, 0.0 }
  0xc2   :  { %5954 = vst [vmem:[#allocation38_spill] sm:$0xff] %v3392_v25  ;;  %v550_v45 = vsub.f32 %v3005_v49, %v3392_v25  ;;  %2489 = vpow2.f32 %v635_v16 }
  0xc3   :  { %v2480_v54 = vpop.eup %2479  ;;  %v637_v33 = vmul.f32 1.442695, %v549_v44 }
  0xc4   :  { %v639_v20 = vmul.f32 1.442695, %v550_v45  ;;  %v2482_v40 = vpop.eup %2481  ;;  %v3399_v41 = vpop.xlane.xlu0 %412  ;;  %v771_v28 = vsel %vm332_vm0, %v2480_v54, 0.0 }
  0xc5   :  { %5955 = vst [vmem:[#allocation39_spill] sm:$0xff] %v3399_v41  ;;  %v3402_v29 = vpop.xlane.xlu1 %415  ;;  %2491 = vpow2.f32 %v637_v33  ;;  %v551_v48 = vsub.f32 %v3014_v52, %v3399_v41  ;;  %769 = vadd.xlane.f32.xlu1 %v768_v13  ;;  %772 = vadd.xlane.f32.xlu0 %v771_v28  ;;  %v774_v55 = vsel %vm332_vm0, %v2482_v40, 0.0 }
  0xc6   :  { %5956 = vst [vmem:[#allocation40_spill] sm:$0xff] %v3402_v29  ;;  %v552_v49 = vsub.f32 %v3019_v53, %v3402_v29  ;;  %2493 = vpow2.f32 %v639_v20 }
  0xc7   :  { %v2484_v16 = vpop.eup %2483  ;;  %v641_v36 = vmul.f32 1.442695, %v551_v48 }
  0xc8   :  { %v643_v24 = vmul.f32 1.442695, %v552_v49  ;;  %v2486_v44 = vpop.eup %2485  ;;  %v3409_v45 = vpop.xlane.xlu0 %418  ;;  %v777_v54 = vsel %vm332_vm0, %v2484_v16, 0.0 }
  0xc9   :  { %5957 = vst [vmem:[#allocation41_spill] sm:$0xff] %v3409_v45  ;;  %v3412_v33 = vpop.xlane.xlu1 %421  ;;  %2495 = vpow2.f32 %v641_v36  ;;  %v553_v52 = vsub.f32 %v3028_v56, %v3409_v45  ;;  %775 = vadd.xlane.f32.xlu1 %v774_v55  ;;  %778 = vadd.xlane.f32.xlu0 %v777_v54  ;;  %v780_v13 = vsel %vm332_vm0, %v2486_v44, 0.0 }
  0xca   :  { %5958 = vst [vmem:[#allocation42_spill] sm:$0xff] %v3412_v33  ;;  %v554_v53 = vsub.f32 %v3033_v57, %v3412_v33  ;;  %2497 = vpow2.f32 %v643_v24 }
  0xcb   :  { %v2488_v20 = vpop.eup %2487  ;;  %v645_v40 = vmul.f32 1.442695, %v553_v52 }
  0xcc   :  { %v647_v28 = vmul.f32 1.442695, %v554_v53  ;;  %v2490_v48 = vpop.eup %2489  ;;  %v3419_v49 = vpop.xlane.xlu0 %424  ;;  %v783_v16 = vsel %vm332_vm0, %v2488_v20, 0.0 }
  0xcd   :  { %5959 = vst [vmem:[#allocation43_spill] sm:$0xff] %v3419_v49  ;;  %v3422_v36 = vpop.xlane.xlu1 %427  ;;  %2499 = vpow2.f32 %v645_v40  ;;  %v555_v56 = vsub.f32 %v3042_v60, %v3419_v49  ;;  %781 = vadd.xlane.f32.xlu1 %v780_v13  ;;  %784 = vadd.xlane.f32.xlu0 %v783_v16  ;;  %v786_v55 = vsel %vm332_vm0, %v2490_v48, 0.0 }
  0xce   :  { %5960 = vst [vmem:[#allocation44_spill] sm:$0xff] %v3422_v36  ;;  %v556_v57 = vsub.f32 %v3047_v61, %v3422_v36  ;;  %2501 = vpow2.f32 %v647_v28 }
  0xcf   :  { %v2492_v24 = vpop.eup %2491  ;;  %v649_v44 = vmul.f32 1.442695, %v555_v56 }
  0xd0   :  { %v651_v54 = vmul.f32 1.442695, %v556_v57  ;;  %v2494_v52 = vpop.eup %2493  ;;  %v3429_v53 = vpop.xlane.xlu0 %430  ;;  %v789_v20 = vsel %vm332_vm0, %v2492_v24, 0.0 }
  0xd1   :  { %5961 = vst [vmem:[#allocation45_spill] sm:$0xff] %v3429_v53  ;;  %v3432_v40 = vpop.xlane.xlu1 %433  ;;  %2503 = vpow2.f32 %v649_v44  ;;  %v557_v60 = vsub.f32 %v3056_v3, %v3429_v53  ;;  %787 = vadd.xlane.f32.xlu1 %v786_v55  ;;  %790 = vadd.xlane.f32.xlu0 %v789_v20  ;;  %v792_v13 = vsel %vm332_vm0, %v2494_v52, 0.0 }
  0xd2   :  { %5962 = vst [vmem:[#allocation46_spill] sm:$0xff] %v3432_v40  ;;  %v558_v61 = vsub.f32 %v3061_v4, %v3432_v40  ;;  %2505 = vpow2.f32 %v651_v54 }
  0xd3   :  { %v2496_v28 = vpop.eup %2495  ;;  %v653_v48 = vmul.f32 1.442695, %v557_v60 }
  0xd4   :  { %v655_v16 = vmul.f32 1.442695, %v558_v61  ;;  %v2498_v56 = vpop.eup %2497  ;;  %v3439_v57 = vpop.xlane.xlu0 %436  ;;  %v795_v24 = vsel %vm332_vm0, %v2496_v28, 0.0 }
  0xd5   :  { %5963 = vst [vmem:[#allocation47_spill] sm:$0xff] %v3439_v57  ;;  %v3442_v44 = vpop.xlane.xlu1 %439  ;;  %2507 = vpow2.f32 %v653_v48  ;;  %v559_v3 = vsub.f32 %v3070_v10, %v3439_v57  ;;  %793 = vadd.xlane.f32.xlu1 %v792_v13  ;;  %796 = vadd.xlane.f32.xlu0 %v795_v24  ;;  %v798_v55 = vsel %vm332_vm0, %v2498_v56, 0.0 }
  0xd6   :  { %5964 = vst [vmem:[#allocation48_spill] sm:$0xff] %v3442_v44  ;;  %v560_v4 = vsub.f32 %v3075_v11, %v3442_v44  ;;  %2509 = vpow2.f32 %v655_v16 }
  0xd7   :  { %v2500_v54 = vpop.eup %2499  ;;  %v657_v52 = vmul.f32 1.442695, %v559_v3 }
  0xd8   :  { %v659_v20 = vmul.f32 1.442695, %v560_v4  ;;  %v2502_v60 = vpop.eup %2501  ;;  %v3449_v61 = vpop.xlane.xlu0 %442  ;;  %v801_v28 = vsel %vm332_vm0, %v2500_v54, 0.0 }
  0xd9   :  { %5965 = vst [vmem:[#allocation49_spill] sm:$0xff] %v3449_v61  ;;  %v3452_v48 = vpop.xlane.xlu1 %445  ;;  %2511 = vpow2.f32 %v657_v52  ;;  %v561_v10 = vsub.f32 %v3084_v18, %v3449_v61  ;;  %799 = vadd.xlane.f32.xlu1 %v798_v55  ;;  %802 = vadd.xlane.f32.xlu0 %v801_v28  ;;  %v804_v13 = vsel %vm332_vm0, %v2502_v60, 0.0 }
  0xda   :  { %5966 = vst [vmem:[#allocation50_spill] sm:$0xff] %v3452_v48  ;;  %v562_v11 = vsub.f32 %v3089_v19, %v3452_v48  ;;  %2513 = vpow2.f32 %v659_v20 }
  0xdb   :  { %v2504_v16 = vpop.eup %2503  ;;  %v661_v56 = vmul.f32 1.442695, %v561_v10 }
  0xdc   :  { %v663_v24 = vmul.f32 1.442695, %v562_v11  ;;  %v2506_v3 = vpop.eup %2505  ;;  %v3459_v4 = vpop.xlane.xlu0 %448  ;;  %v807_v54 = vsel %vm332_vm0, %v2504_v16, 0.0 }
  0xdd   :  { %5967 = vst [vmem:[#allocation51_spill] sm:$0xff] %v3459_v4  ;;  %v3462_v52 = vpop.xlane.xlu1 %451  ;;  %2515 = vpow2.f32 %v661_v56  ;;  %v563_v18 = vsub.f32 %v3098_v26, %v3459_v4  ;;  %805 = vadd.xlane.f32.xlu1 %v804_v13  ;;  %808 = vadd.xlane.f32.xlu0 %v807_v54  ;;  %v810_v55 = vsel %vm332_vm0, %v2506_v3, 0.0 }
  0xde   :  { %5968 = vst [vmem:[#allocation52_spill] sm:$0xff] %v3462_v52  ;;  %v564_v19 = vsub.f32 %v3103_v27, %v3462_v52  ;;  %2517 = vpow2.f32 %v663_v24 }
  0xdf   :  { %v2508_v20 = vpop.eup %2507  ;;  %v665_v60 = vmul.f32 1.442695, %v563_v18 }
  0xe0   :  { %v667_v28 = vmul.f32 1.442695, %v564_v19  ;;  %v2510_v10 = vpop.eup %2509  ;;  %v3469_v11 = vpop.xlane.xlu0 %454  ;;  %v813_v16 = vsel %vm332_vm0, %v2508_v20, 0.0 }
  0xe1   :  { %5969 = vst [vmem:[#allocation53_spill] sm:$0xff] %v3469_v11  ;;  %v3472_v56 = vpop.xlane.xlu1 %457  ;;  %2519 = vpow2.f32 %v665_v60  ;;  %v565_v26 = vsub.f32 %v3112_v34, %v3469_v11  ;;  %811 = vadd.xlane.f32.xlu1 %v810_v55  ;;  %814 = vadd.xlane.f32.xlu0 %v813_v16  ;;  %v816_v13 = vsel %vm332_vm0, %v2510_v10, 0.0 }
  0xe2   :  { %5970 = vst [vmem:[#allocation54_spill] sm:$0xff] %v3472_v56  ;;  %v566_v27 = vsub.f32 %v3117_v35, %v3472_v56  ;;  %2521 = vpow2.f32 %v667_v28 }
  0xe3   :  { %v2512_v24 = vpop.eup %2511  ;;  %v669_v3 = vmul.f32 1.442695, %v565_v26 }
  0xe4   :  { %v671_v54 = vmul.f32 1.442695, %v566_v27  ;;  %v2514_v18 = vpop.eup %2513  ;;  %v3479_v19 = vpop.xlane.xlu0 %460  ;;  %v819_v20 = vsel %vm332_vm0, %v2512_v24, 0.0 }
  0xe5   :  { %5971 = vst [vmem:[#allocation55_spill] sm:$0xff] %v3479_v19  ;;  %v3482_v60 = vpop.xlane.xlu1 %463  ;;  %2523 = vpow2.f32 %v669_v3  ;;  %v567_v34 = vsub.f32 %v3126_v42, %v3479_v19  ;;  %817 = vadd.xlane.f32.xlu1 %v816_v13  ;;  %820 = vadd.xlane.f32.xlu0 %v819_v20  ;;  %v822_v55 = vsel %vm332_vm0, %v2514_v18, 0.0 }
  0xe6   :  { %5972 = vst [vmem:[#allocation56_spill] sm:$0xff] %v3482_v60  ;;  %v568_v35 = vsub.f32 %v3131_v43, %v3482_v60  ;;  %2525 = vpow2.f32 %v671_v54 }
  0xe7   :  { %v2516_v28 = vpop.eup %2515  ;;  %v673_v10 = vmul.f32 1.442695, %v567_v34 }
  0xe8   :  { %v675_v16 = vmul.f32 1.442695, %v568_v35  ;;  %v2518_v26 = vpop.eup %2517  ;;  %v3489_v27 = vpop.xlane.xlu0 %466  ;;  %v825_v24 = vsel %vm332_vm0, %v2516_v28, 0.0 }
  0xe9   :  { %5973 = vst [vmem:[#allocation57_spill] sm:$0xff] %v3489_v27  ;;  %v3492_v3 = vpop.xlane.xlu1 %469  ;;  %2527 = vpow2.f32 %v673_v10  ;;  %v569_v42 = vsub.f32 %v3140_v50, %v3489_v27  ;;  %823 = vadd.xlane.f32.xlu1 %v822_v55  ;;  %826 = vadd.xlane.f32.xlu0 %v825_v24  ;;  %v828_v13 = vsel %vm332_vm0, %v2518_v26, 0.0 }
  0xea   :  { %5974 = vst [vmem:[#allocation58_spill] sm:$0xff] %v3492_v3  ;;  %v570_v43 = vsub.f32 %v3145_v51, %v3492_v3  ;;  %2529 = vpow2.f32 %v675_v16 }
  0xeb   :  { %v2520_v54 = vpop.eup %2519  ;;  %v677_v18 = vmul.f32 1.442695, %v569_v42 }
  0xec   :  { %v679_v20 = vmul.f32 1.442695, %v570_v43  ;;  %v2522_v34 = vpop.eup %2521  ;;  %v3499_v35 = vpop.xlane.xlu0 %472  ;;  %v831_v28 = vsel %vm332_vm0, %v2520_v54, 0.0 }
  0xed   :  { %5975 = vst [vmem:[#allocation59_spill] sm:$0xff] %v3499_v35  ;;  %v3502_v10 = vpop.xlane.xlu1 %475  ;;  %2531 = vpow2.f32 %v677_v18  ;;  %v571_v50 = vsub.f32 %v3154_v58, %v3499_v35  ;;  %829 = vadd.xlane.f32.xlu1 %v828_v13  ;;  %832 = vadd.xlane.f32.xlu0 %v831_v28  ;;  %v834_v55 = vsel %vm332_vm0, %v2522_v34, 0.0 }
  0xee   :  { %5976 = vst [vmem:[#allocation60_spill] sm:$0xff] %v3502_v10  ;;  %v572_v51 = vsub.f32 %v3159_v59, %v3502_v10  ;;  %2533 = vpow2.f32 %v679_v20 }
  0xef   :  { %v2524_v16 = vpop.eup %2523  ;;  %v681_v26 = vmul.f32 1.442695, %v571_v50 }
  0xf0   :  { %v683_v24 = vmul.f32 1.442695, %v572_v51  ;;  %v2526_v42 = vpop.eup %2525  ;;  %v3509_v43 = vpop.xlane.xlu0 %478  ;;  %v837_v54 = vsel %vm332_vm0, %v2524_v16, 0.0 }
  0xf1   :  { %5977 = vst [vmem:[#allocation61_spill] sm:$0xff] %v3509_v43  ;;  %v3512_v18 = vpop.xlane.xlu1 %481  ;;  %2535 = vpow2.f32 %v681_v26  ;;  %v573_v58 = vsub.f32 %v3168_v6, %v3509_v43  ;;  %835 = vadd.xlane.f32.xlu1 %v834_v55  ;;  %838 = vadd.xlane.f32.xlu0 %v837_v54  ;;  %v840_v13 = vsel %vm332_vm0, %v2526_v42, 0.0 }
  0xf2   :  { %5978 = vst [vmem:[#allocation62_spill] sm:$0xff] %v3512_v18  ;;  %v574_v59 = vsub.f32 %v3173_v7, %v3512_v18  ;;  %2537 = vpow2.f32 %v683_v24 }
  0xf3   :  { %v2528_v20 = vpop.eup %2527  ;;  %v685_v34 = vmul.f32 1.442695, %v573_v58 }
  0xf4   :  { %v687_v28 = vmul.f32 1.442695, %v574_v59  ;;  %v2530_v50 = vpop.eup %2529  ;;  %v3519_v51 = vpop.xlane.xlu0 %484  ;;  %v843_v16 = vsel %vm332_vm0, %v2528_v20, 0.0 }
  0xf5   :  { %5979 = vst [vmem:[#allocation63_spill] sm:$0xff] %v3519_v51  ;;  %v3522_v26 = vpop.xlane.xlu1 %487  ;;  %2539 = vpow2.f32 %v685_v34  ;;  %v575_v6 = vsub.f32 %v3182_v22, %v3519_v51  ;;  %841 = vadd.xlane.f32.xlu1 %v840_v13  ;;  %844 = vadd.xlane.f32.xlu0 %v843_v16  ;;  %v846_v55 = vsel %vm332_vm0, %v2530_v50, 0.0  ;;  %v5983_v22 = vld [vmem:[#allocation5_spill] sm:$0xff] }
  0xf6   :  { %5980 = vst [vmem:[#allocation64_spill] sm:$0xff] %v3522_v26  ;;  %v576_v7 = vsub.f32 %v3187_v23, %v3522_v26  ;;  %2541 = vpow2.f32 %v687_v28  ;;  %v5984_v23 = vld [vmem:[#allocation6_spill] sm:$0xff] }
  0xf7   :  { %v2532_v24 = vpop.eup %2531  ;;  %v689_v42 = vmul.f32 1.442695, %v575_v6 }
  0xf8   :  { %v691_v54 = vmul.f32 1.442695, %v576_v7  ;;  %v2534_v58 = vpop.eup %2533  ;;  %v3529_v59 = vpop.xlane.xlu0 %490  ;;  %v849_v20 = vsel %vm332_vm0, %v2532_v24, 0.0 }
  0xf9   :  { %5981 = vst [vmem:[#allocation65_spill] sm:$0xff] %v3529_v59  ;;  %v3532_v34 = vpop.xlane.xlu1 %493  ;;  %2543 = vpow2.f32 %v689_v42  ;;  %v577_v13 = vsub.f32 %v5983_v22, %v3529_v59  ;;  %847 = vadd.xlane.f32.xlu1 %v846_v55  ;;  %850 = vadd.xlane.f32.xlu0 %v849_v20  ;;  %v852_v50 = vsel %vm332_vm0, %v2534_v58, 0.0  ;;  %v5987_v55 = vld [vmem:[#allocation7_spill] sm:$0xff] }
  0xfa   :  { %5982 = vst [vmem:[#allocation66_spill] sm:$0xff] %v3532_v34  ;;  %v578_v28 = vsub.f32 %v5984_v23, %v3532_v34  ;;  %2545 = vpow2.f32 %v691_v54  ;;  %v5988_v54 = vld [vmem:[#allocation8_spill] sm:$0xff] }
  0xfb   :  { %v2536_v16 = vpop.eup %2535  ;;  %v693_v6 = vmul.f32 1.442695, %v577_v13 }
  0xfc   :  { %v695_v7 = vmul.f32 1.442695, %v578_v28  ;;  %v2538_v26 = vpop.eup %2537  ;;  %v3539_v51 = vpop.xlane.xlu0 %496  ;;  %v855_v24 = vsel %vm332_vm0, %v2536_v16, 0.0 }
  0xfd   :  { %5985 = vst [vmem:[#allocation5_spill] sm:$0xff] %v3539_v51  ;;  %v3542_v42 = vpop.xlane.xlu1 %499  ;;  %2547 = vpow2.f32 %v693_v6  ;;  %v579_v20 = vsub.f32 %v5987_v55, %v3539_v51  ;;  %853 = vadd.xlane.f32.xlu1 %v852_v50  ;;  %856 = vadd.xlane.f32.xlu0 %v855_v24  ;;  %v858_v58 = vsel %vm332_vm0, %v2538_v26, 0.0  ;;  %v5991_v50 = vld [vmem:[#allocation9_spill] sm:$0xff] }
  0xfe   :  { %5986 = vst [vmem:[#allocation6_spill] sm:$0xff] %v3542_v42  ;;  %v580_v22 = vsub.f32 %v5988_v54, %v3542_v42  ;;  %2549 = vpow2.f32 %v695_v7  ;;  %v5992_v7 = vld [vmem:[#allocation10_spill] sm:$0xff] }
  0xff   :  { %v2540_v13 = vpop.eup %2539  ;;  %v697_v23 = vmul.f32 1.442695, %v579_v20 }
 0x100   :  { %v699_v28 = vmul.f32 1.442695, %v580_v22  ;;  %v2542_v34 = vpop.eup %2541  ;;  %v3549_v59 = vpop.xlane.xlu0 %502  ;;  %v861_v16 = vsel %vm332_vm0, %v2540_v13, 0.0 }
 0x101   :  { %5989 = vst [vmem:[#allocation7_spill] sm:$0xff] %v3549_v59  ;;  %v3552_v6 = vpop.xlane.xlu1 %505  ;;  %2551 = vpow2.f32 %v697_v23  ;;  %v581_v24 = vsub.f32 %v5991_v50, %v3549_v59  ;;  %859 = vadd.xlane.f32.xlu1 %v858_v58  ;;  %862 = vadd.xlane.f32.xlu0 %v861_v16  ;;  %v864_v26 = vsel %vm332_vm0, %v2542_v34, 0.0  ;;  %v5995_v58 = vld [vmem:[#allocation11_spill] sm:$0xff] }
 0x102   :  { %5990 = vst [vmem:[#allocation8_spill] sm:$0xff] %v3552_v6  ;;  %v582_v55 = vsub.f32 %v5992_v7, %v3552_v6  ;;  %2553 = vpow2.f32 %v699_v28  ;;  %v5996_v28 = vld [vmem:[#allocation12_spill] sm:$0xff] }
 0x103   :  { %v2544_v20 = vpop.eup %2543  ;;  %v701_v54 = vmul.f32 1.442695, %v581_v24 }
 0x104   :  { %v703_v22 = vmul.f32 1.442695, %v582_v55  ;;  %v2546_v42 = vpop.eup %2545  ;;  %v3559_v51 = vpop.xlane.xlu0 %508  ;;  %v867_v13 = vsel %vm332_vm0, %v2544_v20, 0.0 }
 0x105   :  { %5993 = vst [vmem:[#allocation9_spill] sm:$0xff] %v3559_v51  ;;  %v3562_v23 = vpop.xlane.xlu1 %511  ;;  %2555 = vpow2.f32 %v701_v54  ;;  %v583_v16 = vsub.f32 %v5995_v58, %v3559_v51  ;;  %865 = vadd.xlane.f32.xlu1 %v864_v26  ;;  %868 = vadd.xlane.f32.xlu0 %v867_v13  ;;  %v870_v34 = vsel %vm332_vm0, %v2546_v42, 0.0  ;;  %v5999_v26 = vld [vmem:[#allocation13_spill] sm:$0xff] }
 0x106   :  { %5994 = vst [vmem:[#allocation10_spill] sm:$0xff] %v3562_v23  ;;  %v584_v50 = vsub.f32 %v5996_v28, %v3562_v23  ;;  %2557 = vpow2.f32 %v703_v22  ;;  %v6000_v22 = vld [vmem:[#allocation14_spill] sm:$0xff] }
 0x107   :  { %v2548_v24 = vpop.eup %2547  ;;  %v705_v7 = vmul.f32 1.442695, %v583_v16 }
 0x108   :  { %v707_v55 = vmul.f32 1.442695, %v584_v50  ;;  %v2550_v6 = vpop.eup %2549  ;;  %v3569_v59 = vpop.xlane.xlu0 %514  ;;  %v873_v20 = vsel %vm332_vm0, %v2548_v24, 0.0 }
 0x109   :  { %5997 = vst [vmem:[#allocation11_spill] sm:$0xff] %v3569_v59  ;;  %v3572_v54 = vpop.xlane.xlu1 %517  ;;  %2559 = vpow2.f32 %v705_v7  ;;  %v585_v13 = vsub.f32 %v5999_v26, %v3569_v59  ;;  %871 = vadd.xlane.f32.xlu1 %v870_v34  ;;  %874 = vadd.xlane.f32.xlu0 %v873_v20  ;;  %v876_v42 = vsel %vm332_vm0, %v2550_v6, 0.0  ;;  %v6003_v34 = vld [vmem:[#allocation15_spill] sm:$0xff] }
 0x10a   :  { %5998 = vst [vmem:[#allocation12_spill] sm:$0xff] %v3572_v54  ;;  %v586_v58 = vsub.f32 %v6000_v22, %v3572_v54  ;;  %2561 = vpow2.f32 %v707_v55  ;;  %v6004_v55 = vld [vmem:[#allocation16_spill] sm:$0xff] }
 0x10b   :  { %v2552_v16 = vpop.eup %2551  ;;  %v709_v28 = vmul.f32 1.442695, %v585_v13 }
 0x10c   :  { %v711_v50 = vmul.f32 1.442695, %v586_v58  ;;  %v2554_v23 = vpop.eup %2553  ;;  %v3579_v51 = vpop.xlane.xlu0 %520  ;;  %v879_v24 = vsel %vm332_vm0, %v2552_v16, 0.0 }
 0x10d   :  { %6001 = vst [vmem:[#allocation13_spill] sm:$0xff] %v3579_v51  ;;  %v3582_v7 = vpop.xlane.xlu1 %523  ;;  %2563 = vpow2.f32 %v709_v28  ;;  %v587_v20 = vsub.f32 %v6003_v34, %v3579_v51  ;;  %877 = vadd.xlane.f32.xlu1 %v876_v42  ;;  %880 = vadd.xlane.f32.xlu0 %v879_v24  ;;  %v882_v6 = vsel %vm332_vm0, %v2554_v23, 0.0 }
 0x10e   :  { %6002 = vst [vmem:[#allocation14_spill] sm:$0xff] %v3582_v7  ;;  %v588_v26 = vsub.f32 %v6004_v55, %v3582_v7  ;;  %2565 = vpow2.f32 %v711_v50 }
 0x10f   :  { %v2556_v13 = vpop.eup %2555  ;;  %v713_v22 = vmul.f32 1.442695, %v587_v20 }
 0x110   :  { %v715_v58 = vmul.f32 1.442695, %v588_v26  ;;  %v2558_v54 = vpop.eup %2557  ;;  %v885_v16 = vsel %vm332_vm0, %v2556_v13, 0.0 }
 0x111   :  { %2567 = vpow2.f32 %v713_v22  ;;  %883 = vadd.xlane.f32.xlu1 %v882_v6  ;;  %886 = vadd.xlane.f32.xlu0 %v885_v16  ;;  %v888_v28 = vsel %vm332_vm0, %v2558_v54, 0.0  ;;  %v3602_v16 = vld [vmem:[%s5727_s1 + $0x8] sm:$0xff] }
 0x112   :  { %2569 = vpow2.f32 %v715_v58  ;;  %vm141_vm10 = vcmp.ne.s32.totalorder %v3602_v16, 4294967295 }
 0x113   :  { %v2560_v42 = vpop.eup %2559 }
 0x114   :  { %v2562_v24 = vpop.eup %2561  ;;  %v891_v34 = vsel %vm332_vm0, %v2560_v42, 0.0 }
 0x115   :  { %889 = vadd.xlane.f32.xlu1 %v888_v28  ;;  %892 = vadd.xlane.f32.xlu0 %v891_v34  ;;  %v894_v23 = vsel %vm332_vm0, %v2562_v24, 0.0  ;;  %v3607_v28 = vld [vmem:[%s5727_s1] sm:$0xff]  ;;  %v3618_v34 = vld [vmem:[%s5727_s1 + $0x10] sm:$0xff] }
 0x116   :  { %vm140_vm11 = vcmp.ne.s32.totalorder %v3607_v28, 4294967295  ;;  %vm142_vm13 = vcmp.ne.s32.totalorder %v3618_v34, 4294967295 }
 0x117   :  { %v2564_v50 = vpop.eup %2563 }
 0x118   :  { %v2566_v20 = vpop.eup %2565  ;;  %v897_v55 = vsel %vm332_vm0, %v2564_v50, 0.0 }
 0x119   :  { %895 = vadd.xlane.f32.xlu1 %v894_v23  ;;  %898 = vadd.xlane.f32.xlu0 %v897_v55  ;;  %v900_v26 = vsel %vm332_vm0, %v2566_v20, 0.0  ;;  %v3628_v20 = vld [vmem:[%s5727_s1 + $0x18] sm:$0xff] }
 0x11a   :  { %vm143_vm14 = vcmp.ne.s32.totalorder %v3628_v20, 4294967295 }
 0x11b   :  { %v2568_v6 = vpop.eup %2567 }
 0x11c   :  { %v2570_v13 = vpop.eup %2569  ;;  %v903_v54 = vsel %vm332_vm0, %v2568_v6, 0.0  ;;  %v3638_v6 = vld [vmem:[%s5727_s1 + $0x20] sm:$0xff] }
 0x11d   :  { %901 = vadd.xlane.f32.xlu1 %v900_v26  ;;  %904 = vadd.xlane.f32.xlu0 %v903_v54  ;;  %v906_v22 = vsel %vm332_vm0, %v2570_v13, 0.0  ;;  %vm144_vm15 = vcmp.ne.s32.totalorder %v3638_v6, 4294967295 }
 0x121   :  { %907 = vadd.xlane.f32.xlu1 %v906_v22  ;;  %v3648_v22 = vld [vmem:[%s5727_s1 + $0x28] sm:$0xff] }
 0x12e   :  { %v3597_v58 = vpop.xlane.xlu0 %718 }
 0x12f   :  { %2571 = vlog2.f32 %v3597_v58 }
 0x132   :  { %1107 = vperm.xlu1 %2442, %v3602_v16   ;;  %v3610_v42 = vpop.xlane.xlu1 %721  ;;  %v3612_v24 = vpop.xlane.xlu0 %724 }
 0x133   :  { %1104 = vperm.xlu0 %2441, %v3607_v28   ;;  %2573 = vlog2.f32 %v3610_v42  ;;  %v2722_v42 = vld [vmem:[%s5726_s0 + $0xb0] sm:$0xff] }
 0x134   :  { %2575 = vlog2.f32 %v3612_v24 }
 0x136   :  { %1110 = vperm.xlu1 %2442, %v3618_v34   ;;  %v3621_v23 = vpop.xlane.xlu1 %727  ;;  %v3623_v50 = vpop.xlane.xlu0 %730 }
 0x137   :  { %2577 = vlog2.f32 %v3621_v23  ;;  %v2723_v23 = vld [vmem:[%s5726_s0 + $0xb8] sm:$0xff] }
 0x138   :  { %2579 = vlog2.f32 %v3623_v50 }
 0x13a   :  { %1113 = vperm.xlu1 %2442, %v3628_v20   ;;  %v3631_v55 = vpop.xlane.xlu1 %733  ;;  %v3633_v26 = vpop.xlane.xlu0 %736 }
 0x13b   :  { %2581 = vlog2.f32 %v3631_v55 }
 0x13c   :  { %2583 = vlog2.f32 %v3633_v26 }
 0x13e   :  { %1116 = vperm.xlu1 %2442, %v3638_v6   ;;  %v3641_v13 = vpop.xlane.xlu1 %739  ;;  %v3643_v54 = vpop.xlane.xlu0 %742 }
 0x13f   :  { %2585 = vlog2.f32 %v3641_v13  ;;  %v2725_v13 = vld [vmem:[%s5726_s0 + $0x138] sm:$0xff] }
 0x140   :  { %2587 = vlog2.f32 %v3643_v54 }
 0x142   :  { %1119 = vperm.xlu1 %2442, %v3648_v22   ;;  %v3651_v7 = vpop.xlane.xlu1 %745  ;;  %v3653_v51 = vpop.xlane.xlu0 %748 }
 0x143   :  { %2589 = vlog2.f32 %v3651_v7 }
 0x144   :  { %2591 = vlog2.f32 %v3653_v51 }
 0x146   :  { %v3655_v59 = vpop.xlane.xlu1 %751  ;;  %v3657_v18 = vpop.xlane.xlu0 %754 }
 0x147   :  { %2593 = vlog2.f32 %v3655_v59  ;;  %v2728_v59 = vld [vmem:[%s5726_s0 + $0xd0] sm:$0xff] }
 0x148   :  { %2595 = vlog2.f32 %v3657_v18 }
 0x14a   :  { %v3659_v43 = vpop.xlane.xlu1 %757  ;;  %v3661_v35 = vpop.xlane.xlu0 %760 }
 0x14b   :  { %2597 = vlog2.f32 %v3659_v43  ;;  %v2729_v43 = vld [vmem:[%s5726_s0 + $0x158] sm:$0xff] }
 0x14c   :  { %2599 = vlog2.f32 %v3661_v35 }
 0x14e   :  { %v3663_v10 = vpop.xlane.xlu1 %763  ;;  %v3665_v3 = vpop.xlane.xlu0 %766 }
 0x14f   :  { %6005 = vst [vmem:[#allocation15_spill] sm:$0xff] %v3665_v3  ;;  %2601 = vlog2.f32 %v3663_v10  ;;  %v2730_v10 = vld [vmem:[%s5726_s0 + $0xd8] sm:$0xff] }
 0x152   :  { %v3667_v27 = vpop.xlane.xlu1 %769  ;;  %v3669_v60 = vpop.xlane.xlu0 %772 }
 0x153   :  { %6006 = vst [vmem:[#allocation16_spill] sm:$0xff] %v3667_v27  ;;  %6007 = vst [vmem:[#allocation67_spill] sm:$0xff] %v3669_v60  ;;  %v122_v27 = vld [vmem:[%s5727_s1 + $0x170] sm:$0xff] }
 0x156   :  { %v3671_v19 = vpop.xlane.xlu1 %775  ;;  %v3673_v56 = vpop.xlane.xlu0 %778 }
 0x157   :  { %6008 = vst [vmem:[#allocation68_spill] sm:$0xff] %v3671_v19  ;;  %6009 = vst [vmem:[#allocation69_spill] sm:$0xff] %v3673_v56  ;;  %v4017_v56 = vld [vmem:[%s5727_s1 + $0x120] sm:$0xff]  ;;  %v119_v19 = vld [vmem:[%s5727_s1 + $0x158] sm:$0xff] }
 0x158   :  { %6061 = vst [vmem:[#allocation121_spill] sm:$0xff] %v4017_v56 }
 0x15a   :  { %v3675_v11 = vpop.xlane.xlu1 %781  ;;  %v3677_v52 = vpop.xlane.xlu0 %784 }
 0x15b   :  { %6010 = vst [vmem:[#allocation70_spill] sm:$0xff] %v3675_v11  ;;  %6011 = vst [vmem:[#allocation71_spill] sm:$0xff] %v3677_v52  ;;  %v4005_v52 = vld [vmem:[%s5727_s1 + $0x108] sm:$0xff]  ;;  %v4011_v11 = vld [vmem:[%s5727_s1 + $0x118] sm:$0xff] }
 0x15c   :  { %6060 = vst [vmem:[#allocation120_spill] sm:$0xff] %v4011_v11 }
 0x15e   :  { %v3679_v4 = vpop.xlane.xlu1 %787  ;;  %v3681_v48 = vpop.xlane.xlu0 %790 }
 0x15f   :  { %6012 = vst [vmem:[#allocation72_spill] sm:$0xff] %v3679_v4  ;;  %6013 = vst [vmem:[#allocation73_spill] sm:$0xff] %v3681_v48  ;;  %v3987_v48 = vld [vmem:[%s5727_s1 + $0xd8] sm:$0xff] }
 0x160   :  { %v3999_v4 = vld [vmem:[%s5727_s1 + $0xf8] sm:$0xff] }
 0x162   :  { %v3683_v61 = vpop.xlane.xlu1 %793  ;;  %v3685_v44 = vpop.xlane.xlu0 %796 }
 0x163   :  { %6014 = vst [vmem:[#allocation74_spill] sm:$0xff] %v3683_v61  ;;  %6015 = vst [vmem:[#allocation75_spill] sm:$0xff] %v3685_v44  ;;  %v116_v44 = vld [vmem:[%s5727_s1 + $0x140] sm:$0xff] }
 0x166   :  { %v3687_v57 = vpop.xlane.xlu1 %799  ;;  %v3689_v40 = vpop.xlane.xlu0 %802 }
 0x167   :  { %6016 = vst [vmem:[#allocation76_spill] sm:$0xff] %v3687_v57  ;;  %6017 = vst [vmem:[#allocation77_spill] sm:$0xff] %v3689_v40  ;;  %v3892_v40 = vld [vmem:[%s5727_s1 + $0x128] sm:$0xff]  ;;  %v3898_v57 = vld [vmem:[%s5727_s1 + $0x130] sm:$0xff] }
 0x168   :  { %6054 = vst [vmem:[#allocation114_spill] sm:$0xff] %v3892_v40  ;;  %6055 = vst [vmem:[#allocation115_spill] sm:$0xff] %v3898_v57 }
 0x16a   :  { %v3691_v53 = vpop.xlane.xlu1 %805  ;;  %v3693_v36 = vpop.xlane.xlu0 %808 }
 0x16b   :  { %6018 = vst [vmem:[#allocation78_spill] sm:$0xff] %v3691_v53  ;;  %6019 = vst [vmem:[#allocation79_spill] sm:$0xff] %v3693_v36  ;;  %v3886_v53 = vld [vmem:[%s5727_s1 + $0x110] sm:$0xff] }
 0x16e   :  { %v3695_v49 = vpop.xlane.xlu1 %811  ;;  %v3697_v33 = vpop.xlane.xlu0 %814 }
 0x16f   :  { %6020 = vst [vmem:[#allocation80_spill] sm:$0xff] %v3695_v49  ;;  %6021 = vst [vmem:[#allocation81_spill] sm:$0xff] %v3697_v33 }
 0x172   :  { %v3699_v45 = vpop.xlane.xlu1 %817  ;;  %v3701_v29 = vpop.xlane.xlu0 %820 }
 0x173   :  { %6022 = vst [vmem:[#allocation82_spill] sm:$0xff] %v3699_v45  ;;  %6023 = vst [vmem:[#allocation83_spill] sm:$0xff] %v3701_v29 }
 0x176   :  { %v3703_v41 = vpop.xlane.xlu1 %823  ;;  %v3705_v25 = vpop.xlane.xlu0 %826 }
 0x177   :  { %6024 = vst [vmem:[#allocation84_spill] sm:$0xff] %v3703_v41  ;;  %6025 = vst [vmem:[#allocation85_spill] sm:$0xff] %v3705_v25 }
 0x17a   :  { %v3707_v37 = vpop.xlane.xlu1 %829  ;;  %v3709_v31 = vpop.xlane.xlu0 %832 }
 0x17b   :  { %6026 = vst [vmem:[#allocation86_spill] sm:$0xff] %v3707_v37  ;;  %6027 = vst [vmem:[#allocation87_spill] sm:$0xff] %v3709_v31 }
 0x17e   :  { %v3711_v0 = vpop.xlane.xlu1 %835  ;;  %v3713_v8 = vpop.xlane.xlu0 %838 }
 0x17f   :  { %6028 = vst [vmem:[#allocation88_spill] sm:$0xff] %v3711_v0  ;;  %6029 = vst [vmem:[#allocation89_spill] sm:$0xff] %v3713_v8 }
 0x182   :  { %v3715_v62 = vpop.xlane.xlu1 %841  ;;  %v3717_v49 = vpop.xlane.xlu0 %844 }
 0x183   :  { %6030 = vst [vmem:[#allocation90_spill] sm:$0xff] %v3715_v62  ;;  %6031 = vst [vmem:[#allocation91_spill] sm:$0xff] %v3717_v49 }
 0x186   :  { %v3719_v33 = vpop.xlane.xlu1 %847  ;;  %v3721_v45 = vpop.xlane.xlu0 %850 }
 0x187   :  { %6032 = vst [vmem:[#allocation92_spill] sm:$0xff] %v3719_v33  ;;  %6033 = vst [vmem:[#allocation93_spill] sm:$0xff] %v3721_v45 }
 0x18a   :  { %v3723_v29 = vpop.xlane.xlu1 %853  ;;  %v3725_v41 = vpop.xlane.xlu0 %856 }
 0x18b   :  { %6034 = vst [vmem:[#allocation94_spill] sm:$0xff] %v3723_v29  ;;  %6035 = vst [vmem:[#allocation95_spill] sm:$0xff] %v3725_v41 }
 0x18e   :  { %v3727_v25 = vpop.xlane.xlu1 %859  ;;  %v3729_v37 = vpop.xlane.xlu0 %862 }
 0x18f   :  { %6036 = vst [vmem:[#allocation96_spill] sm:$0xff] %v3727_v25  ;;  %6037 = vst [vmem:[#allocation97_spill] sm:$0xff] %v3729_v37 }
 0x192   :  { %v3731_v31 = vpop.xlane.xlu1 %865  ;;  %v3733_v0 = vpop.xlane.xlu0 %868 }
 0x193   :  { %6038 = vst [vmem:[#allocation98_spill] sm:$0xff] %v3731_v31  ;;  %6039 = vst [vmem:[#allocation99_spill] sm:$0xff] %v3733_v0 }
 0x196   :  { %v3735_v8 = vpop.xlane.xlu1 %871  ;;  %v3737_v62 = vpop.xlane.xlu0 %874 }
 0x197   :  { %6040 = vst [vmem:[#allocation100_spill] sm:$0xff] %v3735_v8  ;;  %6041 = vst [vmem:[#allocation101_spill] sm:$0xff] %v3737_v62  ;;  %v1101_v8 = vlaneseq }
 0x19a   :  { %v3739_v49 = vpop.xlane.xlu1 %877  ;;  %v3741_v33 = vpop.xlane.xlu0 %880 }
 0x19b   :  { %6042 = vst [vmem:[#allocation102_spill] sm:$0xff] %v3739_v49  ;;  %6043 = vst [vmem:[#allocation103_spill] sm:$0xff] %v3741_v33  ;;  %v3761_v33 = vand.u32 127, %v1101_v8 }
 0x19d   :  { %6053 = vst [vmem:[#allocation113_spill] sm:$0xff] %v3761_v33 }
 0x19e   :  { %v3743_v45 = vpop.xlane.xlu1 %883  ;;  %v3745_v29 = vpop.xlane.xlu0 %886 }
 0x19f   :  { %6044 = vst [vmem:[#allocation104_spill] sm:$0xff] %v3743_v45  ;;  %6045 = vst [vmem:[#allocation105_spill] sm:$0xff] %v3745_v29  ;;  %v3856_v29 = vld [vmem:[%s5727_s1 + $0xc0] sm:$0xff] }
 0x1a2   :  { %v3747_v41 = vpop.xlane.xlu1 %889  ;;  %v3749_v25 = vpop.xlane.xlu0 %892 }
 0x1a3   :  { %6046 = vst [vmem:[#allocation106_spill] sm:$0xff] %v3747_v41  ;;  %6047 = vst [vmem:[#allocation107_spill] sm:$0xff] %v3749_v25 }
 0x1a6   :  { %v3751_v37 = vpop.xlane.xlu1 %895  ;;  %v3753_v31 = vpop.xlane.xlu0 %898 }
 0x1a7   :  { %6048 = vst [vmem:[#allocation108_spill] sm:$0xff] %v3751_v37  ;;  %6049 = vst [vmem:[#allocation109_spill] sm:$0xff] %v3753_v31  ;;  %v2699_v37 = vld [vmem:[%s5726_s0 + $0x8] sm:$0xff] }
 0x1aa   :  { %v3755_v0 = vpop.xlane.xlu1 %901  ;;  %v3757_v62 = vpop.xlane.xlu0 %904 }
 0x1ab   :  { %6050 = vst [vmem:[#allocation110_spill] sm:$0xff] %v3755_v0  ;;  %6051 = vst [vmem:[#allocation111_spill] sm:$0xff] %v3757_v62  ;;  %v2700_v0 = vld [vmem:[%s5726_s0] sm:$0xff] }
 0x1ae   :  { %v3759_v49 = vpop.xlane.xlu1 %907 }
 0x1af   :  { %6052 = vst [vmem:[#allocation112_spill] sm:$0xff] %v3759_v49 }
 0x1b2   :  { %v1108_v45 = vpop.permute.xlu1 %1107  ;;  %v1105_v36 = vpop.permute.xlu0 %1104 }
 0x1b3   :  { %vm1296_vm1 = vcmp.eq.s32.totalorder %v3761_v33, %v1108_v45  ;;  %vm1295_vm2 = vcmp.eq.s32.totalorder %v3761_v33, %v1105_v36  ;;  %v2701_v45 = vld [vmem:[%s5726_s0 + $0x10] sm:$0xff] }
 0x1b4   :  { %v1360_v31 = vsel %vm1296_vm1, %v2699_v37, 0.0  ;;  %v1359_v62 = vsel %vm1295_vm2, %v2700_v0, 0.0  ;;  %vm145_vm1 = vcmp.ne.s32.totalorder %v3648_v22, 4294967295 }
 0x1b5   :  { %v1426_v49 = vsel %vm332_vm0, %v1360_v31, 0.0  ;;  %v1423_v8 = vsel %vm332_vm0, %v1359_v62, 0.0  ;;  %v2702_v62 = vld [vmem:[%s5726_s0 + $0x18] sm:$0xff] }
 0x1b6   :  { %v1111_v25 = vpop.permute.xlu1 %1110  ;;  %1427 = vadd.xlane.f32.xlu0 %v1426_v49  ;;  %1424 = vadd.xlane.f32.xlu1 %v1423_v8 }
 0x1b7   :  { %vm1297_vm3 = vcmp.eq.s32.totalorder %v3761_v33, %v1111_v25  ;;  %v2703_v25 = vld [vmem:[%s5726_s0 + $0x20] sm:$0xff] }
 0x1b8   :  { %v1361_v36 = vsel %vm1297_vm3, %v2701_v45, 0.0 }
 0x1b9   :  { %v1429_v37 = vsel %vm332_vm0, %v1361_v36, 0.0 }
 0x1ba   :  { %v1114_v41 = vpop.permute.xlu1 %1113  ;;  %1430 = vadd.xlane.f32.xlu1 %v1429_v37 }
 0x1bb   :  { %vm1298_vm4 = vcmp.eq.s32.totalorder %v3761_v33, %v1114_v41  ;;  %v2704_v41 = vld [vmem:[%s5726_s0 + $0x28] sm:$0xff] }
 0x1bc   :  { %v1362_v0 = vsel %vm1298_vm4, %v2702_v62, 0.0 }
 0x1bd   :  { %v1432_v31 = vsel %vm332_vm0, %v1362_v0, 0.0  ;;  %v3796_v0 = vld [vmem:[%s5727_s1 + $0x30] sm:$0xff] }
 0x1be   :  { %v1117_v49 = vpop.permute.xlu1 %1116  ;;  %1433 = vadd.xlane.f32.xlu0 %v1432_v31  ;;  %v3802_v31 = vld [vmem:[%s5727_s1 + $0x38] sm:$0xff]  ;;  %vm146_vm2 = vcmp.ne.s32.totalorder %v3796_v0, 4294967295 }
 0x1bf   :  { %vm1299_vm5 = vcmp.eq.s32.totalorder %v3761_v33, %v1117_v49  ;;  %v3808_v49 = vld [vmem:[%s5727_s1 + $0x40] sm:$0xff]  ;;  %vm147_vm3 = vcmp.ne.s32.totalorder %v3802_v31, 4294967295 }
 0x1c0   :  { %v1363_v8 = vsel %vm1299_vm5, %v2703_v25, 0.0  ;;  %v3814_v25 = vld [vmem:[%s5727_s1 + $0x50] sm:$0xff]  ;;  %vm148_vm4 = vcmp.ne.s32.totalorder %v3808_v49, 4294967295 }
 0x1c1   :  { %v1435_v45 = vsel %vm332_vm0, %v1363_v8, 0.0  ;;  %v3820_v8 = vld [vmem:[%s5727_s1 + $0x60] sm:$0xff] }
 0x1c2   :  { %v1120_v36 = vpop.permute.xlu1 %1119  ;;  %1436 = vadd.xlane.f32.xlu1 %v1435_v45  ;;  %v3826_v45 = vld [vmem:[%s5727_s1 + $0x70] sm:$0xff] }
 0x1c3   :  { %vm1300_vm6 = vcmp.eq.s32.totalorder %v3761_v33, %v1120_v36  ;;  %v3832_v36 = vld [vmem:[%s5727_s1 + $0x80] sm:$0xff] }
 0x1c4   :  { %v1364_v37 = vsel %vm1300_vm6, %v2704_v41, 0.0  ;;  %v3838_v41 = vld [vmem:[%s5727_s1 + $0x90] sm:$0xff]  ;;  %vm150_vm6 = vcmp.ne.s32.totalorder %v3814_v25, 4294967295 }
 0x1c5   :  { %v1438_v62 = vsel %vm332_vm0, %v1364_v37, 0.0  ;;  %v3844_v37 = vld [vmem:[%s5727_s1 + $0xa0] sm:$0xff] }
 0x1c6   :  { %1439 = vadd.xlane.f32.xlu1 %v1438_v62  ;;  %v3850_v62 = vld [vmem:[%s5727_s1 + $0xb0] sm:$0xff] }
 0x1d7   :  { %1122 = vperm.xlu1 %2442, %v3796_v0  }
 0x1db   :  { %1125 = vperm.xlu1 %2442, %v3802_v31  }
 0x1df   :  { %1128 = vperm.xlu1 %2442, %v3808_v49  }
 0x1e3   :  { %1134 = vperm.xlu1 %2442, %v3814_v25  }
 0x1e7   :  { %1140 = vperm.xlu1 %2442, %v3820_v8  }
 0x1eb   :  { %1146 = vperm.xlu1 %2442, %v3826_v45  }
 0x1ef   :  { %1152 = vperm.xlu1 %2442, %v3832_v36  }
 0x1f3   :  { %1158 = vperm.xlu1 %2442, %v3838_v41  }
 0x1f7   :  { %1164 = vperm.xlu1 %2442, %v3844_v37  }
 0x1fb   :  { %1170 = vperm.xlu1 %2442, %v3850_v62  }
 0x1ff   :  { %1176 = vperm.xlu1 %2442, %v3856_v29  }
 0x203   :  { %1182 = vperm.xlu1 %2442, %v3862_v32  }
 0x207   :  { %1188 = vperm.xlu1 %2442, %v3868_v38  }
 0x20b   :  { %1194 = vperm.xlu1 %2442, %v3874_v46  }
 0x20f   :  { %1200 = vperm.xlu1 %2442, %v3880_v21  }
 0x213   :  { %1206 = vperm.xlu1 %2442, %v3886_v53  }
 0x217   :  { %1215 = vperm.xlu1 %2442, %v3892_v40   ;;  %v3993_v40 = vld [vmem:[%s5727_s1 + $0xe8] sm:$0xff] }
 0x21b   :  { %1218 = vperm.xlu1 %2442, %v3898_v57  }
 0x21f   :  { %1224 = vperm.xlu1 %2442, %v116_v44   ;;  %v2705_v44 = vld [vmem:[%s5726_s0 + $0x30] sm:$0xff] }
 0x223   :  { %1227 = vperm.xlu1 %2442, %v117_v63  }
 0x243   :  { %v3907_v61 = vpop.xlane.xlu1 %1424 }
 0x244   :  { %6056 = vst [vmem:[#allocation116_spill] sm:$0xff] %v3907_v61  ;;  %v3981_v61 = vld [vmem:[%s5727_s1 + $0xc8] sm:$0xff] }
 0x247   :  { %v3909_v17 = vpop.xlane.xlu1 %1430 }
 0x248   :  { %6057 = vst [vmem:[#allocation117_spill] sm:$0xff] %v3909_v17 }
 0x24f   :  { %v3911_v2 = vpop.xlane.xlu1 %1436 }
 0x250   :  { %6058 = vst [vmem:[#allocation118_spill] sm:$0xff] %v3911_v2  ;;  %v2706_v2 = vld [vmem:[%s5726_s0 + $0x38] sm:$0xff] }
 0x253   :  { %v3913_v12 = vpop.xlane.xlu1 %1439 }
 0x254   :  { %6059 = vst [vmem:[#allocation119_spill] sm:$0xff] %v3913_v12 }
 0x257   :  { %v1123_v30 = vpop.permute.xlu1 %1122 }
 0x258   :  { %vm1301_vm7 = vcmp.eq.s32.totalorder %v3761_v33, %v1123_v30 }
 0x259   :  { %v1365_v57 = vsel %vm1301_vm7, %v2705_v44, 0.0  ;;  %v2707_v44 = vld [vmem:[%s5726_s0 + $0x40] sm:$0xff] }
 0x25a   :  { %v1441_v5 = vsel %vm332_vm0, %v1365_v57, 0.0 }
 0x25b   :  { %1442 = vadd.xlane.f32.xlu0 %v1441_v5  ;;  %v1126_v63 = vpop.permute.xlu1 %1125 }
 0x25c   :  { %vm1302_vm8 = vcmp.eq.s32.totalorder %v3761_v33, %v1126_v63  ;;  %v3933_v63 = vld [vmem:[%s5727_s1 + $0x48] sm:$0xff] }
 0x25d   :  { %v1366_v17 = vsel %vm1302_vm8, %v2706_v2, 0.0  ;;  %v3945_v2 = vld [vmem:[%s5727_s1 + $0x68] sm:$0xff]  ;;  %vm149_vm5 = vcmp.ne.s32.totalorder %v3933_v63, 4294967295  ;;  %vm152_vm8 = vcmp.ne.s32.totalorder %v3820_v8, 4294967295 }
 0x25e   :  { %v1444_v12 = vsel %vm332_vm0, %v1366_v17, 0.0  ;;  %v3951_v17 = vld [vmem:[%s5727_s1 + $0x78] sm:$0xff] }
 0x25f   :  { %1445 = vadd.xlane.f32.xlu1 %v1444_v12  ;;  %v1129_v30 = vpop.permute.xlu1 %1128  ;;  %v3939_v12 = vld [vmem:[%s5727_s1 + $0x58] sm:$0xff] }
 0x260   :  { %vm1303_vm9 = vcmp.eq.s32.totalorder %v3761_v33, %v1129_v30  ;;  %v3957_v30 = vld [vmem:[%s5727_s1 + $0x88] sm:$0xff]  ;;  %vm151_vm7 = vcmp.ne.s32.totalorder %v3939_v12, 4294967295 }
 0x261   :  { %v1367_v57 = vsel %vm1303_vm9, %v2707_v44, 0.0  ;;  %v3963_v44 = vld [vmem:[%s5727_s1 + $0x98] sm:$0xff]  ;;  %vm153_vm9 = vcmp.ne.s32.totalorder %v3945_v2, 4294967295 }
 0x262   :  { %v1447_v5 = vsel %vm332_vm0, %v1367_v57, 0.0  ;;  %v3969_v57 = vld [vmem:[%s5727_s1 + $0xa8] sm:$0xff] }
 0x263   :  { %1448 = vadd.xlane.f32.xlu1 %v1447_v5  ;;  %v3975_v5 = vld [vmem:[%s5727_s1 + $0xb8] sm:$0xff]  ;;  %v4081_v6 = vpop.permute.xlu1 %1134 }
 0x271   :  { %1131 = vperm.xlu0 %2441, %v3933_v63  }
 0x275   :  { %1137 = vperm.xlu0 %2441, %v3939_v12  }
 0x279   :  { %1143 = vperm.xlu0 %2441, %v3945_v2  }
 0x27d   :  { %1149 = vperm.xlu0 %2441, %v3951_v17  }
 0x281   :  { %1155 = vperm.xlu0 %2441, %v3957_v30  }
 0x285   :  { %1161 = vperm.xlu0 %2441, %v3963_v44  }
 0x289   :  { %1167 = vperm.xlu0 %2441, %v3969_v57  }
 0x28d   :  { %1173 = vperm.xlu0 %2441, %v3975_v5  }
 0x291   :  { %1179 = vperm.xlu0 %2441, %v3981_v61  }
 0x295   :  { %1185 = vperm.xlu0 %2441, %v3987_v48  }
 0x299   :  { %1191 = vperm.xlu0 %2441, %v3993_v40  }
 0x29d   :  { %1197 = vperm.xlu0 %2441, %v3999_v4  }
 0x2a1   :  { %1203 = vperm.xlu0 %2441, %v4005_v52  }
 0x2a5   :  { %1209 = vperm.xlu0 %2441, %v4011_v11  }
 0x2a9   :  { %1212 = vperm.xlu0 %2441, %v4017_v56   ;;  %v120_v56 = vld [vmem:[%s5727_s1 + $0x160] sm:$0xff] }
 0x2ad   :  { %1221 = vperm.xlu0 %2441, %v4023_v1   ;;  %v5849_v1 = vmov 0.0  }
 0x2ae   :  { %v4038_v11 = vsel %vm141_vm10, 1.0, %v5849_v1  ;;  %v4052_v28 = vsel %vm142_vm13, 1.0, %v5849_v1  ;;  %v4090_v22 = vsel %vm146_vm2, 1.0, %v5849_v1  ;;  %v4101_v0 = vsel %vm147_vm3, 1.0, %v5849_v1 }
 0x2af   :  { %6063 = vst [vmem:[#allocation123_spill] sm:$0xff] %v4038_v11  ;;  %v2209_v60 = vsel %vm1743_vm12, %v4038_v11, 0.0  ;;  %v2211_v3 = vsel %vm1743_vm12, %v4052_v28, 0.0  ;;  %6066 = vst [vmem:[#allocation126_spill] sm:$0xff] %v4090_v22  ;;  %v4110_v31 = vsel %vm148_vm4, 1.0, %v5849_v1  ;;  %v4121_v49 = vsel %vm149_vm5, 1.0, %v5849_v1 }
 0x2b0   :  { %6067 = vst [vmem:[#allocation127_spill] sm:$0xff] %v4101_v0  ;;  %6068 = vst [vmem:[#allocation128_spill] sm:$0xff] %v4110_v31  ;;  %v4154_v12 = vsel %vm152_vm8, 1.0, %v5849_v1  ;;  %vm154_vm10 = vcmp.ne.s32.totalorder %v3826_v45, 4294967295  ;;  %vm1305_vm13 = vcmp.eq.s32.totalorder %v3761_v33, %v4081_v6  ;;  %vm157_vm2 = vcmp.ne.s32.totalorder %v3957_v30, 4294967295  ;;  %v137_v30 = vld [vmem:[%s5727_s1 + $0x1e8] sm:$0xff] }
 0x2b1   :  { %1230 = vperm.xlu0 %2441, %v118_v9   ;;  %v4041_v9 = vsel %vm140_vm11, 1.0, %v5849_v1  ;;  %6069 = vst [vmem:[#allocation129_spill] sm:$0xff] %v4121_v49  ;;  %6072 = vst [vmem:[#allocation132_spill] sm:$0xff] %v4154_v12  ;;  %v4178_v2 = vsel %vm154_vm10, 1.0, %v5849_v1  ;;  %vm155_vm11 = vcmp.ne.s32.totalorder %v3951_v17, 4294967295  ;;  %vm158_vm4 = vcmp.ne.s32.totalorder %v3838_v41, 4294967295 }
 0x2b2   :  { %6064 = vst [vmem:[#allocation124_spill] sm:$0xff] %v4041_v9  ;;  %v2208_v16 = vsel %vm1743_vm12, %v4041_v9, 0.0  ;;  %v4061_v9 = vsel %vm143_vm14, 1.0, %v5849_v1  ;;  %6074 = vst [vmem:[#allocation134_spill] sm:$0xff] %v4178_v2  ;;  %v138_v41 = vld [vmem:[%s5727_s1 + $0x1f0] sm:$0xff]  ;;  %vm160_vm8 = vcmp.ne.s32.totalorder %v3844_v37, 4294967295 }
 0x2b3   :  { %v2213_v34 = vsel %vm1743_vm12, %v4061_v9, 0.0  ;;  %vm161_vm10 = vcmp.ne.s32.totalorder %v3969_v57, 4294967295 }
 0x2b5   :  { %1233 = vperm.xlu0 %2441, %v119_v19   ;;  %v121_v19 = vld [vmem:[%s5727_s1 + $0x168] sm:$0xff] }
 0x2b9   :  { %1236 = vperm.xlu0 %2441, %v120_v56   ;;  %v2210_v56 = vadd.f32 %v2209_v60, %v2208_v16  ;;  %v123_v60 = vld [vmem:[%s5727_s1 + $0x178] sm:$0xff]  ;;  %v4070_v16 = vsel %vm144_vm15, 1.0, %v5849_v1  ;;  %vm156_vm15 = vcmp.ne.s32.totalorder %v3832_v36, 4294967295 }
 0x2bb   :  { %v2212_v11 = vadd.f32 %v2211_v3, %v2210_v56  ;;  %v2215_v3 = vsel %vm1743_vm12, %v4070_v16, 0.0  ;;  %v4079_v56 = vsel %vm145_vm1, 1.0, %v5849_v1 }
 0x2bc   :  { %6065 = vst [vmem:[#allocation125_spill] sm:$0xff] %v4079_v56 }
 0x2bd   :  { %1239 = vperm.xlu0 %2441, %v121_v19   ;;  %v2214_v19 = vadd.f32 %v2213_v34, %v2212_v11  ;;  %v125_v11 = vld [vmem:[%s5727_s1 + $0x188] sm:$0xff] }
 0x2bf   :  { %v2216_v20 = vadd.f32 %v2215_v3, %v2214_v19  ;;  %v126_v19 = vld [vmem:[%s5727_s1 + $0x190] sm:$0xff]  ;;  %v4098_v3 = vpop.permute.xlu1 %1140 }
 0x2c0   :  { %vm1307_vm3 = vcmp.eq.s32.totalorder %v3761_v33, %v4098_v3  ;;  %v2711_v3 = vld [vmem:[%s5726_s0 + $0x60] sm:$0xff] }
 0x2c1   :  { %1242 = vperm.xlu0 %2441, %v122_v27   ;;  %v124_v27 = vld [vmem:[%s5727_s1 + $0x180] sm:$0xff] }
 0x2c5   :  { %1245 = vperm.xlu0 %2441, %v123_v60   ;;  %v2217_v60 = vsel %vm1743_vm12, %v4079_v56, 0.0 }
 0x2c6   :  { %v2218_v34 = vadd.f32 %v2217_v60, %v2216_v20  ;;  %v127_v20 = vld [vmem:[%s5727_s1 + $0x198] sm:$0xff] }
 0x2c9   :  { %1248 = vperm.xlu0 %2441, %v124_v27   ;;  %v2219_v27 = vsel %vm1743_vm12, %v4090_v22, 0.0  ;;  %v4112_v22 = vpop.permute.xlu1 %1146 }
 0x2ca   :  { %v2220_v56 = vadd.f32 %v2219_v27, %v2218_v34  ;;  %v128_v34 = vld [vmem:[%s5727_s1 + $0x1a0] sm:$0xff] }
 0x2cd   :  { %1251 = vperm.xlu0 %2441, %v125_v11   ;;  %v2221_v11 = vsel %vm1743_vm12, %v4101_v0, 0.0  ;;  %v2235_v0 = vsel %vm1743_vm12, %v4178_v2, 0.0  ;;  %v4210_v2 = vsel %vm156_vm15, 1.0, %v5849_v1  ;;  %vm163_vm15 = vcmp.ne.s32.totalorder %v3975_v5, 4294967295 }
 0x2ce   :  { %v2222_v60 = vadd.f32 %v2221_v11, %v2220_v56  ;;  %v129_v56 = vld [vmem:[%s5727_s1 + $0x1a8] sm:$0xff]  ;;  %v4129_v11 = vpop.permute.xlu1 %1152  ;;  %6076 = vst [vmem:[#allocation136_spill] sm:$0xff] %v4210_v2 }
 0x2d1   :  { %1254 = vperm.xlu0 %2441, %v126_v19   ;;  %v2223_v19 = vsel %vm1743_vm12, %v4110_v31, 0.0  ;;  %v4132_v31 = vsel %vm150_vm6, 1.0, %v5849_v1  ;;  %vm159_vm6 = vcmp.ne.s32.totalorder %v3963_v44, 4294967295  ;;  %v139_v44 = vld [vmem:[%s5727_s1 + $0x1f8] sm:$0xff] }
 0x2d2   :  { %v2224_v27 = vadd.f32 %v2223_v19, %v2222_v60  ;;  %6070 = vst [vmem:[#allocation130_spill] sm:$0xff] %v4132_v31  ;;  %v130_v60 = vld [vmem:[%s5727_s1 + $0x1b0] sm:$0xff]  ;;  %v4140_v19 = vpop.permute.xlu1 %1158 }
 0x2d5   :  { %1257 = vperm.xlu0 %2441, %v127_v20   ;;  %v2225_v20 = vsel %vm1743_vm12, %v4121_v49, 0.0  ;;  %v4143_v49 = vsel %vm151_vm7, 1.0, %v5849_v1  ;;  %vm1309_vm7 = vcmp.eq.s32.totalorder %v3761_v33, %v4112_v22  ;;  %v2713_v22 = vld [vmem:[%s5726_s0 + $0x70] sm:$0xff] }
 0x2d6   :  { %v2226_v63 = vadd.f32 %v2225_v20, %v2224_v27  ;;  %6071 = vst [vmem:[#allocation131_spill] sm:$0xff] %v4143_v49  ;;  %v131_v27 = vld [vmem:[%s5727_s1 + $0x1b8] sm:$0xff]  ;;  %v4151_v20 = vpop.xlane.xlu0 %1427 }
 0x2d9   :  { %1260 = vperm.xlu0 %2441, %v128_v34   ;;  %v2227_v34 = vsel %vm1743_vm12, %v4132_v31, 0.0  ;;  %v4164_v31 = vpop.permute.xlu1 %1164 }
 0x2da   :  { %v2228_v25 = vadd.f32 %v2227_v34, %v2226_v63  ;;  %v2231_v34 = vsel %vm1743_vm12, %v4154_v12, 0.0  ;;  %v4162_v8 = vpop.xlane.xlu0 %1433 }
 0x2dd   :  { %1263 = vperm.xlu0 %2441, %v129_v56   ;;  %v2229_v56 = vsel %vm1743_vm12, %v4143_v49, 0.0 }
 0x2de   :  { %v2230_v63 = vadd.f32 %v2229_v56, %v2228_v25  ;;  %v133_v25 = vld [vmem:[%s5727_s1 + $0x1c8] sm:$0xff] }
 0x2e0   :  { %v2232_v49 = vadd.f32 %v2231_v34, %v2230_v63  ;;  %v4180_v63 = vpop.permute.xlu1 %1170  ;;  %v134_v34 = vld [vmem:[%s5727_s1 + $0x1d0] sm:$0xff] }
 0x2e1   :  { %1266 = vperm.xlu0 %2441, %v130_v60   ;;  %v132_v60 = vld [vmem:[%s5727_s1 + $0x1c0] sm:$0xff] }
 0x2e5   :  { %1269 = vperm.xlu0 %2441, %v131_v27   ;;  %v4167_v27 = vsel %vm153_vm9, 1.0, %v5849_v1 }
 0x2e6   :  { %6073 = vst [vmem:[#allocation133_spill] sm:$0xff] %v4167_v27  ;;  %v2233_v56 = vsel %vm1743_vm12, %v4167_v27, 0.0  ;;  %v4191_v27 = vsel %vm155_vm11, 1.0, %v5849_v1  ;;  %vm1311_vm11 = vcmp.eq.s32.totalorder %v3761_v33, %v4129_v11  ;;  %v2715_v11 = vld [vmem:[%s5726_s0 + $0x80] sm:$0xff] }
 0x2e7   :  { %6075 = vst [vmem:[#allocation135_spill] sm:$0xff] %v4191_v27  ;;  %v2237_v17 = vsel %vm1743_vm12, %v4191_v27, 0.0 }
 0x2e8   :  { %v4175_v12 = vpop.xlane.xlu0 %1442 }
 0x2e9   :  { %1272 = vperm.xlu0 %2441, %v132_v60   ;;  %v2234_v60 = vadd.f32 %v2233_v56, %v2232_v49  ;;  %v135_v49 = vld [vmem:[%s5727_s1 + $0x1d8] sm:$0xff]  ;;  %v2708_v56 = vld [vmem:[%s5726_s0 + $0x48] sm:$0xff] }
 0x2ed   :  { %1275 = vperm.xlu0 %2441, %v133_v25   ;;  %v2236_v25 = vadd.f32 %v2235_v0, %v2234_v60  ;;  %v4203_v0 = vpop.permute.xlu1 %1176 }
 0x2ef   :  { %v2238_v27 = vadd.f32 %v2237_v17, %v2236_v25  ;;  %v2710_v25 = vld [vmem:[%s5726_s0 + $0x58] sm:$0xff] }
 0x2f0   :  { %v1132_v45 = vpop.permute.xlu0 %1131 }
 0x2f1   :  { %1278 = vperm.xlu0 %2441, %v134_v34   ;;  %vm1304_vm14 = vcmp.eq.s32.totalorder %v3761_v33, %v1132_v45  ;;  %v2709_v45 = vld [vmem:[%s5726_s0 + $0x50] sm:$0xff] }
 0x2f2   :  { %v1368_v6 = vsel %vm1304_vm14, %v2708_v56, 0.0  ;;  %v1369_v36 = vsel %vm1305_vm13, %v2709_v45, 0.0  ;;  %v136_v56 = vld [vmem:[%s5727_s1 + $0x1e0] sm:$0xff]  ;;  %v4226_v45 = vsel %vm157_vm2, 1.0, %v5849_v1  ;;  %vm162_vm13 = vcmp.ne.s32.totalorder %v3850_v62, 4294967295 }
 0x2f3   :  { %v1450_v60 = vsel %vm332_vm0, %v1368_v6, 0.0  ;;  %v2239_v6 = vsel %vm1743_vm12, %v4210_v2, 0.0  ;;  %6077 = vst [vmem:[#allocation137_spill] sm:$0xff] %v4226_v45  ;;  %v4228_v2 = vpop.permute.xlu1 %1182  ;;  %vm164_vm2 = vcmp.ne.s32.totalorder %v3856_v29, 4294967295 }
 0x2f4   :  { %v1138_v34 = vpop.permute.xlu0 %1137  ;;  %1451 = vadd.xlane.f32.xlu1 %v1450_v60 }
 0x2f5   :  { %1281 = vperm.xlu0 %2441, %v135_v49   ;;  %vm1306_vm1 = vcmp.eq.s32.totalorder %v3761_v33, %v1138_v34  ;;  %v1453_v49 = vsel %vm332_vm0, %v1369_v36, 0.0  ;;  %v2240_v34 = vadd.f32 %v2239_v6, %v2238_v27  ;;  %v2241_v36 = vsel %vm1743_vm12, %v4226_v45, 0.0 }
 0x2f6   :  { %v1370_v17 = vsel %vm1306_vm1, %v2710_v25, 0.0  ;;  %v1371_v27 = vsel %vm1307_vm3, %v2711_v3, 0.0  ;;  %v4241_v6 = vsel %vm158_vm4, 1.0, %v5849_v1  ;;  %vm1313_vm1 = vcmp.eq.s32.totalorder %v3761_v33, %v4140_v19  ;;  %v2717_v19 = vld [vmem:[%s5726_s0 + $0x90] sm:$0xff] }
 0x2f7   :  { %6078 = vst [vmem:[#allocation138_spill] sm:$0xff] %v4241_v6  ;;  %v2242_v25 = vadd.f32 %v2241_v36, %v2240_v34  ;;  %vm165_vm4 = vcmp.ne.s32.totalorder %v3981_v61, 4294967295 }
 0x2f8   :  { %v1144_v60 = vpop.permute.xlu0 %1143  ;;  %1454 = vadd.xlane.f32.xlu1 %v1453_v49 }
 0x2f9   :  { %1284 = vperm.xlu0 %2441, %v136_v56   ;;  %v1456_v56 = vsel %vm332_vm0, %v1370_v17, 0.0  ;;  %vm1308_vm5 = vcmp.eq.s32.totalorder %v3761_v33, %v1144_v60  ;;  %v2243_v17 = vsel %vm1743_vm12, %v4241_v6, 0.0  ;;  %v2712_v60 = vld [vmem:[%s5726_s0 + $0x68] sm:$0xff]  ;;  %v4259_v6 = vsel %vm159_vm6, 1.0, %v5849_v1 }
 0x2fa   :  { %v1372_v34 = vsel %vm1308_vm5, %v2712_v60, 0.0  ;;  %v2244_v36 = vadd.f32 %v2243_v17, %v2242_v25  ;;  %v1373_v25 = vsel %vm1309_vm7, %v2713_v22, 0.0  ;;  %v4272_v17 = vsel %vm160_vm8, 1.0, %v5849_v1 }
 0x2fb   :  { %6079 = vst [vmem:[#allocation139_spill] sm:$0xff] %v4272_v17  ;;  %v2247_v37 = vsel %vm1743_vm12, %v4272_v17, 0.0  ;;  %vm1315_vm5 = vcmp.eq.s32.totalorder %v3761_v33, %v4164_v31  ;;  %vm166_vm6 = vcmp.ne.s32.totalorder %v3862_v32, 4294967295  ;;  %v2719_v31 = vld [vmem:[%s5726_s0 + $0xa0] sm:$0xff]  ;;  %v6171_v17 = vld [vmem:[#allocation90_spill] sm:$0xff] }
 0x2fc   :  { %v1150_v49 = vpop.permute.xlu0 %1149  ;;  %1457 = vadd.xlane.f32.xlu1 %v1456_v56  ;;  %v1459_v56 = vsel %vm332_vm0, %v1371_v27, 0.0  ;;  %v2245_v27 = vsel %vm1743_vm12, %v4259_v6, 0.0 }
 0x2fd   :  { %1287 = vperm.xlu0 %2441, %v137_v30   ;;  %v4250_v30 = vpop.permute.xlu1 %1188  ;;  %v2246_v60 = vadd.f32 %v2245_v27, %v2244_v36  ;;  %vm1310_vm9 = vcmp.eq.s32.totalorder %v3761_v33, %v1150_v49  ;;  %v4289_v49 = vsel %vm161_vm10, 1.0, %v5849_v1  ;;  %vm1317_vm10 = vcmp.eq.s32.totalorder %v3761_v33, %v4180_v63 }
 0x2fe   :  { %6080 = vst [vmem:[#allocation140_spill] sm:$0xff] %v4289_v49  ;;  %v2249_v57 = vsel %vm1743_vm12, %v4289_v49, 0.0 }
 0x2ff   :  { %v2248_v36 = vadd.f32 %v2247_v37, %v2246_v60  ;;  %v1375_v60 = vsel %vm1311_vm11, %v2715_v11, 0.0  ;;  %v4303_v37 = vsel %vm162_vm13, 1.0, %v5849_v1  ;;  %vm168_vm11 = vcmp.ne.s32.totalorder %v3868_v38, 4294967295 }
 0x300   :  { %v1156_v3 = vpop.permute.xlu0 %1155  ;;  %1460 = vadd.xlane.f32.xlu1 %v1459_v56  ;;  %6081 = vst [vmem:[#allocation141_spill] sm:$0xff] %v4303_v37  ;;  %v2251_v62 = vsel %vm1743_vm12, %v4303_v37, 0.0  ;;  %v1381_v38 = vsel %vm1317_vm10, %v2722_v42, 0.0  ;;  %vm173_vm10 = vcmp.ne.s32.totalorder %v4005_v52, 4294967295 }
 0x301   :  { %1290 = vperm.xlu0 %2441, %v138_v41   ;;  %v1462_v41 = vsel %vm332_vm0, %v1372_v34, 0.0  ;;  %v4274_v45 = vpop.permute.xlu1 %1194  ;;  %v1465_v34 = vsel %vm332_vm0, %v1373_v25, 0.0  ;;  %vm1312_vm14 = vcmp.eq.s32.totalorder %v3761_v33, %v1156_v3  ;;  %v4318_v3 = vsel %vm163_vm15, 1.0, %v5849_v1 }
 0x302   :  { %6082 = vst [vmem:[#allocation142_spill] sm:$0xff] %v4318_v3  ;;  %v2253_v5 = vsel %vm1743_vm12, %v4318_v3, 0.0  ;;  %vm1325_vm7 = vcmp.eq.s32.totalorder %v3761_v33, %v4274_v45  ;;  %vm1319_vm15 = vcmp.eq.s32.totalorder %v3761_v33, %v4203_v0 }
 0x304   :  { %v1162_v56 = vpop.permute.xlu0 %1161  ;;  %1463 = vadd.xlane.f32.xlu1 %v1462_v41  ;;  %v2714_v41 = vld [vmem:[%s5726_s0 + $0x78] sm:$0xff] }
 0x305   :  { %1293 = vperm.xlu0 %2441, %v139_v44   ;;  %v1374_v22 = vsel %vm1310_vm9, %v2714_v41, 0.0  ;;  %v4294_v27 = vpop.permute.xlu1 %1200  ;;  %v2250_v41 = vadd.f32 %v2249_v57, %v2248_v36  ;;  %vm1314_vm3 = vcmp.eq.s32.totalorder %v3761_v33, %v1162_v56  ;;  %vm167_vm9 = vcmp.ne.s32.totalorder %v3987_v48, 4294967295 }
 0x306   :  { %v1468_v25 = vsel %vm332_vm0, %v1374_v22, 0.0  ;;  %v1471_v22 = vsel %vm332_vm0, %v1375_v60, 0.0 }
 0x307   :  { %v2252_v36 = vadd.f32 %v2251_v62, %v2250_v41  ;;  %v1377_v41 = vsel %vm1313_vm1, %v2717_v19, 0.0  ;;  %v4332_v62 = vsel %vm164_vm2, 1.0, %v5849_v1  ;;  %v2718_v19 = vld [vmem:[%s5726_s0 + $0x98] sm:$0xff]  ;;  %vm170_vm1 = vcmp.ne.s32.totalorder %v3874_v46, 4294967295  ;;  %v2724_v46 = vld [vmem:[%s5726_s0 + $0xc0] sm:$0xff] }
 0x308   :  { %v4281_v44 = vpop.permute.xlu0 %1167  ;;  %1466 = vadd.xlane.f32.xlu1 %v1465_v34  ;;  %6083 = vst [vmem:[#allocation143_spill] sm:$0xff] %v4332_v62  ;;  %v2255_v29 = vsel %vm1743_vm12, %v4332_v62, 0.0  ;;  %v1378_v1 = vsel %vm1314_vm3, %v2718_v19, 0.0  ;;  %v1383_v42 = vsel %vm1319_vm15, %v2724_v46, 0.0 }
 0x309   :  { %v4320_v57 = vpop.permute.xlu1 %1206  ;;  %vm1316_vm8 = vcmp.eq.s32.totalorder %v3761_v33, %v4281_v44  ;;  %v1495_v54 = vsel %vm332_vm0, %v1383_v42, 0.0 }
 0x30c   :  { %v4297_v34 = vpop.permute.xlu0 %1173  ;;  %1469 = vadd.xlane.f32.xlu1 %v1468_v25  ;;  %v2716_v25 = vld [vmem:[%s5726_s0 + $0x88] sm:$0xff] }
 0x30d   :  { %v1376_v11 = vsel %vm1312_vm14, %v2716_v25, 0.0  ;;  %v4338_v25 = vpop.permute.xlu1 %1215  ;;  %vm1318_vm13 = vcmp.eq.s32.totalorder %v3761_v33, %v4297_v34  ;;  %vm169_vm14 = vcmp.ne.s32.totalorder %v3993_v40, 4294967295 }
 0x30e   :  { %v1474_v60 = vsel %vm332_vm0, %v1376_v11, 0.0  ;;  %v1477_v11 = vsel %vm332_vm0, %v1377_v41, 0.0  ;;  %v1480_v41 = vsel %vm332_vm0, %v1378_v1, 0.0 }
 0x310   :  { %v4310_v49 = vpop.permute.xlu0 %1179  ;;  %1472 = vadd.xlane.f32.xlu1 %v1471_v22  ;;  %v2254_v22 = vadd.f32 %v2253_v5, %v2252_v36  ;;  %v6084_v36 = vmov 0.0  }
 0x311   :  { %v4349_v5 = vsel %vm165_vm4, 1.0, %v6084_v36  ;;  %v4385_v48 = vsel %vm167_vm9, 1.0, %v6084_v36  ;;  %v4421_v50 = vsel %vm169_vm14, 1.0, %v6084_v36  ;;  %vm1320_vm4 = vcmp.eq.s32.totalorder %v3761_v33, %v4310_v49 }
 0x312   :  { %v2256_v56 = vadd.f32 %v2255_v29, %v2254_v22  ;;  %6085 = vst [vmem:[#allocation144_spill] sm:$0xff] %v4349_v5  ;;  %v2257_v61 = vsel %vm1743_vm12, %v4349_v5, 0.0  ;;  %v1379_v22 = vsel %vm1315_vm5, %v2719_v31, 0.0  ;;  %v4363_v29 = vsel %vm166_vm6, 1.0, %v6084_v36  ;;  %6087 = vst [vmem:[#allocation146_spill] sm:$0xff] %v4385_v48 }
 0x313   :  { %6086 = vst [vmem:[#allocation145_spill] sm:$0xff] %v4363_v29  ;;  %v2259_v1 = vsel %vm1743_vm12, %v4363_v29, 0.0  ;;  %v1483_v45 = vsel %vm332_vm0, %v1379_v22, 0.0  ;;  %v2261_v22 = vsel %vm1743_vm12, %v4385_v48, 0.0  ;;  %6089 = vst [vmem:[#allocation148_spill] sm:$0xff] %v4421_v50  ;;  %v2265_v55 = vsel %vm1743_vm12, %v4421_v50, 0.0 }
 0x314   :  { %v4326_v37 = vpop.permute.xlu0 %1185  ;;  %1475 = vadd.xlane.f32.xlu1 %v1474_v60  ;;  %v2258_v32 = vadd.f32 %v2257_v61, %v2256_v56  ;;  %v2721_v56 = vld [vmem:[%s5726_s0 + $0xa8] sm:$0xff]  ;;  %vm171_vm5 = vcmp.ne.s32.totalorder %v3999_v4, 4294967295  ;;  %vm1321_vm6 = vcmp.eq.s32.totalorder %v3761_v33, %v4228_v2  ;;  %v6142_v48 = vld [vmem:[#allocation35_spill] sm:$0xff]  ;;  %v6144_v29 = vld [vmem:[#allocation36_spill] sm:$0xff] }
 0x315   :  { %v1380_v61 = vsel %vm1316_vm8, %v2721_v56, 0.0  ;;  %vm1322_vm9 = vcmp.eq.s32.totalorder %v3761_v33, %v4326_v37 }
 0x316   :  { %v2260_v44 = vadd.f32 %v2259_v1, %v2258_v32  ;;  %v1486_v58 = vsel %vm332_vm0, %v1380_v61, 0.0  ;;  %v4403_v32 = vsel %vm168_vm11, 1.0, %v6084_v36  ;;  %v1382_v61 = vsel %vm1318_vm13, %v2723_v23, 0.0 }
 0x317   :  { %6088 = vst [vmem:[#allocation147_spill] sm:$0xff] %v4403_v32  ;;  %v2263_v24 = vsel %vm1743_vm12, %v4403_v32, 0.0  ;;  %vm1323_vm11 = vcmp.eq.s32.totalorder %v3761_v33, %v4250_v30  ;;  %vm174_vm13 = vcmp.ne.s32.totalorder %v3886_v53, 4294967295 }
 0x318   :  { %v4341_v60 = vpop.permute.xlu0 %1191  ;;  %1478 = vadd.xlane.f32.xlu1 %v1477_v11  ;;  %v4365_v11 = vpop.permute.xlu1 %1218  ;;  %v2262_v1 = vadd.f32 %v2261_v22, %v2260_v44  ;;  %v1492_v22 = vsel %vm332_vm0, %v1382_v61, 0.0 }
 0x319   :  { %v2572_v44 = vpop.eup %2571  ;;  %vm1324_vm15 = vcmp.eq.s32.totalorder %v3761_v33, %v4341_v60 }
 0x31a   :  { %v2264_v34 = vadd.f32 %v2263_v24, %v2262_v1  ;;  %v910_v61 = vmul.f32 0.6931472, %v2572_v44  ;;  %v2727_v44 = vld [vmem:[%s5726_s0 + $0xc8] sm:$0xff] }
 0x31b   :  { %v1384_v7 = vsel %vm1320_vm4, %v2727_v44, 0.0 }
 0x31c   :  { %v4355_v62 = vpop.permute.xlu0 %1197  ;;  %1481 = vadd.xlane.f32.xlu1 %v1480_v41  ;;  %v2720_v41 = vld [vmem:[%s5726_s0 + $0xf0] sm:$0xff]  ;;  %v2266_v1 = vadd.f32 %v2265_v55, %v2264_v34  ;;  %v2726_v34 = vld [vmem:[%s5726_s0 + $0x148] sm:$0xff] }
 0x31d   :  { %v1389_v31 = vsel %vm1325_vm7, %v2720_v41, 0.0  ;;  %vm172_vm7 = vcmp.ne.s32.totalorder %v3880_v21, 4294967295 }
 0x31e   :  { %v1513_v41 = vsel %vm332_vm0, %v1389_v31, 0.0  ;;  %v1489_v31 = vsel %vm332_vm0, %v1381_v38, 0.0  ;;  %v4438_v38 = vsel %vm170_vm1, 1.0, %v6084_v36  ;;  %v4491_v18 = vsel %vm172_vm7, 1.0, %v6084_v36 }
 0x31f   :  { %6090 = vst [vmem:[#allocation149_spill] sm:$0xff] %v4438_v38  ;;  %6092 = vst [vmem:[#allocation151_spill] sm:$0xff] %v4491_v18  ;;  %v2271_v2 = vsel %vm1743_vm12, %v4491_v18, 0.0 }
 0x320   :  { %v4373_v19 = vpop.permute.xlu0 %1203  ;;  %1484 = vadd.xlane.f32.xlu1 %v1483_v45  ;;  %v4393_v45 = vpop.permute.xlu1 %1224 }
 0x321   :  { %vm1328_vm7 = vcmp.eq.s32.totalorder %v3761_v33, %v4373_v19  ;;  %v6125_v19 = vld [vmem:[#allocation76_spill] sm:$0xff] }
 0x324   :  { %1514 = vadd.xlane.f32.xlu0 %v1513_v41  ;;  %v4396_v63 = vpop.permute.xlu0 %1209  ;;  %1487 = vadd.xlane.f32.xlu1 %v1486_v58  ;;  %v1228_v40 = vpop.permute.xlu1 %1227 }
 0x325   :  { %v2574_v58 = vpop.eup %2573  ;;  %vm1336_vm2 = vcmp.eq.s32.totalorder %v3761_v33, %v1228_v40  ;;  %v4471_v40 = vsel %vm171_vm5, 1.0, %v6084_v36  ;;  %vm1327_vm5 = vcmp.eq.s32.totalorder %v3761_v33, %v4294_v27  ;;  %v6121_v27 = vld [vmem:[#allocation74_spill] sm:$0xff] }
 0x326   :  { %v2576_v26 = vpop.eup %2575  ;;  %v1400_v55 = vsel %vm1336_vm2, %v2726_v34, 0.0  ;;  %v912_v46 = vmul.f32 0.6931472, %v2574_v58  ;;  %6091 = vst [vmem:[#allocation150_spill] sm:$0xff] %v4471_v40  ;;  %v2269_v49 = vsel %vm1743_vm12, %v4471_v40, 0.0  ;;  %vm1326_vm2 = vcmp.eq.s32.totalorder %v3761_v33, %v4355_v62  ;;  %v2734_v62 = vld [vmem:[%s5726_s0 + $0xf8] sm:$0xff] }
 0x327   :  { %v2578_v23 = vpop.eup %2577  ;;  %v1546_v42 = vsel %vm332_vm0, %v1400_v55, 0.0 }
 0x328   :  { %v4413_v56 = vpop.permute.xlu0 %1212  ;;  %1490 = vadd.xlane.f32.xlu1 %v1489_v31  ;;  %v2267_v31 = vsel %vm1743_vm12, %v4438_v38, 0.0  ;;  %v4511_v35 = vadd.f32 %v912_v46, %v3285_v39  ;;  %v4533_v39 = vsel %vm173_vm10, 1.0, %v6084_v36  ;;  %vm1329_vm10 = vcmp.eq.s32.totalorder %v3761_v33, %v4320_v57  ;;  %v6146_v38 = vld [vmem:[#allocation83_spill] sm:$0xff] }
 0x329   :  { %v2268_v58 = vadd.f32 %v2267_v31, %v2266_v1  ;;  %v1385_v1 = vsel %vm1321_vm6, %v2728_v59, 0.0  ;;  %v2273_v46 = vsel %vm1743_vm12, %v4533_v39, 0.0 }
 0x32c   :  { %v1222_v41 = vpop.permute.xlu0 %1221  ;;  %1493 = vadd.xlane.f32.xlu1 %v1492_v22 }
 0x32d   :  { %vm1334_vm3 = vcmp.eq.s32.totalorder %v3761_v33, %v1222_v41  ;;  %v2580_v41 = vpop.eup %2579 }
 0x32e   :  { %v1398_v24 = vsel %vm1334_vm3, %v2725_v13, 0.0  ;;  %v914_v13 = vmul.f32 0.6931472, %v2576_v26  ;;  %v916_v26 = vmul.f32 0.6931472, %v2578_v23  ;;  %v2270_v23 = vadd.f32 %v2269_v49, %v2268_v58 }
 0x32f   :  { %v1540_v0 = vsel %vm332_vm0, %v1398_v24, 0.0  ;;  %v2582_v24 = vpop.eup %2581  ;;  %v918_v51 = vmul.f32 0.6931472, %v2580_v41  ;;  %v6093_v41 = vld [vmem:[#allocation17_spill] sm:$0xff] }
 0x330   :  { %1541 = vadd.xlane.f32.xlu0 %v1540_v0  ;;  %v4457_v22 = vpop.permute.xlu0 %1230  ;;  %1496 = vadd.xlane.f32.xlu1 %v1495_v54  ;;  %v1498_v0 = vsel %vm332_vm0, %v1384_v7, 0.0  ;;  %v920_v34 = vmul.f32 0.6931472, %v2582_v24  ;;  %v2584_v31 = vpop.eup %2583  ;;  %v4505_v44 = vadd.f32 %v910_v61, %v6093_v41  ;;  %v1501_v7 = vsel %vm332_vm0, %v1385_v1, 0.0  ;;  %6095 = vst [vmem:[#allocation17_spill] sm:$0xff] %v4533_v39  ;;  %v6096_v1 = vld [vmem:[#allocation15_spill] sm:$0xff] }
 0x331   :  { %v2586_v54 = vpop.eup %2585  ;;  %v4514_v49 = vadd.f32 %v914_v13, %v3279_v15  ;;  %v1386_v61 = vsel %vm1322_vm9, %v2730_v10, 0.0  ;;  %v2272_v15 = vadd.f32 %v2271_v2, %v2270_v23  ;;  %2603 = vlog2.f32 %v6096_v1  ;;  %v6097_v23 = vld [vmem:[#allocation16_spill] sm:$0xff]  ;;  %v2732_v41 = vld [vmem:[%s5726_s0 + $0x168] sm:$0xff]  ;;  %v6099_v10 = vld [vmem:[#allocation67_spill] sm:$0xff] }
 0x332   :  { %v2588_v58 = vpop.eup %2587  ;;  %v4537_v37 = vadd.f32 %v920_v34, %v3295_v14  ;;  %2605 = vlog2.f32 %v6097_v23  ;;  %v2731_v14 = vld [vmem:[%s5726_s0 + $0xe0] sm:$0xff] }
 0x333   :  { %v1387_v34 = vsel %vm1323_vm11, %v2731_v14, 0.0  ;;  %v2274_v2 = vadd.f32 %v2273_v46, %v2272_v15  ;;  %2607 = vlog2.f32 %v6099_v10  ;;  %v6103_v46 = vld [vmem:[#allocation20_spill] sm:$0xff] }
 0x334   :  { %1547 = vadd.xlane.f32.xlu0 %v1546_v42  ;;  %v1234_v4 = vpop.permute.xlu0 %1233  ;;  %1499 = vadd.xlane.f32.xlu1 %v1498_v0  ;;  %v4517_v42 = vadd.f32 %v916_v26, %v3287_v47  ;;  %v2590_v0 = vpop.eup %2589  ;;  %v922_v47 = vmul.f32 0.6931472, %v2584_v31  ;;  %v924_v26 = vmul.f32 0.6931472, %v2586_v54  ;;  %v4554_v54 = vsel %vm174_vm13, 1.0, %v6084_v36 }
 0x335   :  { %vm1338_vm8 = vcmp.eq.s32.totalorder %v3761_v33, %v1234_v4  ;;  %v6094_v4 = vld [vmem:[#allocation18_spill] sm:$0xff]  ;;  %v2592_v13 = vpop.eup %2591  ;;  %v2275_v30 = vsel %vm1743_vm12, %v4554_v54, 0.0  ;;  %vm1330_vm13 = vcmp.eq.s32.totalorder %v3761_v33, %v4396_v63 }
 0x336   :  { %v1402_v55 = vsel %vm1338_vm8, %v2729_v43, 0.0  ;;  %v4526_v59 = vadd.f32 %v918_v51, %v6094_v4  ;;  %v926_v51 = vmul.f32 0.6931472, %v2588_v58  ;;  %v1504_v43 = vsel %vm332_vm0, %v1386_v61, 0.0  ;;  %6098 = vst [vmem:[#allocation18_spill] sm:$0xff] %v4554_v54  ;;  %v6100_v61 = vld [vmem:[#allocation120_spill] sm:$0xff] }
 0x337   :  { %v1552_v21 = vsel %vm332_vm0, %v1402_v55, 0.0  ;;  %v2594_v55 = vpop.eup %2593  ;;  %vm175_vm1 = vcmp.ne.s32.totalorder %v6100_v61, 4294967295  ;;  %v6102_v4 = vld [vmem:[#allocation19_spill] sm:$0xff]  ;;  %v4571_v1 = vadd.f32 %v924_v26, %v6103_v46  ;;  %v930_v14 = vmul.f32 0.6931472, %v2592_v13  ;;  %v6105_v26 = vld [vmem:[#allocation22_spill] sm:$0xff] }
 0x338   :  { %1553 = vadd.xlane.f32.xlu0 %v1552_v21  ;;  %v4508_v24 = vpop.permute.xlu0 %1236  ;;  %1502 = vadd.xlane.f32.xlu1 %v1501_v7  ;;  %v928_v21 = vmul.f32 0.6931472, %v2590_v0  ;;  %v2596_v31 = vpop.eup %2595  ;;  %v6101_v0 = vld [vmem:[#allocation68_spill] sm:$0xff]  ;;  %v4568_v15 = vadd.f32 %v922_v47, %v6102_v4  ;;  %v4591_v13 = vsel %vm175_vm1, 1.0, %v6084_v36  ;;  %v6107_v46 = vld [vmem:[#allocation69_spill] sm:$0xff]  ;;  %vm1331_vm1 = vcmp.eq.s32.totalorder %v3761_v33, %v4413_v56 }
 0x339   :  { %v2598_v58 = vpop.eup %2597  ;;  %2609 = vlog2.f32 %v6101_v0  ;;  %6106 = vst [vmem:[#allocation15_spill] sm:$0xff] %v4591_v13  ;;  %v934_v4 = vmul.f32 0.6931472, %v2596_v31  ;;  %v2277_v60 = vsel %vm1743_vm12, %v4591_v13, 0.0  ;;  %v1390_v31 = vsel %vm1326_vm2, %v2734_v62, 0.0  ;;  %v6115_v62 = vld [vmem:[#allocation23_spill] sm:$0xff] }
 0x33a   :  { %v2600_v23 = vpop.eup %2599  ;;  %v4586_v0 = vadd.f32 %v928_v21, %v6105_v26  ;;  %2611 = vlog2.f32 %v6107_v46  ;;  %v936_v21 = vmul.f32 0.6931472, %v2598_v58  ;;  %v4624_v13 = vadd.f32 %v930_v14, %v6115_v62  ;;  %v6119_v14 = vld [vmem:[#allocation27_spill] sm:$0xff] }
 0x33c   :  { %v1240_v52 = vpop.permute.xlu0 %1239  ;;  %1505 = vadd.xlane.f32.xlu1 %v1504_v43  ;;  %v1507_v43 = vsel %vm332_vm0, %v1387_v34, 0.0  ;;  %v2602_v34 = vpop.eup %2601 }
 0x33d   :  { %vm1340_vm14 = vcmp.eq.s32.totalorder %v3761_v33, %v1240_v52  ;;  %v940_v26 = vmul.f32 0.6931472, %v2602_v34 }
 0x33e   :  { %v1404_v7 = vsel %vm1340_vm14, %v2732_v41, 0.0  ;;  %v6104_v41 = vld [vmem:[#allocation21_spill] sm:$0xff] }
 0x33f   :  { %v1558_v53 = vsel %vm332_vm0, %v1404_v7, 0.0  ;;  %v4577_v10 = vadd.f32 %v926_v51, %v6104_v41  ;;  %v2733_v7 = vld [vmem:[%s5726_s0 + $0xe8] sm:$0xff]  ;;  %v2276_v51 = vadd.f32 %v2275_v30, %v2274_v2  ;;  %v938_v41 = vmul.f32 0.6931472, %v2600_v23  ;;  %v6110_v2 = vld [vmem:[#allocation71_spill] sm:$0xff]  ;;  %v2604_v30 = vpop.eup %2603 }
 0x340   :  { %1559 = vadd.xlane.f32.xlu0 %v1558_v53  ;;  %v4574_v52 = vpop.permute.xlu0 %1242  ;;  %v1388_v47 = vsel %vm1324_vm15, %v2733_v7, 0.0  ;;  %1508 = vadd.xlane.f32.xlu1 %v1507_v43  ;;  %v932_v53 = vmul.f32 0.6931472, %v2594_v55  ;;  %v6108_v43 = vld [vmem:[#allocation121_spill] sm:$0xff]  ;;  %v6109_v55 = vld [vmem:[#allocation70_spill] sm:$0xff]  ;;  %v2606_v46 = vpop.eup %2605 }
 0x341   :  { %vm176_vm3 = vcmp.ne.s32.totalorder %v6108_v43, 4294967295  ;;  %2613 = vlog2.f32 %v6109_v55  ;;  %v1510_v61 = vsel %vm332_vm0, %v1388_v47, 0.0  ;;  %v2278_v58 = vadd.f32 %v2277_v60, %v2276_v51  ;;  %v2735_v47 = vld [vmem:[%s5726_s0 + $0x178] sm:$0xff]  ;;  %v6112_v43 = vld [vmem:[#allocation72_spill] sm:$0xff]  ;;  %v6113_v55 = vld [vmem:[#allocation114_spill] sm:$0xff] }
 0x342   :  { %2615 = vlog2.f32 %v6110_v2  ;;  %v4609_v23 = vsel %vm176_vm3, 1.0, %v6084_v36  ;;  %vm177_vm6 = vcmp.ne.s32.totalorder %v6113_v55, 4294967295  ;;  %v6114_v2 = vld [vmem:[#allocation73_spill] sm:$0xff]  ;;  %v1516_v51 = vsel %vm332_vm0, %v1390_v31, 0.0 }
 0x343   :  { %6111 = vst [vmem:[#allocation16_spill] sm:$0xff] %v4609_v23  ;;  %2617 = vlog2.f32 %v6112_v43  ;;  %v2608_v43 = vpop.eup %2607  ;;  %v6117_v31 = vld [vmem:[#allocation25_spill] sm:$0xff]  ;;  %v4642_v62 = vadd.f32 %v938_v41, %v6119_v14  ;;  %v6123_v41 = vld [vmem:[#allocation28_spill] sm:$0xff]  ;;  %vm1332_vm3 = vcmp.eq.s32.totalorder %v3761_v33, %v4338_v25 }
 0x344   :  { %v1246_v7 = vpop.permute.xlu0 %1245  ;;  %1511 = vadd.xlane.f32.xlu1 %v1510_v61  ;;  %v2279_v61 = vsel %vm1743_vm12, %v4609_v23, 0.0  ;;  %2619 = vlog2.f32 %v6114_v2  ;;  %v2736_v23 = vld [vmem:[%s5726_s0 + $0x100] sm:$0xff]  ;;  %v6118_v2 = vld [vmem:[#allocation26_spill] sm:$0xff] }
 0x345   :  { %vm1342_vm4 = vcmp.eq.s32.totalorder %v3761_v33, %v1246_v7  ;;  %v4639_v39 = vadd.f32 %v936_v21, %v6118_v2  ;;  %v2280_v18 = vadd.f32 %v2279_v61, %v2278_v58  ;;  %2621 = vlog2.f32 %v6121_v27  ;;  %v6122_v21 = vld [vmem:[#allocation115_spill] sm:$0xff]  ;;  %v2737_v27 = vld [vmem:[%s5726_s0 + $0x108] sm:$0xff] }
 0x346   :  { %v1406_v34 = vsel %vm1342_vm4, %v2735_v47, 0.0  ;;  %v6116_v47 = vld [vmem:[#allocation24_spill] sm:$0xff]  ;;  %vm178_vm8 = vcmp.ne.s32.totalorder %v6122_v21, 4294967295  ;;  %v6124_v2 = vld [vmem:[#allocation75_spill] sm:$0xff] }
 0x347   :  { %v1564_v7 = vsel %vm332_vm0, %v1406_v34, 0.0  ;;  %v4627_v54 = vadd.f32 %v932_v53, %v6116_v47  ;;  %v1391_v34 = vsel %vm1327_vm5, %v2736_v23, 0.0  ;;  %v2610_v53 = vpop.eup %2609  ;;  %v942_v47 = vmul.f32 0.6931472, %v2604_v30 }
 0x348   :  { %1565 = vadd.xlane.f32.xlu0 %v1564_v7  ;;  %v4621_v60 = vpop.permute.xlu0 %1248  ;;  %1517 = vadd.xlane.f32.xlu1 %v1516_v51  ;;  %v4636_v7 = vadd.f32 %v934_v4, %v6117_v31  ;;  %v4647_v51 = vsel %vm177_vm6, 1.0, %v6084_v36  ;;  %v4656_v23 = vadd.f32 %v940_v26, %v6123_v41  ;;  %v944_v30 = vmul.f32 0.6931472, %v2606_v46  ;;  %v2612_v61 = vpop.eup %2611  ;;  %v6127_v41 = vld [vmem:[#allocation77_spill] sm:$0xff] }
 0x349   :  { %6120 = vst [vmem:[#allocation67_spill] sm:$0xff] %v4647_v51  ;;  %v2281_v4 = vsel %vm1743_vm12, %v4647_v51, 0.0  ;;  %v946_v31 = vmul.f32 0.6931472, %v2608_v43  ;;  %2623 = vlog2.f32 %v6124_v2  ;;  %v1519_v55 = vsel %vm332_vm0, %v1391_v34, 0.0  ;;  %v2738_v34 = vld [vmem:[%s5726_s0 + $0x188] sm:$0xff] }
 0x34a   :  { %v948_v14 = vmul.f32 0.6931472, %v2610_v53  ;;  %2625 = vlog2.f32 %v6125_v19  ;;  %v1392_v51 = vsel %vm1328_vm7, %v2737_v27, 0.0  ;;  %v4666_v46 = vsel %vm178_vm8, 1.0, %v6084_v36  ;;  %v6129_v19 = vld [vmem:[#allocation78_spill] sm:$0xff] }
 0x34b   :  { %v2614_v26 = vpop.eup %2613  ;;  %6126 = vst [vmem:[#allocation120_spill] sm:$0xff] %v4666_v46  ;;  %v2282_v43 = vadd.f32 %v2281_v4, %v2280_v18  ;;  %2627 = vlog2.f32 %v6127_v41  ;;  %v2283_v2 = vsel %vm1743_vm12, %v4666_v46, 0.0  ;;  %v1522_v27 = vsel %vm332_vm0, %v1392_v51, 0.0  ;;  %v6130_v4 = vld [vmem:[#allocation29_spill] sm:$0xff]  ;;  %v6133_v46 = vld [vmem:[#allocation32_spill] sm:$0xff] }
 0x34c   :  { %v1252_v58 = vpop.permute.xlu0 %1251  ;;  %1520 = vadd.xlane.f32.xlu1 %v1519_v55  ;;  %v2616_v21 = vpop.eup %2615  ;;  %v6128_v55 = vld [vmem:[#allocation122_spill] sm:$0xff]  ;;  %2629 = vlog2.f32 %v6129_v19  ;;  %v4683_v40 = vadd.f32 %v942_v47, %v6130_v4  ;;  %v950_v32 = vmul.f32 0.6931472, %v2612_v61  ;;  %v4698_v47 = vadd.f32 %v948_v14, %v6133_v46 }
 0x34d   :  { %vm1344_vm9 = vcmp.eq.s32.totalorder %v3761_v33, %v1252_v58  ;;  %vm179_vm11 = vcmp.ne.s32.totalorder %v6128_v55, 4294967295  ;;  %v2618_v41 = vpop.eup %2617  ;;  %v952_v57 = vmul.f32 0.6931472, %v2614_v26  ;;  %v954_v46 = vmul.f32 0.6931472, %v2616_v21  ;;  %v6137_v55 = vld [vmem:[#allocation81_spill] sm:$0xff] }
 0x34e   :  { %v1408_v53 = vsel %vm1344_vm9, %v2738_v34, 0.0  ;;  %v6131_v34 = vld [vmem:[#allocation30_spill] sm:$0xff]  ;;  %v2620_v4 = vpop.eup %2619  ;;  %v4704_v61 = vsel %vm179_vm11, 1.0, %v6084_v36  ;;  %v2741_v26 = vld [vmem:[%s5726_s0 + $0x118] sm:$0xff]  ;;  %vm1333_vm6 = vcmp.eq.s32.totalorder %v3761_v33, %v4365_v11  ;;  %vm1335_vm8 = vcmp.eq.s32.totalorder %v3761_v33, %v4393_v45 }
 0x34f   :  { %v1570_v58 = vsel %vm332_vm0, %v1408_v53, 0.0  ;;  %v4686_v50 = vadd.f32 %v944_v30, %v6131_v34  ;;  %v2739_v53 = vld [vmem:[%s5726_s0 + $0x110] sm:$0xff]  ;;  %v6134_v30 = vld [vmem:[#allocation79_spill] sm:$0xff]  ;;  %6135 = vst [vmem:[#allocation68_spill] sm:$0xff] %v4704_v61  ;;  %v6136_v34 = vld [vmem:[#allocation80_spill] sm:$0xff]  ;;  %v2285_v14 = vsel %vm1743_vm12, %v4704_v61, 0.0  ;;  %vm1337_vm11 = vcmp.eq.s32.totalorder %v3761_v33, %v4457_v22 }
 0x350   :  { %1571 = vadd.xlane.f32.xlu0 %v1570_v58  ;;  %v4680_v18 = vpop.permute.xlu0 %1254  ;;  %1523 = vadd.xlane.f32.xlu1 %v1522_v27  ;;  %v1393_v51 = vsel %vm1329_vm10, %v2739_v53, 0.0  ;;  %v6132_v58 = vld [vmem:[#allocation31_spill] sm:$0xff]  ;;  %2631 = vlog2.f32 %v6134_v30  ;;  %v2284_v27 = vadd.f32 %v2283_v2, %v2282_v43  ;;  %v956_v53 = vmul.f32 0.6931472, %v2618_v41  ;;  %v6141_v61 = vld [vmem:[#allocation34_spill] sm:$0xff] }
 0x351   :  { %v4695_v19 = vadd.f32 %v946_v31, %v6132_v58  ;;  %2633 = vlog2.f32 %v6136_v34  ;;  %v2740_v31 = vld [vmem:[%s5727_s1 + $0x140] sm:$0xff]  ;;  %v1525_v43 = vsel %vm332_vm0, %v1393_v51, 0.0  ;;  %v2622_v58 = vpop.eup %2621  ;;  %v958_v63 = vmul.f32 0.6931472, %v2620_v4  ;;  %v6138_v34 = vld [vmem:[#allocation33_spill] sm:$0xff]  ;;  %v2742_v51 = vld [vmem:[%s5726_s0 + $0x198] sm:$0xff] }
 0x352   :  { %vm180_vm14 = vcmp.ne.s32.totalorder %v2740_v31, 4294967295  ;;  %2635 = vlog2.f32 %v6137_v55  ;;  %v1394_v30 = vsel %vm1330_vm13, %v2741_v26, 0.0  ;;  %v4721_v31 = vadd.f32 %v950_v32, %v6138_v34  ;;  %v2755_v22 = vld [vmem:[%s5727_s1 + $0x170] sm:$0xff] }
 0x353   :  { %v2624_v21 = vpop.eup %2623  ;;  %v4724_v41 = vsel %vm180_vm14, 1.0, %v6084_v36  ;;  %v2286_v55 = vadd.f32 %v2285_v14, %v2284_v27  ;;  %v1528_v14 = vsel %vm332_vm0, %v1394_v30, 0.0  ;;  %v960_v3 = vmul.f32 0.6931472, %v2622_v58  ;;  %v2744_v30 = vld [vmem:[%s5726_s0 + $0x120] sm:$0xff]  ;;  %v6151_v58 = vld [vmem:[#allocation85_spill] sm:$0xff] }
 0x354   :  { %v1258_v2 = vpop.permute.xlu0 %1257  ;;  %1526 = vadd.xlane.f32.xlu1 %v1525_v43  ;;  %6139 = vst [vmem:[#allocation19_spill] sm:$0xff] %v4724_v41  ;;  %v2626_v26 = vpop.eup %2625  ;;  %v6140_v43 = vld [vmem:[#allocation82_spill] sm:$0xff]  ;;  %v2287_v32 = vsel %vm1743_vm12, %v4724_v41, 0.0  ;;  %v4748_v41 = vadd.f32 %v956_v53, %v6144_v29  ;;  %v962_v53 = vmul.f32 0.6931472, %v2624_v21  ;;  %vm1339_vm14 = vcmp.eq.s32.totalorder %v3761_v33, %v4508_v24  ;;  %v6184_v24 = vld [vmem:[#allocation97_spill] sm:$0xff] }
 0x355   :  { %vm1346_vm15 = vcmp.eq.s32.totalorder %v3761_v33, %v1258_v2  ;;  %2637 = vlog2.f32 %v6140_v43  ;;  %v2743_v2 = vld [vmem:[%s5727_s1 + $0x148] sm:$0xff]  ;;  %v4745_v43 = vadd.f32 %v954_v46, %v6142_v48  ;;  %v2628_v5 = vpop.eup %2627  ;;  %v6149_v46 = vld [vmem:[#allocation84_spill] sm:$0xff] }
 0x356   :  { %v1410_v4 = vsel %vm1346_vm15, %v2742_v51, 0.0  ;;  %vm181_vm2 = vcmp.ne.s32.totalorder %v2743_v2, 4294967295  ;;  %v4742_v51 = vadd.f32 %v952_v57, %v6141_v61  ;;  %6145 = vst [vmem:[#allocation21_spill] sm:$0xff] %v4748_v41  ;;  %2639 = vlog2.f32 %v6146_v38  ;;  %v6147_v61 = vld [vmem:[#allocation37_spill] sm:$0xff]  ;;  %v2630_v48 = vpop.eup %2629 }
 0x357   :  { %v1576_v27 = vsel %vm332_vm0, %v1410_v4, 0.0  ;;  %6143 = vst [vmem:[#allocation20_spill] sm:$0xff] %v4745_v43  ;;  %v1395_v4 = vsel %vm1331_vm1, %v2744_v30, 0.0  ;;  %v4758_v57 = vadd.f32 %v958_v63, %v6147_v61  ;;  %2641 = vlog2.f32 %v6149_v46  ;;  %v2745_v63 = vld [vmem:[%s5727_s1 + $0x150] sm:$0xff] }
 0x358   :  { %1577 = vadd.xlane.f32.xlu0 %v1576_v27  ;;  %v4739_v34 = vpop.permute.xlu0 %1260  ;;  %1529 = vadd.xlane.f32.xlu1 %v1528_v14  ;;  %v4763_v29 = vsel %vm181_vm2, 1.0, %v6084_v36  ;;  %v2288_v38 = vadd.f32 %v2287_v32, %v2286_v55  ;;  %2643 = vlog2.f32 %v6151_v58  ;;  %vm182_vm4 = vcmp.ne.s32.totalorder %v2745_v63, 4294967295  ;;  %v6152_v30 = vld [vmem:[#allocation86_spill] sm:$0xff]  ;;  %v6153_v32 = vld [vmem:[#allocation87_spill] sm:$0xff]  ;;  %v2746_v58 = vld [vmem:[%s5726_s0 + $0x128] sm:$0xff] }
 0x359   :  { %6148 = vst [vmem:[#allocation22_spill] sm:$0xff] %v4758_v57  ;;  %6150 = vst [vmem:[#allocation69_spill] sm:$0xff] %v4763_v29  ;;  %v2289_v56 = vsel %vm1743_vm12, %v4763_v29, 0.0  ;;  %v964_v14 = vmul.f32 0.6931472, %v2626_v26  ;;  %2645 = vlog2.f32 %v6152_v30  ;;  %v1531_v61 = vsel %vm332_vm0, %v1395_v4, 0.0 }
 0x35a   :  { %v2632_v27 = vpop.eup %2631  ;;  %v966_v2 = vmul.f32 0.6931472, %v2628_v5  ;;  %v968_v21 = vmul.f32 0.6931472, %v2630_v48  ;;  %2647 = vlog2.f32 %v6153_v32  ;;  %v1396_v29 = vsel %vm1332_vm3, %v2746_v58, 0.0  ;;  %v2747_v48 = vld [vmem:[%s5726_s0 + $0x1a8] sm:$0xff] }
 0x35b   :  { %v2634_v55 = vpop.eup %2633  ;;  %v4787_v26 = vsel %vm182_vm4, 1.0, %v6084_v36  ;;  %v2290_v4 = vadd.f32 %v2289_v56, %v2288_v38  ;;  %v6155_v32 = vld [vmem:[#allocation88_spill] sm:$0xff]  ;;  %v6156_v38 = vld [vmem:[#allocation89_spill] sm:$0xff]  ;;  %v1534_v56 = vsel %vm332_vm0, %v1396_v29, 0.0  ;;  %vm186_vm15 = vcmp.ne.s32.totalorder %v2755_v22, 4294967295  ;;  %v6186_v22 = vld [vmem:[#allocation98_spill] sm:$0xff] }
 0x35c   :  { %v1264_v46 = vpop.permute.xlu0 %1263  ;;  %1532 = vadd.xlane.f32.xlu1 %v1531_v61  ;;  %v2636_v5 = vpop.eup %2635  ;;  %6154 = vst [vmem:[#allocation121_spill] sm:$0xff] %v4787_v26  ;;  %2649 = vlog2.f32 %v6155_v32  ;;  %v2291_v25 = vsel %vm1743_vm12, %v4787_v26, 0.0  ;;  %v2748_v61 = vld [vmem:[%s5727_s1 + $0x158] sm:$0xff]  ;;  %v972_v58 = vmul.f32 0.6931472, %v2634_v55  ;;  %v2749_v26 = vld [vmem:[%s5726_s0 + $0x130] sm:$0xff]  ;;  %vm1341_vm2 = vcmp.eq.s32.totalorder %v3761_v33, %v4574_v52 }
 0x35d   :  { %vm1348_vm5 = vcmp.eq.s32.totalorder %v3761_v33, %v1264_v46  ;;  %vm183_vm7 = vcmp.ne.s32.totalorder %v2748_v61, 4294967295  ;;  %v970_v46 = vmul.f32 0.6931472, %v2632_v27  ;;  %2651 = vlog2.f32 %v6156_v38  ;;  %v6157_v27 = vld [vmem:[#allocation38_spill] sm:$0xff]  ;;  %v6199_v52 = vld [vmem:[#allocation52_spill] sm:$0xff] }
 0x35e   :  { %v1412_v30 = vsel %vm1348_vm5, %v2747_v48, 0.0  ;;  %v974_v57 = vmul.f32 0.6931472, %v2636_v5  ;;  %v1397_v41 = vsel %vm1333_vm6, %v2749_v26, 0.0  ;;  %v4810_v55 = vadd.f32 %v960_v3, %v6157_v27  ;;  %v2750_v3 = vld [vmem:[%s5727_s1 + $0x160] sm:$0xff] }
 0x35f   :  { %v1582_v63 = vsel %vm332_vm0, %v1412_v30, 0.0  ;;  %v2638_v32 = vpop.eup %2637  ;;  %v6159_v30 = vld [vmem:[#allocation39_spill] sm:$0xff]  ;;  %v2292_v29 = vadd.f32 %v2291_v25, %v2290_v4  ;;  %v4819_v5 = vsel %vm183_vm7, 1.0, %v6084_v36  ;;  %vm184_vm9 = vcmp.ne.s32.totalorder %v2750_v3, 4294967295  ;;  %v6166_v4 = vld [vmem:[#allocation42_spill] sm:$0xff] }
 0x360   :  { %1583 = vadd.xlane.f32.xlu0 %v1582_v63  ;;  %v4801_v48 = vpop.permute.xlu0 %1266  ;;  %1535 = vadd.xlane.f32.xlu1 %v1534_v56  ;;  %6158 = vst [vmem:[#allocation70_spill] sm:$0xff] %v4810_v55  ;;  %v4813_v38 = vadd.f32 %v962_v53, %v6159_v30  ;;  %6161 = vst [vmem:[#allocation72_spill] sm:$0xff] %v4819_v5  ;;  %v6162_v63 = vld [vmem:[#allocation40_spill] sm:$0xff]  ;;  %v2640_v11 = vpop.eup %2639  ;;  %v2293_v26 = vsel %vm1743_vm12, %v4819_v5, 0.0  ;;  %v6164_v53 = vld [vmem:[#allocation41_spill] sm:$0xff]  ;;  %v4833_v25 = vadd.f32 %v968_v21, %v6166_v4 }
 0x361   :  { %v4822_v43 = vadd.f32 %v964_v14, %v6162_v63  ;;  %v4830_v56 = vadd.f32 %v966_v2, %v6164_v53  ;;  %v2642_v61 = vpop.eup %2641  ;;  %v976_v27 = vmul.f32 0.6931472, %v2638_v32  ;;  %v1537_v14 = vsel %vm332_vm0, %v1397_v41, 0.0  ;;  %v6168_v63 = vld [vmem:[#allocation43_spill] sm:$0xff]  ;;  %v6169_v5 = vld [vmem:[#allocation44_spill] sm:$0xff]  ;;  %v6172_v41 = vld [vmem:[#allocation45_spill] sm:$0xff] }
 0x362   :  { %6160 = vst [vmem:[#allocation71_spill] sm:$0xff] %v4813_v38  ;;  %6167 = vst [vmem:[#allocation23_spill] sm:$0xff] %v4833_v25  ;;  %v4840_v38 = vadd.f32 %v972_v58, %v6169_v5  ;;  %v2644_v55 = vpop.eup %2643  ;;  %2653 = vlog2.f32 %v6171_v17  ;;  %v2751_v2 = vld [vmem:[%s5726_s0 + $0x140] sm:$0xff]  ;;  %v2294_v58 = vadd.f32 %v2293_v26, %v2292_v29  ;;  %v4855_v5 = vsel %vm184_vm9, 1.0, %v6084_v36  ;;  %v2752_v17 = vld [vmem:[%s5726_s0 + $0x1b8] sm:$0xff] }
 0x363   :  { %6163 = vst [vmem:[#allocation114_spill] sm:$0xff] %v4822_v43  ;;  %6165 = vst [vmem:[#allocation73_spill] sm:$0xff] %v4830_v56  ;;  %v4837_v43 = vadd.f32 %v970_v46, %v6168_v63  ;;  %v1399_v21 = vsel %vm1335_vm8, %v2751_v2, 0.0  ;;  %v4851_v46 = vadd.f32 %v974_v57, %v6172_v41  ;;  %v2646_v32 = vpop.eup %2645  ;;  %v6175_v4 = vld [vmem:[#allocation91_spill] sm:$0xff]  ;;  %v2295_v57 = vsel %vm1743_vm12, %v4855_v5, 0.0  ;;  %v2753_v29 = vld [vmem:[%s5727_s1 + $0x168] sm:$0xff] }
 0x364   :  { %v1270_v30 = vpop.permute.xlu0 %1269  ;;  %6170 = vst [vmem:[#allocation24_spill] sm:$0xff] %v4840_v38  ;;  %1538 = vadd.xlane.f32.xlu1 %v1537_v14  ;;  %6174 = vst [vmem:[#allocation26_spill] sm:$0xff] %v4855_v5  ;;  %v2648_v53 = vpop.eup %2647  ;;  %2655 = vlog2.f32 %v6175_v4  ;;  %vm185_vm13 = vcmp.ne.s32.totalorder %v2753_v29, 4294967295  ;;  %v978_v3 = vmul.f32 0.6931472, %v2640_v11  ;;  %v6176_v14 = vld [vmem:[#allocation92_spill] sm:$0xff]  ;;  %vm1343_vm4 = vcmp.eq.s32.totalorder %v3761_v33, %v4621_v60 }
 0x365   :  { %vm1350_vm10 = vcmp.eq.s32.totalorder %v3761_v33, %v1270_v30  ;;  %6173 = vst [vmem:[#allocation25_spill] sm:$0xff] %v4851_v46  ;;  %2657 = vlog2.f32 %v6176_v14  ;;  %v1543_v30 = vsel %vm332_vm0, %v1399_v21, 0.0  ;;  %v6177_v2 = vld [vmem:[#allocation46_spill] sm:$0xff]  ;;  %v980_v4 = vmul.f32 0.6931472, %v2642_v61  ;;  %v6179_v46 = vld [vmem:[#allocation93_spill] sm:$0xff] }
 0x366   :  { %v1414_v45 = vsel %vm1350_vm10, %v2752_v17, 0.0  ;;  %v4874_v41 = vadd.f32 %v976_v27, %v6177_v2  ;;  %v2650_v17 = vpop.eup %2649  ;;  %v982_v5 = vmul.f32 0.6931472, %v2644_v55  ;;  %2659 = vlog2.f32 %v6179_v46  ;;  %v6182_v61 = vld [vmem:[#allocation95_spill] sm:$0xff] }
 0x367   :  { %v1588_v26 = vsel %vm332_vm0, %v1414_v45, 0.0  ;;  %v2754_v45 = vld [vmem:[%s5726_s0 + $0x150] sm:$0xff]  ;;  %v2652_v21 = vpop.eup %2651  ;;  %v2296_v14 = vadd.f32 %v2295_v57, %v2294_v58  ;;  %v4886_v27 = vsel %vm185_vm13, 1.0, %v6084_v36  ;;  %v984_v55 = vmul.f32 0.6931472, %v2646_v32  ;;  %v6183_v57 = vld [vmem:[#allocation96_spill] sm:$0xff] }
 0x368   :  { %1589 = vadd.xlane.f32.xlu0 %v1588_v26  ;;  %v4871_v63 = vpop.permute.xlu0 %1272  ;;  %6178 = vst [vmem:[#allocation27_spill] sm:$0xff] %v4874_v41  ;;  %v1401_v11 = vsel %vm1337_vm11, %v2754_v45, 0.0  ;;  %1544 = vadd.xlane.f32.xlu1 %v1543_v30  ;;  %v6180_v26 = vld [vmem:[#allocation94_spill] sm:$0xff]  ;;  %6181 = vst [vmem:[#allocation74_spill] sm:$0xff] %v4886_v27  ;;  %v2297_v46 = vsel %vm1743_vm12, %v4886_v27, 0.0  ;;  %v2756_v32 = vld [vmem:[%s5726_s0 + $0x160] sm:$0xff]  ;;  %vm1345_vm7 = vcmp.eq.s32.totalorder %v3761_v33, %v4680_v18 }
 0x369   :  { %2661 = vlog2.f32 %v6180_v26  ;;  %v986_v30 = vmul.f32 0.6931472, %v2648_v53  ;;  %v988_v58 = vmul.f32 0.6931472, %v2650_v17  ;;  %v1549_v29 = vsel %vm332_vm0, %v1401_v11, 0.0  ;;  %v2757_v17 = vld [vmem:[%s5726_s0 + $0x1c8] sm:$0xff] }
 0x36a   :  { %2663 = vlog2.f32 %v6182_v61  ;;  %v990_v45 = vmul.f32 0.6931472, %v2652_v21  ;;  %v1403_v26 = vsel %vm1339_vm14, %v2756_v32, 0.0  ;;  %v2298_v61 = vadd.f32 %v2297_v46, %v2296_v14  ;;  %v2758_v14 = vld [vmem:[%s5727_s1 + $0x178] sm:$0xff]  ;;  %v2759_v41 = vld [vmem:[%s5726_s0 + $0x170] sm:$0xff] }
 0x36b   :  { %2665 = vlog2.f32 %v6183_v57  ;;  %v4904_v53 = vsel %vm186_vm15, 1.0, %v6084_v36  ;;  %vm187_vm3 = vcmp.ne.s32.totalorder %v2758_v14, 4294967295  ;;  %v6188_v32 = vld [vmem:[#allocation47_spill] sm:$0xff]  ;;  %vm1347_vm9 = vcmp.eq.s32.totalorder %v3761_v33, %v4739_v34 }
 0x36c   :  { %v1276_v2 = vpop.permute.xlu0 %1275  ;;  %2667 = vlog2.f32 %v6184_v24  ;;  %1550 = vadd.xlane.f32.xlu1 %v1549_v29  ;;  %6185 = vst [vmem:[#allocation115_spill] sm:$0xff] %v4904_v53  ;;  %v2654_v21 = vpop.eup %2653  ;;  %v2299_v57 = vsel %vm1743_vm12, %v4904_v53, 0.0  ;;  %v6187_v29 = vld [vmem:[#allocation99_spill] sm:$0xff]  ;;  %vm1349_vm13 = vcmp.eq.s32.totalorder %v3761_v33, %v4801_v48  ;;  %vm1351_vm15 = vcmp.eq.s32.totalorder %v3761_v33, %v4871_v63 }
 0x36d   :  { %vm1352_vm1 = vcmp.eq.s32.totalorder %v3761_v33, %v1276_v2  ;;  %2669 = vlog2.f32 %v6186_v22  ;;  %v1555_v2 = vsel %vm332_vm0, %v1403_v26, 0.0  ;;  %v6190_v22 = vld [vmem:[#allocation48_spill] sm:$0xff]  ;;  %v6192_v26 = vld [vmem:[#allocation49_spill] sm:$0xff]  ;;  %v6207_v60 = vld [vmem:[#allocation103_spill] sm:$0xff] }
 0x36e   :  { %v1416_v11 = vsel %vm1352_vm1, %v2757_v17, 0.0  ;;  %2671 = vlog2.f32 %v6187_v29  ;;  %v4923_v17 = vadd.f32 %v978_v3, %v6188_v32  ;;  %v4926_v27 = vadd.f32 %v980_v4, %v6190_v22  ;;  %v2656_v53 = vpop.eup %2655  ;;  %v6194_v29 = vld [vmem:[#allocation50_spill] sm:$0xff]  ;;  %v6196_v3 = vld [vmem:[#allocation51_spill] sm:$0xff] }
 0x36f   :  { %v1594_v46 = vsel %vm332_vm0, %v1416_v11, 0.0  ;;  %v1405_v11 = vsel %vm1341_vm2, %v2759_v41, 0.0  ;;  %v4938_v38 = vadd.f32 %v984_v55, %v6194_v29  ;;  %v4941_v32 = vadd.f32 %v986_v30, %v6196_v3  ;;  %v2658_v4 = vpop.eup %2657  ;;  %v2760_v30 = vld [vmem:[%s5727_s1 + $0x180] sm:$0xff]  ;;  %v6204_v3 = vld [vmem:[#allocation101_spill] sm:$0xff]  ;;  %v6218_v34 = vld [vmem:[#allocation107_spill] sm:$0xff] }
 0x370   :  { %1595 = vadd.xlane.f32.xlu0 %v1594_v46  ;;  %v4920_v24 = vpop.permute.xlu0 %1278  ;;  %6189 = vst [vmem:[#allocation28_spill] sm:$0xff] %v4923_v17  ;;  %6191 = vst [vmem:[#allocation75_spill] sm:$0xff] %v4926_v27  ;;  %1556 = vadd.xlane.f32.xlu1 %v1555_v2  ;;  %v4935_v46 = vadd.f32 %v982_v5, %v6192_v26  ;;  %v2300_v22 = vadd.f32 %v2299_v57, %v2298_v61  ;;  %v4945_v27 = vsel %vm187_vm3, 1.0, %v6084_v36  ;;  %v2660_v5 = vpop.eup %2659  ;;  %v6201_v2 = vld [vmem:[#allocation100_spill] sm:$0xff]  ;;  %v6202_v61 = vld [vmem:[#allocation53_spill] sm:$0xff] }
 0x371   :  { %6195 = vst [vmem:[#allocation77_spill] sm:$0xff] %v4938_v38  ;;  %6197 = vst [vmem:[#allocation122_spill] sm:$0xff] %v4941_v32  ;;  %v4950_v41 = vadd.f32 %v988_v58, %v6199_v52  ;;  %2673 = vlog2.f32 %v6201_v2  ;;  %v2301_v55 = vsel %vm1743_vm12, %v4945_v27, 0.0  ;;  %vm188_vm5 = vcmp.ne.s32.totalorder %v2760_v30, 4294967295  ;;  %v6205_v38 = vld [vmem:[#allocation102_spill] sm:$0xff]  ;;  %v6208_v30 = vld [vmem:[#allocation104_spill] sm:$0xff] }
 0x372   :  { %6193 = vst [vmem:[#allocation76_spill] sm:$0xff] %v4935_v46  ;;  %6198 = vst [vmem:[#allocation78_spill] sm:$0xff] %v4945_v27  ;;  %v4959_v57 = vadd.f32 %v990_v45, %v6202_v61  ;;  %v992_v26 = vmul.f32 0.6931472, %v2654_v21  ;;  %v994_v29 = vmul.f32 0.6931472, %v2656_v53  ;;  %2675 = vlog2.f32 %v6204_v3  ;;  %v4988_v3 = vpop.xlane.xlu1 %1445 }
 0x373   :  { %6200 = vst [vmem:[#allocation29_spill] sm:$0xff] %v4950_v41  ;;  %v2662_v14 = vpop.eup %2661  ;;  %v1561_v58 = vsel %vm332_vm0, %v1405_v11, 0.0  ;;  %v996_v32 = vmul.f32 0.6931472, %v2658_v4  ;;  %2677 = vlog2.f32 %v6205_v38  ;;  %v2761_v27 = vld [vmem:[%s5726_s0 + $0x180] sm:$0xff]  ;;  %v2302_v21 = vadd.f32 %v2301_v55, %v2300_v22  ;;  %v2762_v38 = vld [vmem:[%s5726_s0 + $0x1d8] sm:$0xff] }
 0x374   :  { %6203 = vst [vmem:[#allocation30_spill] sm:$0xff] %v4959_v57  ;;  %v1282_v52 = vpop.permute.xlu0 %1281  ;;  %v2664_v2 = vpop.eup %2663  ;;  %v1407_v45 = vsel %vm1343_vm4, %v2761_v27, 0.0  ;;  %1562 = vadd.xlane.f32.xlu1 %v1561_v58  ;;  %v4973_v11 = vsel %vm188_vm5, 1.0, %v6084_v36  ;;  %2679 = vlog2.f32 %v6207_v60  ;;  %v2763_v22 = vld [vmem:[%s5727_s1 + $0x188] sm:$0xff]  ;;  %v998_v17 = vmul.f32 0.6931472, %v2660_v5 }
 0x375   :  { %vm1354_vm6 = vcmp.eq.s32.totalorder %v3761_v33, %v1282_v52  ;;  %v2666_v53 = vpop.eup %2665  ;;  %6206 = vst [vmem:[#allocation31_spill] sm:$0xff] %v4973_v11  ;;  %v2303_v27 = vsel %vm1743_vm12, %v4973_v11, 0.0  ;;  %vm189_vm8 = vcmp.ne.s32.totalorder %v2763_v22, 4294967295  ;;  %2681 = vlog2.f32 %v6208_v30  ;;  %v6211_v11 = vld [vmem:[#allocation55_spill] sm:$0xff] }
 0x376   :  { %v1418_v4 = vsel %vm1354_vm6, %v2762_v38, 0.0  ;;  %v2668_v61 = vpop.eup %2667  ;;  %v1567_v58 = vsel %vm332_vm0, %v1407_v45, 0.0  ;;  %v6209_v38 = vld [vmem:[#allocation54_spill] sm:$0xff]  ;;  %v4997_v57 = vadd.f32 %v994_v29, %v6211_v11  ;;  %v1000_v25 = vmul.f32 0.6931472, %v2662_v14  ;;  %v6228_v56 = vld [vmem:[#allocation59_spill] sm:$0xff] }
 0x377   :  { %v1600_v55 = vsel %vm332_vm0, %v1418_v4, 0.0  ;;  %v4994_v60 = vadd.f32 %v992_v26, %v6209_v38  ;;  %v2670_v46 = vpop.eup %2669  ;;  %v2764_v4 = vld [vmem:[%s5726_s0 + $0x190] sm:$0xff]  ;;  %v6215_v38 = vld [vmem:[#allocation105_spill] sm:$0xff]  ;;  %v2304_v29 = vadd.f32 %v2303_v27, %v2302_v21  ;;  %v5011_v5 = vsel %vm189_vm8, 1.0, %v6084_v36 }
 0x378   :  { %1601 = vadd.xlane.f32.xlu0 %v1600_v55  ;;  %v4991_v52 = vpop.permute.xlu0 %1284  ;;  %6212 = vst [vmem:[#allocation79_spill] sm:$0xff] %v4997_v57  ;;  %v1409_v45 = vsel %vm1345_vm7, %v2764_v4, 0.0  ;;  %1568 = vadd.xlane.f32.xlu1 %v1567_v58  ;;  %v6213_v55 = vld [vmem:[#allocation56_spill] sm:$0xff]  ;;  %v2672_v26 = vpop.eup %2671  ;;  %2683 = vlog2.f32 %v6215_v38  ;;  %6216 = vst [vmem:[#allocation81_spill] sm:$0xff] %v5011_v5  ;;  %v1002_v14 = vmul.f32 0.6931472, %v2664_v2  ;;  %vm1353_vm3 = vcmp.eq.s32.totalorder %v3761_v33, %v4920_v24 }
 0x379   :  { %6210 = vst [vmem:[#allocation32_spill] sm:$0xff] %v4994_v60  ;;  %v5006_v30 = vadd.f32 %v996_v32, %v6213_v55  ;;  %v1004_v11 = vmul.f32 0.6931472, %v2666_v53  ;;  %v2305_v18 = vsel %vm1743_vm12, %v5011_v5, 0.0  ;;  %v2765_v32 = vld [vmem:[%s5727_s1 + $0x190] sm:$0xff]  ;;  %v1573_v27 = vsel %vm332_vm0, %v1409_v45, 0.0 }
 0x37a   :  { %vm190_vm10 = vcmp.ne.s32.totalorder %v2765_v32, 4294967295  ;;  %v1006_v58 = vmul.f32 0.6931472, %v2668_v61  ;;  %v1008_v4 = vmul.f32 0.6931472, %v2670_v46  ;;  %v6217_v21 = vld [vmem:[#allocation106_spill] sm:$0xff]  ;;  %v2306_v61 = vadd.f32 %v2305_v18, %v2304_v29 }
 0x37b   :  { %6214 = vst [vmem:[#allocation80_spill] sm:$0xff] %v5006_v30  ;;  %2685 = vlog2.f32 %v6217_v21  ;;  %v2674_v55 = vpop.eup %2673  ;;  %v1010_v38 = vmul.f32 0.6931472, %v2672_v26  ;;  %v2766_v2 = vld [vmem:[%s5726_s0 + $0x1a0] sm:$0xff]  ;;  %v5028_v46 = vsel %vm190_vm10, 1.0, %v6084_v36  ;;  %v5030_v21 = vpop.xlane.xlu1 %1448  ;;  %v2767_v45 = vld [vmem:[%s5726_s0 + $0x1e8] sm:$0xff]  ;;  %v5064_v41 = vadd.f32 %v1002_v14, %v6228_v56 }
 0x37c   :  { %v1288_v22 = vpop.permute.xlu0 %1287  ;;  %2687 = vlog2.f32 %v6218_v34  ;;  %v1411_v53 = vsel %vm1347_vm9, %v2766_v2, 0.0  ;;  %1574 = vadd.xlane.f32.xlu1 %v1573_v27  ;;  %v2676_v32 = vpop.eup %2675  ;;  %6219 = vst [vmem:[#allocation33_spill] sm:$0xff] %v5028_v46  ;;  %v6220_v2 = vld [vmem:[#allocation108_spill] sm:$0xff]  ;;  %v2307_v27 = vsel %vm1743_vm12, %v5028_v46, 0.0  ;;  %v2768_v29 = vld [vmem:[%s5727_s1 + $0x198] sm:$0xff]  ;;  %v6221_v5 = vld [vmem:[#allocation109_spill] sm:$0xff]  ;;  %vm1355_vm5 = vcmp.eq.s32.totalorder %v3761_v33, %v4991_v52 }
 0x37d   :  { %vm1356_vm11 = vcmp.eq.s32.totalorder %v3761_v33, %v1288_v22  ;;  %v2678_v34 = vpop.eup %2677  ;;  %2689 = vlog2.f32 %v6220_v2  ;;  %vm191_vm14 = vcmp.ne.s32.totalorder %v2768_v29, 4294967295  ;;  %v1012_v22 = vmul.f32 0.6931472, %v2674_v55  ;;  %v6222_v30 = vld [vmem:[#allocation57_spill] sm:$0xff]  ;;  %v2769_v46 = vld [vmem:[%s5726_s0 + $0x1b0] sm:$0xff]  ;;  %6229 = vst [vmem:[#allocation36_spill] sm:$0xff] %v5064_v41 }
 0x37e   :  { %v1420_v26 = vsel %vm1356_vm11, %v2767_v45, 0.0  ;;  %2691 = vlog2.f32 %v6221_v5  ;;  %v1579_v57 = vsel %vm332_vm0, %v1411_v53, 0.0  ;;  %v5049_v2 = vadd.f32 %v998_v17, %v6222_v30  ;;  %v2680_v60 = vpop.eup %2679  ;;  %v6224_v55 = vld [vmem:[#allocation58_spill] sm:$0xff]  ;;  %v6226_v53 = vld [vmem:[#allocation60_spill] sm:$0xff] }
 0x37f   :  { %v1606_v18 = vsel %vm332_vm0, %v1420_v26, 0.0  ;;  %v1413_v26 = vsel %vm1349_vm13, %v2769_v46, 0.0  ;;  %v5058_v5 = vadd.f32 %v1000_v25, %v6224_v55  ;;  %v2682_v17 = vpop.eup %2681  ;;  %v2308_v30 = vadd.f32 %v2307_v27, %v2306_v61  ;;  %v2770_v56 = vld [vmem:[%s5727_s1 + $0x1a0] sm:$0xff]  ;;  %v6233_v14 = vld [vmem:[#allocation62_spill] sm:$0xff]  ;;  %v6234_v46 = vld [vmem:[#allocation63_spill] sm:$0xff] }
 0x380   :  { %1607 = vadd.xlane.f32.xlu0 %v1606_v18  ;;  %v5046_v45 = vpop.permute.xlu0 %1290  ;;  %6223 = vst [vmem:[#allocation82_spill] sm:$0xff] %v5049_v2  ;;  %1580 = vadd.xlane.f32.xlu1 %v1579_v57  ;;  %v5061_v18 = vadd.f32 %v1004_v11, %v6226_v53  ;;  %v5068_v2 = vsel %vm191_vm14, 1.0, %v6084_v36  ;;  %v6231_v57 = vld [vmem:[#allocation61_spill] sm:$0xff]  ;;  %vm192_vm1 = vcmp.ne.s32.totalorder %v2770_v56, 4294967295  ;;  %v5083_v61 = vadd.f32 %v1008_v4, %v6233_v14  ;;  %v6246_v24 = vld [vmem:[#allocation6_spill] sm:$0xff]  ;;  %v6251_v52 = vld [vmem:[#allocation112_spill] sm:$0xff] }
 0x381   :  { %6225 = vst [vmem:[#allocation34_spill] sm:$0xff] %v5058_v5  ;;  %6230 = vst [vmem:[#allocation83_spill] sm:$0xff] %v5068_v2  ;;  %v5072_v48 = vpop.xlane.xlu1 %1451  ;;  %v5075_v25 = vadd.f32 %v1006_v58, %v6231_v57  ;;  %v2309_v11 = vsel %vm1743_vm12, %v5068_v2, 0.0  ;;  %v5086_v27 = vadd.f32 %v1010_v38, %v6234_v46  ;;  %v1014_v55 = vmul.f32 0.6931472, %v2676_v32  ;;  %v2771_v5 = vld [vmem:[%s5726_s0 + $0x1c0] sm:$0xff] }
 0x382   :  { %6227 = vst [vmem:[#allocation35_spill] sm:$0xff] %v5061_v18  ;;  %v2684_v29 = vpop.eup %2683  ;;  %v1016_v53 = vmul.f32 0.6931472, %v2678_v34  ;;  %v1585_v58 = vsel %vm332_vm0, %v1413_v26, 0.0  ;;  %v1018_v2 = vmul.f32 0.6931472, %v2680_v60  ;;  %v2310_v32 = vadd.f32 %v2309_v11, %v2308_v30 }
 0x383   :  { %6232 = vst [vmem:[#allocation37_spill] sm:$0xff] %v5075_v25  ;;  %6235 = vst [vmem:[#allocation84_spill] sm:$0xff] %v5086_v27  ;;  %v6236_v25 = vld [vmem:[#allocation64_spill] sm:$0xff]  ;;  %v1020_v18 = vmul.f32 0.6931472, %v2682_v17  ;;  %v1415_v4 = vsel %vm1351_vm15, %v2771_v5, 0.0  ;;  %vm1357_vm7 = vcmp.eq.s32.totalorder %v3761_v33, %v5046_v45 }
 0x384   :  { %v1294_v57 = vpop.permute.xlu0 %1293  ;;  %v5090_v41 = vadd.f32 %v1012_v22, %v6236_v25  ;;  %1586 = vadd.xlane.f32.xlu1 %v1585_v58  ;;  %v5101_v34 = vsel %vm192_vm1, 1.0, %v6084_v36  ;;  %v2772_v60 = vld [vmem:[%s5726_s0 + $0x1f8] sm:$0xff]  ;;  %v1022_v5 = vmul.f32 0.6931472, %v2684_v29  ;;  %v6238_v17 = vld [vmem:[#allocation110_spill] sm:$0xff]  ;;  %v2773_v25 = vld [vmem:[%s5727_s1 + $0x1a8] sm:$0xff] }
 0x385   :  { %vm1358_vm2 = vcmp.eq.s32.totalorder %v3761_v33, %v1294_v57  ;;  %v2686_v38 = vpop.eup %2685  ;;  %6237 = vst [vmem:[#allocation85_spill] sm:$0xff] %v5101_v34  ;;  %v5108_v26 = vpop.xlane.xlu1 %1454  ;;  %2693 = vlog2.f32 %v6238_v17  ;;  %v2311_v30 = vsel %vm1743_vm12, %v5101_v34, 0.0  ;;  %vm193_vm4 = vcmp.ne.s32.totalorder %v2773_v25, 4294967295  ;;  %v6239_v11 = vld [vmem:[#allocation111_spill] sm:$0xff]  ;;  %v6240_v46 = vld [vmem:[#allocation65_spill] sm:$0xff]  ;;  %v6242_v25 = vld [vmem:[#allocation66_spill] sm:$0xff] }
 0x386   :  { %v1422_v22 = vsel %vm1358_vm2, %v2772_v60, 0.0  ;;  %v2688_v63 = vpop.eup %2687  ;;  %2695 = vlog2.f32 %v6239_v11  ;;  %v1591_v56 = vsel %vm332_vm0, %v1415_v4, 0.0  ;;  %v5120_v58 = vadd.f32 %v1014_v55, %v6240_v46  ;;  %v2774_v60 = vld [vmem:[%s5726_s0 + $0x1d0] sm:$0xff]  ;;  %v6243_v4 = vld [vmem:[#allocation5_spill] sm:$0xff] }
 0x387   :  { %v1612_v14 = vsel %vm332_vm0, %v1422_v22, 0.0  ;;  %v2690_v29 = vpop.eup %2689  ;;  %v1024_v57 = vmul.f32 0.6931472, %v2686_v38  ;;  %v1417_v17 = vsel %vm1353_vm3, %v2774_v60, 0.0  ;;  %v5129_v11 = vadd.f32 %v1016_v53, %v6242_v25  ;;  %v6256_v45 = vld [vmem:[#allocation9_spill] sm:$0xff] }
 0x388   :  { %6241 = vst [vmem:[#allocation86_spill] sm:$0xff] %v5120_v58  ;;  %1592 = vadd.xlane.f32.xlu1 %v1591_v56  ;;  %1613 = vadd.xlane.f32.xlu0 %v1612_v14  ;;  %v5132_v22 = vadd.f32 %v1018_v2, %v6243_v4  ;;  %v2692_v55 = vpop.eup %2691  ;;  %v2312_v46 = vadd.f32 %v2311_v30, %v2310_v32  ;;  %v5135_v38 = vsel %vm193_vm4, 1.0, %v6084_v36  ;;  %v6248_v56 = vld [vmem:[#allocation116_spill] sm:$0xff]  ;;  %v2775_v2 = vld [vmem:[%s5727_s1 + $0x1b0] sm:$0xff]  ;;  %v6249_v32 = vld [vmem:[#allocation7_spill] sm:$0xff]  ;;  %2697 = vlog2.f32 %v6251_v52 }
 0x389   :  { %6245 = vst [vmem:[#allocation88_spill] sm:$0xff] %v5135_v38  ;;  %v5139_v34 = vpop.xlane.xlu1 %1457  ;;  %v5142_v60 = vadd.f32 %v1020_v18, %v6246_v24  ;;  %v1880_v14 = vsub.f32 1.0, %v6248_v56  ;;  %v2313_v53 = vsel %vm1743_vm12, %v5135_v38, 0.0  ;;  %vm194_vm6 = vcmp.ne.s32.totalorder %v2775_v2, 4294967295  ;;  %v2776_v58 = vld [vmem:[%s5726_s0 + $0x1e0] sm:$0xff] }
 0x38a   :  { %6244 = vst [vmem:[#allocation87_spill] sm:$0xff] %v5132_v22  ;;  %v5151_v30 = vadd.f32 %v1022_v5, %v6249_v32  ;;  %v1026_v25 = vmul.f32 0.6931472, %v2688_v63  ;;  %v1881_v4 = vsub.f32 1.0, %v4151_v20  ;;  %v1597_v18 = vsel %vm332_vm0, %v1417_v17, 0.0 }
 0x38b   :  { %6247 = vst [vmem:[#allocation89_spill] sm:$0xff] %v5142_v60  ;;  %v1028_v24 = vmul.f32 0.6931472, %v2690_v29  ;;  %v1030_v22 = vmul.f32 0.6931472, %v2692_v55  ;;  %v1419_v27 = vsel %vm1355_vm5, %v2776_v58, 0.0  ;;  %v1615_v63 = vsub.f32 %v4505_v44, %v6248_v56 }
 0x38c   :  { %6250 = vst [vmem:[#allocation38_spill] sm:$0xff] %v5151_v30  ;;  %1598 = vadd.xlane.f32.xlu1 %v1597_v18  ;;  %v6252_v60 = vld [vmem:[#allocation8_spill] sm:$0xff]  ;;  %v2314_v5 = vadd.f32 %v2313_v53, %v2312_v46  ;;  %v5165_v32 = vsel %vm194_vm6, 1.0, %v6084_v36  ;;  %v1944_v17 = vmul.f32 %v1880_v14, %v1880_v14  ;;  %v1616_v58 = vsub.f32 %v4511_v35, %v4151_v20  ;;  %v2777_v44 = vld [vmem:[%s5727_s1 + $0x1b8] sm:$0xff]  ;;  %v6255_v46 = vld [vmem:[#allocation117_spill] sm:$0xff] }
 0x38d   :  { %v5160_v2 = vadd.f32 %v1024_v57, %v6252_v60  ;;  %6254 = vst [vmem:[#allocation40_spill] sm:$0xff] %v5165_v32  ;;  %v5169_v29 = vpop.xlane.xlu1 %1460  ;;  %v2315_v57 = vsel %vm1743_vm12, %v5165_v32, 0.0  ;;  %vm195_vm8 = vcmp.ne.s32.totalorder %v2777_v44, 4294967295  ;;  %v1945_v55 = vmul.f32 %v1881_v4, %v1881_v4  ;;  %v2778_v20 = vld [vmem:[%s5726_s0 + $0x1f0] sm:$0xff]  ;;  %v6260_v4 = vld [vmem:[#allocation11_spill] sm:$0xff] }
 0x38e   :  { %v1882_v60 = vsub.f32 1.0, %v6255_v46  ;;  %v1603_v56 = vsel %vm332_vm0, %v1419_v27, 0.0  ;;  %v5181_v53 = vadd.f32 %v1026_v25, %v6256_v45  ;;  %v1883_v52 = vsub.f32 1.0, %v4162_v8  ;;  %v6258_v18 = vld [vmem:[#allocation10_spill] sm:$0xff]  ;;  %v6262_v27 = vld [vmem:[#allocation124_spill] sm:$0xff] }
 0x38f   :  { %6253 = vst [vmem:[#allocation39_spill] sm:$0xff] %v5160_v2  ;;  %v2694_v14 = vpop.eup %2693  ;;  %v1421_v35 = vsel %vm1357_vm7, %v2778_v20, 0.0  ;;  %v5188_v33 = vadd.f32 %v1028_v24, %v6258_v18  ;;  %v5191_v30 = vadd.f32 %v1030_v22, %v6260_v4  ;;  %v1679_v2 = vmul.f32 %v6262_v27, %v1615_v63  ;;  %v6263_v24 = vld [vmem:[#allocation123_spill] sm:$0xff]  ;;  %v2779_v63 = vld [vmem:[%s5727_s1 + $0x1c0] sm:$0xff] }
 0x390   :  { %6257 = vst [vmem:[#allocation41_spill] sm:$0xff] %v5181_v53  ;;  %1604 = vadd.xlane.f32.xlu1 %v1603_v56  ;;  %v2696_v32 = vpop.eup %2695  ;;  %v1617_v25 = vsub.f32 %v4514_v49, %v6255_v46  ;;  %v2316_v45 = vadd.f32 %v2315_v57, %v2314_v5  ;;  %v5198_v53 = vsel %vm195_vm8, 1.0, %v6084_v36  ;;  %v2008_v56 = vmul.f32 %v6262_v27, %v1944_v17 }
 0x391   :  { %6259 = vst [vmem:[#allocation42_spill] sm:$0xff] %v5188_v33  ;;  %6261 = vst [vmem:[#allocation43_spill] sm:$0xff] %v5191_v30  ;;  %v5200_v38 = vpop.xlane.xlu1 %1463  ;;  %v1680_v20 = vmul.f32 %v6263_v24, %v1616_v58  ;;  %v2317_v22 = vsel %vm1743_vm12, %v5198_v53, 0.0  ;;  %vm196_vm9 = vcmp.ne.s32.totalorder %v2779_v63, 4294967295  ;;  %v2009_v49 = vmul.f32 %v6263_v24, %v1945_v55  ;;  %v6264_v58 = vld [vmem:[#allocation118_spill] sm:$0xff]  ;;  %v6266_v24 = vld [vmem:[#allocation119_spill] sm:$0xff] }
 0x392   :  { %v1946_v5 = vmul.f32 %v1882_v60, %v1882_v60  ;;  %v1618_v57 = vsub.f32 %v4517_v42, %v4162_v8  ;;  %v1609_v44 = vsel %vm332_vm0, %v1421_v35, 0.0  ;;  %v1032_v46 = vmul.f32 0.6931472, %v2694_v14  ;;  %v2698_v27 = vpop.eup %2697  ;;  %v2780_v14 = vld [vmem:[%s5727_s1 + $0x1c8] sm:$0xff] }
 0x393   :  { %v1034_v17 = vmul.f32 0.6931472, %v2696_v32  ;;  %v1947_v18 = vmul.f32 %v1883_v52, %v1883_v52  ;;  %v1884_v4 = vsub.f32 1.0, %v6264_v58  ;;  %v1744_v30 = vsel %vm1743_vm12, %v1679_v2, 0.0 }
 0x394   :  { %1610 = vadd.xlane.f32.xlu1 %v1609_v44  ;;  %v1681_v33 = vmul.f32 %v4052_v28, %v1617_v25  ;;  %v2318_v63 = vadd.f32 %v2317_v22, %v2316_v45  ;;  %v5217_v55 = vsel %vm196_vm9, 1.0, %v6084_v36  ;;  %v2072_v8 = vsel %vm1743_vm12, %v2008_v56, 0.0  ;;  %v6267_v22 = vld [vmem:[#allocation12_spill] sm:$0xff] }
 0x395   :  { %6265 = vst [vmem:[#allocation44_spill] sm:$0xff] %v5217_v55  ;;  %v5219_v60 = vpop.xlane.xlu1 %1466  ;;  %v1745_v42 = vsel %vm1743_vm12, %v1680_v20, 0.0  ;;  %v2319_v32 = vsel %vm1743_vm12, %v5217_v55, 0.0  ;;  %vm197_vm0 = vcmp.ne.s32.totalorder %v2780_v14, 4294967295  ;;  %v2073_v2 = vsel %vm1743_vm12, %v2009_v49, 0.0 }
 0x396   :  { %v2010_v52 = vmul.f32 %v4052_v28, %v1946_v5  ;;  %v1682_v35 = vmul.f32 %v4061_v9, %v1618_v57  ;;  %v1619_v25 = vsub.f32 %v4526_v59, %v6264_v58  ;;  %v2011_v45 = vmul.f32 %v4061_v9, %v1947_v18  ;;  %v6268_v5 = vld [vmem:[#allocation13_spill] sm:$0xff] }
 0x397   :  { %v1948_v56 = vmul.f32 %v1884_v4, %v1884_v4  ;;  %v1885_v20 = vsub.f32 1.0, %v6266_v24  ;;  %v5236_v44 = vadd.f32 %v1032_v46, %v6267_v22  ;;  %v1747_v55 = vsel %vm1743_vm12, %v1681_v33, 0.0  ;;  %v2781_v46 = vld [vmem:[%s5727_s1 + $0x1d0] sm:$0xff] }
 0x398   :  { %v2320_v14 = vadd.f32 %v2319_v32, %v2318_v63  ;;  %v5240_v49 = vsel %vm197_vm0, 1.0, %v6084_v36  ;;  %v5245_v57 = vadd.f32 %v1034_v17, %v6268_v5  ;;  %v1746_v59 = vadd.f32 %v1745_v42, %v1744_v30 }
 0x399   :  { %v5242_v28 = vpop.xlane.xlu1 %1469  ;;  %v2074_v58 = vadd.f32 %v2073_v2, %v2072_v8  ;;  %v2321_v9 = vsel %vm1743_vm12, %v5240_v49, 0.0  ;;  %vm198_vm10 = vcmp.ne.s32.totalorder %v2781_v46, 4294967295  ;;  %v2075_v33 = vsel %vm1743_vm12, %v2010_v52, 0.0  ;;  %v2782_v52 = vld [vmem:[%s5727_s1 + $0x1d8] sm:$0xff] }
 0x39a   :  { %v1749_v18 = vsel %vm1743_vm12, %v1682_v35, 0.0  ;;  %v1683_v4 = vmul.f32 %v4070_v16, %v1619_v25  ;;  %v1620_v17 = vsub.f32 %v4537_v37, %v6266_v24  ;;  %v1748_v63 = vadd.f32 %v1747_v55, %v1746_v59 }
 0x39b   :  { %v2077_v30 = vsel %vm1743_vm12, %v2011_v45, 0.0  ;;  %v2012_v8 = vmul.f32 %v4070_v16, %v1948_v56  ;;  %v1949_v42 = vmul.f32 %v1885_v20, %v1885_v20  ;;  %v1886_v32 = vsub.f32 1.0, %v4175_v12  ;;  %v6269_v56 = vld [vmem:[#allocation125_spill] sm:$0xff] }
 0x39c   :  { %v2322_v2 = vadd.f32 %v2321_v9, %v2320_v14  ;;  %v5261_v22 = vsel %vm198_vm10, 1.0, %v6084_v36  ;;  %vm199_vm11 = vcmp.ne.s32.totalorder %v2782_v52, 4294967295  ;;  %v1036_v37 = vmul.f32 0.6931472, %v2698_v27 }
 0x39d   :  { %v5266_v35 = vpop.xlane.xlu1 %1472  ;;  %v2076_v55 = vadd.f32 %v2075_v33, %v2074_v58  ;;  %v1750_v25 = vadd.f32 %v1749_v18, %v1748_v63  ;;  %v2323_v16 = vsel %vm1743_vm12, %v5261_v22, 0.0  ;;  %v1751_v45 = vsel %vm1743_vm12, %v1683_v4, 0.0  ;;  %v2783_v18 = vld [vmem:[%s5727_s1 + $0x1e0] sm:$0xff]  ;;  %v6270_v63 = vld [vmem:[#allocation14_spill] sm:$0xff] }
 0x39e   :  { %v1684_v24 = vmul.f32 %v6269_v56, %v1620_v17  ;;  %v1621_v20 = vsub.f32 %v4568_v15, %v4175_v12  ;;  %v1887_v14 = vsub.f32 1.0, %v4988_v3  ;;  %v2079_v59 = vsel %vm1743_vm12, %v2012_v8, 0.0 }
 0x39f   :  { %v2078_v5 = vadd.f32 %v2077_v30, %v2076_v55  ;;  %v2013_v9 = vmul.f32 %v6269_v56, %v1949_v42  ;;  %v5278_v27 = vsel %vm199_vm11, 1.0, %v6084_v36  ;;  %v1950_v58 = vmul.f32 %v1886_v32, %v1886_v32 }
 0x3a0   :  { %v1622_v46 = vsub.f32 %v4571_v1, %v4988_v3  ;;  %v2324_v33 = vadd.f32 %v2323_v16, %v2322_v2  ;;  %vm200_vm13 = vcmp.ne.s32.totalorder %v2783_v18, 4294967295  ;;  %v1752_v15 = vadd.f32 %v1751_v45, %v1750_v25  ;;  %v6271_v3 = vld [vmem:[#allocation126_spill] sm:$0xff] }
 0x3a1   :  { %v5285_v12 = vpop.xlane.xlu1 %1475  ;;  %v1888_v4 = vsub.f32 1.0, %v5030_v21  ;;  %v2325_v17 = vsel %vm1743_vm12, %v5278_v27, 0.0  ;;  %v5291_v30 = vadd.f32 %v1036_v37, %v6270_v63  ;;  %v2080_v8 = vadd.f32 %v2079_v59, %v2078_v5  ;;  %v6272_v37 = vld [vmem:[#allocation127_spill] sm:$0xff] }
 0x3a2   :  { %v1753_v1 = vsel %vm1743_vm12, %v1684_v24, 0.0  ;;  %v1685_v42 = vmul.f32 %v6271_v3, %v1621_v20  ;;  %v1951_v32 = vmul.f32 %v1887_v14, %v1887_v14  ;;  %v2081_v2 = vsel %vm1743_vm12, %v2013_v9, 0.0 }
 0x3a3   :  { %v1623_v52 = vsub.f32 %v4577_v10, %v5030_v21  ;;  %v5299_v55 = vsel %vm200_vm13, 1.0, %v6084_v36  ;;  %v1889_v25 = vsub.f32 1.0, %v5072_v48  ;;  %v2014_v16 = vmul.f32 %v6271_v3, %v1950_v58 }
 0x3a4   :  { %v1686_v45 = vmul.f32 %v6272_v37, %v1622_v46  ;;  %v2326_v56 = vadd.f32 %v2325_v17, %v2324_v33  ;;  %v1890_v24 = vsub.f32 1.0, %v5108_v26  ;;  %v1754_v20 = vadd.f32 %v1753_v1, %v1752_v15  ;;  %v2784_v46 = vld [vmem:[%s5727_s1 + $0x1e8] sm:$0xff]  ;;  %v6273_v33 = vld [vmem:[#allocation128_spill] sm:$0xff] }
 0x3a5   :  { %v5305_v5 = vpop.xlane.xlu1 %1478  ;;  %v1952_v14 = vmul.f32 %v1888_v4, %v1888_v4  ;;  %v2327_v59 = vsel %vm1743_vm12, %v5299_v55, 0.0  ;;  %v1624_v10 = vsub.f32 %v4586_v0, %v5072_v48  ;;  %v2082_v21 = vadd.f32 %v2081_v2, %v2080_v8 }
 0x3a6   :  { %v1755_v9 = vsel %vm1743_vm12, %v1685_v42, 0.0  ;;  %v2015_v58 = vmul.f32 %v6272_v37, %v1951_v32  ;;  %vm201_vm14 = vcmp.ne.s32.totalorder %v2784_v46, 4294967295  ;;  %v1687_v18 = vmul.f32 %v6273_v33, %v1623_v52  ;;  %v6274_v42 = vld [vmem:[#allocation129_spill] sm:$0xff]  ;;  %v6276_v46 = vld [vmem:[#allocation131_spill] sm:$0xff] }
 0x3a7   :  { %v1953_v15 = vmul.f32 %v1889_v25, %v1889_v25  ;;  %v1625_v4 = vsub.f32 %v4624_v13, %v5108_v26  ;;  %v1891_v17 = vsub.f32 1.0, %v5139_v34  ;;  %v2083_v0 = vsel %vm1743_vm12, %v2014_v16, 0.0 }
 0x3a8   :  { %v1757_v48 = vsel %vm1743_vm12, %v1686_v45, 0.0  ;;  %v5322_v63 = vadd.f32 %v2327_v59, %v2326_v56  ;;  %v1954_v8 = vmul.f32 %v1890_v24, %v1890_v24  ;;  %v2016_v3 = vmul.f32 %v6273_v33, %v1952_v14  ;;  %v6275_v56 = vld [vmem:[#allocation130_spill] sm:$0xff] }
 0x3a9   :  { %v5324_v1 = vpop.xlane.xlu1 %1481  ;;  %v1688_v32 = vmul.f32 %v6274_v42, %v1624_v10  ;;  %v1626_v2 = vsub.f32 %v4627_v54, %v5139_v34  ;;  %v1892_v13 = vsub.f32 1.0, %v5169_v29  ;;  %v1756_v26 = vadd.f32 %v1755_v9, %v1754_v20 }
 0x3aa   :  { %v2085_v52 = vsel %vm1743_vm12, %v2015_v58, 0.0  ;;  %v5334_v25 = vsel %vm201_vm14, 1.0, %v6084_v36  ;;  %v1893_v16 = vsub.f32 1.0, %v5200_v38  ;;  %v1759_v37 = vsel %vm1743_vm12, %v1687_v18, 0.0 }
 0x3ab   :  { %v2017_v45 = vmul.f32 %v6274_v42, %v1953_v15  ;;  %v1689_v24 = vmul.f32 %v6275_v56, %v1625_v4  ;;  %v1955_v14 = vmul.f32 %v1891_v17, %v1891_v17  ;;  %v2084_v59 = vadd.f32 %v2083_v0, %v2082_v21 }
 0x3ac   :  { %v1758_v54 = vadd.f32 %v1757_v48, %v1756_v26  ;;  %v2018_v34 = vmul.f32 %v6275_v56, %v1954_v8  ;;  %v1627_v20 = vsub.f32 %v4636_v7, %v5169_v29  ;;  %v2087_v9 = vsel %vm1743_vm12, %v2016_v3, 0.0 }
 0x3ad   :  { %v5343_v10 = vpop.xlane.xlu1 %1484  ;;  %v1761_v58 = vsel %vm1743_vm12, %v1688_v32, 0.0  ;;  %v1690_v33 = vmul.f32 %v6276_v46, %v1626_v2  ;;  %v1956_v18 = vmul.f32 %v1892_v13, %v1892_v13  ;;  %v2086_v15 = vadd.f32 %v2085_v52, %v2084_v59  ;;  %v6277_v32 = vld [vmem:[#allocation132_spill] sm:$0xff] }
 0x3ae   :  { %v1760_v42 = vadd.f32 %v1759_v37, %v1758_v54  ;;  %v1628_v21 = vsub.f32 %v4639_v39, %v5200_v38  ;;  %v1957_v4 = vmul.f32 %v1893_v16, %v1893_v16  ;;  %v2089_v17 = vsel %vm1743_vm12, %v2017_v45, 0.0  ;;  %v6278_v45 = vld [vmem:[#allocation133_spill] sm:$0xff] }
 0x3af   :  { %v1763_v0 = vsel %vm1743_vm12, %v1689_v24, 0.0  ;;  %v2019_v7 = vmul.f32 %v6276_v46, %v1955_v14  ;;  %v1894_v29 = vsub.f32 1.0, %v5219_v60  ;;  %v2088_v48 = vadd.f32 %v2087_v9, %v2086_v15 }
 0x3b0   :  { %v1762_v8 = vadd.f32 %v1761_v58, %v1760_v42  ;;  %v2091_v3 = vsel %vm1743_vm12, %v2018_v34, 0.0  ;;  %v1691_v2 = vmul.f32 %v6277_v32, %v1627_v20  ;;  %v1765_v26 = vsel %vm1743_vm12, %v1690_v33, 0.0  ;;  %v6279_v33 = vld [vmem:[#allocation134_spill] sm:$0xff] }
 0x3b1   :  { %v5356_v13 = vpop.xlane.xlu1 %1487  ;;  %v2020_v39 = vmul.f32 %v6277_v32, %v1956_v18  ;;  %v1629_v38 = vsub.f32 %v4642_v62, %v5219_v60  ;;  %v1895_v52 = vsub.f32 1.0, %v5242_v28  ;;  %v2090_v16 = vadd.f32 %v2089_v17, %v2088_v48 }
 0x3b2   :  { %v1764_v37 = vadd.f32 %v1763_v0, %v1762_v8  ;;  %v1692_v56 = vmul.f32 %v6278_v45, %v1628_v21  ;;  %v2021_v24 = vmul.f32 %v6278_v45, %v1957_v4  ;;  %v2093_v14 = vsel %vm1743_vm12, %v2019_v7, 0.0  ;;  %v6280_v0 = vld [vmem:[#allocation135_spill] sm:$0xff]  ;;  %v2785_v8 = vld [vmem:[%s5727_s1 + $0x1f0] sm:$0xff] }
 0x3b3   :  { %v1958_v59 = vmul.f32 %v1894_v29, %v1894_v29  ;;  %v1630_v54 = vsub.f32 %v4656_v23, %v5242_v28  ;;  %v1896_v34 = vsub.f32 1.0, %v5266_v35  ;;  %v5371_v20 = vsel %vm1743_vm12, %v5334_v25, 0.0 }
 0x3b4   :  { %v2092_v62 = vadd.f32 %v2091_v3, %v2090_v16  ;;  %v1766_v60 = vadd.f32 %v1765_v26, %v1764_v37  ;;  %v1767_v9 = vsel %vm1743_vm12, %v1691_v2, 0.0  ;;  %v2095_v46 = vsel %vm1743_vm12, %v2020_v39, 0.0  ;;  %v6281_v37 = vld [vmem:[#allocation136_spill] sm:$0xff] }
 0x3b5   :  { %v5374_v58 = vpop.xlane.xlu1 %1490  ;;  %v1693_v18 = vmul.f32 %v6279_v33, %v1629_v38  ;;  %v1959_v15 = vmul.f32 %v1895_v52, %v1895_v52  ;;  %v1897_v42 = vsub.f32 1.0, %v5285_v12  ;;  %v1769_v28 = vsel %vm1743_vm12, %v1692_v56, 0.0 }
 0x3b6   :  { %v2094_v23 = vadd.f32 %v2093_v14, %v2092_v62  ;;  %v2097_v21 = vsel %vm1743_vm12, %v2021_v24, 0.0  ;;  %v1631_v4 = vsub.f32 %v4683_v40, %v5266_v35  ;;  %v2022_v17 = vmul.f32 %v6279_v33, %v1958_v59 }
 0x3b7   :  { %v1694_v7 = vmul.f32 %v6280_v0, %v1630_v54  ;;  %v1960_v29 = vmul.f32 %v1896_v34, %v1896_v34  ;;  %v1898_v48 = vsub.f32 1.0, %v5305_v5  ;;  %vm202_vm15 = vcmp.ne.s32.totalorder %v2785_v8, 4294967295  ;;  %v6282_v54 = vld [vmem:[#allocation137_spill] sm:$0xff] }
 0x3b8   :  { %v1768_v3 = vadd.f32 %v1767_v9, %v1766_v60  ;;  %v2096_v32 = vadd.f32 %v2095_v46, %v2094_v23  ;;  %v1632_v2 = vsub.f32 %v4686_v50, %v5285_v12  ;;  %v1771_v40 = vsel %vm1743_vm12, %v1693_v18, 0.0  ;;  %v6283_v23 = vld [vmem:[#allocation138_spill] sm:$0xff] }
 0x3b9   :  { %v5391_v26 = vpop.xlane.xlu1 %1493  ;;  %v2023_v35 = vmul.f32 %v6280_v0, %v1959_v15  ;;  %v1961_v39 = vmul.f32 %v1897_v42, %v1897_v42  ;;  %v1899_v38 = vsub.f32 1.0, %v5324_v1  ;;  %v1695_v45 = vmul.f32 %v6281_v37, %v1631_v4 }
 0x3ba   :  { %v1770_v52 = vadd.f32 %v1769_v28, %v1768_v3  ;;  %v2098_v16 = vadd.f32 %v2097_v21, %v2096_v32  ;;  %v1633_v56 = vsub.f32 %v4695_v19, %v5305_v5  ;;  %v2099_v24 = vsel %vm1743_vm12, %v2022_v17, 0.0 }
 0x3bb   :  { %v1773_v50 = vsel %vm1743_vm12, %v1694_v7, 0.0  ;;  %v2024_v12 = vmul.f32 %v6281_v37, %v1960_v29  ;;  %v1962_v14 = vmul.f32 %v1898_v48, %v1898_v48  ;;  %v1696_v34 = vmul.f32 %v6282_v54, %v1632_v2  ;;  %v1515_v48 = vpop.xlane.xlu0 %1514 }
 0x3bc   :  { %v1772_v59 = vadd.f32 %v1771_v40, %v1770_v52  ;;  %v1634_v62 = vsub.f32 %v4698_v47, %v5324_v1  ;;  %v1900_v60 = vsub.f32 1.0, %v5343_v10  ;;  %v5410_v19 = vsel %vm202_vm15, 1.0, %v6084_v36  ;;  %v6284_v52 = vld [vmem:[#allocation139_spill] sm:$0xff] }
 0x3bd   :  { %v5406_v9 = vpop.xlane.xlu1 %1496  ;;  %v2101_v5 = vsel %vm1743_vm12, %v2023_v35, 0.0  ;;  %v2025_v46 = vmul.f32 %v6282_v54, %v1961_v39  ;;  %v1963_v33 = vmul.f32 %v1899_v38, %v1899_v38  ;;  %v2100_v18 = vadd.f32 %v2099_v24, %v2098_v16 }
 0x3be   :  { %v1774_v15 = vadd.f32 %v1773_v50, %v1772_v59  ;;  %v1775_v42 = vsel %vm1743_vm12, %v1695_v45, 0.0  ;;  %v1697_v28 = vmul.f32 %v6283_v23, %v1633_v56  ;;  %v2103_v47 = vsel %vm1743_vm12, %v2024_v12, 0.0  ;;  %v6285_v12 = vld [vmem:[#allocation140_spill] sm:$0xff] }
 0x3bf   :  { %v2026_v1 = vmul.f32 %v6283_v23, %v1962_v14  ;;  %v1635_v21 = vsub.f32 %v4721_v31, %v5343_v10  ;;  %v1901_v4 = vsub.f32 1.0, %v5356_v13  ;;  %v2102_v17 = vadd.f32 %v2101_v5, %v2100_v18  ;;  %v2786_v10 = vld [vmem:[%s5727_s1 + $0x1f8] sm:$0xff]  ;;  %v6286_v59 = vld [vmem:[#allocation20_spill] sm:$0xff] }
 0x3c0   :  { %v1777_v0 = vsel %vm1743_vm12, %v1696_v34, 0.0  ;;  %v1698_v7 = vmul.f32 %v4259_v6, %v1634_v62  ;;  %v1964_v29 = vmul.f32 %v1900_v60, %v1900_v60  ;;  %v2105_v3 = vsel %vm1743_vm12, %v2025_v46, 0.0 }
 0x3c1   :  { %v5423_v8 = vpop.xlane.xlu1 %1499  ;;  %v2027_v32 = vmul.f32 %v4259_v6, %v1963_v33  ;;  %v1636_v2 = vsub.f32 %v4742_v51, %v5356_v13  ;;  %v1902_v31 = vsub.f32 1.0, %v5374_v58  ;;  %vm203_vm1 = vcmp.ne.s32.totalorder %v2786_v10, 4294967295 }
 0x3c2   :  { %v1776_v40 = vadd.f32 %v1775_v42, %v1774_v15  ;;  %v2104_v35 = vadd.f32 %v2103_v47, %v2102_v17  ;;  %v1779_v39 = vsel %vm1743_vm12, %v1697_v28, 0.0  ;;  %v2107_v38 = vsel %vm1743_vm12, %v2026_v1, 0.0 }
 0x3c3   :  { %v1699_v16 = vmul.f32 %v6284_v52, %v1635_v21  ;;  %v1965_v37 = vmul.f32 %v1901_v4, %v1901_v4  ;;  %v1910_v6 = vsub.f32 1.0, %v1515_v48  ;;  %v1781_v51 = vsel %vm1743_vm12, %v1698_v7, 0.0  ;;  %v6287_v21 = vld [vmem:[#allocation141_spill] sm:$0xff] }
 0x3c4   :  { %v1778_v45 = vadd.f32 %v1777_v0, %v1776_v40  ;;  %v2106_v56 = vadd.f32 %v2105_v3, %v2104_v35  ;;  %v2028_v13 = vmul.f32 %v6284_v52, %v1964_v29  ;;  %v2109_v50 = vsel %vm1743_vm12, %v2027_v32, 0.0  ;;  %v6288_v0 = vld [vmem:[#allocation21_spill] sm:$0xff]  ;;  %v6291_v52 = vld [vmem:[#allocation70_spill] sm:$0xff] }
 0x3c5   :  { %v1503_v24 = vpop.xlane.xlu1 %1502  ;;  %v1700_v14 = vmul.f32 %v6285_v12, %v1636_v2  ;;  %v1637_v54 = vsub.f32 %v6286_v59, %v5374_v58  ;;  %v1966_v34 = vmul.f32 %v1902_v31, %v1902_v31  ;;  %v5444_v62 = vsel %vm203_vm1, 1.0, %v6084_v36  ;;  %v6290_v31 = vld [vmem:[#allocation149_spill] sm:$0xff] }
 0x3c6   :  { %v1780_v60 = vadd.f32 %v1779_v39, %v1778_v45  ;;  %v2108_v5 = vadd.f32 %v2107_v38, %v2106_v56  ;;  %v1903_v46 = vsub.f32 1.0, %v5391_v26  ;;  %v1783_v33 = vsel %vm1743_vm12, %v1699_v16, 0.0  ;;  %v6292_v45 = vld [vmem:[#allocation142_spill] sm:$0xff] }
 0x3c7   :  { %v2029_v18 = vmul.f32 %v6285_v12, %v1965_v37  ;;  %v1645_v15 = vsub.f32 %v4837_v43, %v1515_v48  ;;  %v1974_v42 = vmul.f32 %v1910_v6, %v1910_v6  ;;  %v2111_v58 = vsel %vm1743_vm12, %v2028_v13, 0.0  ;;  %v6289_v43 = vld [vmem:[#allocation22_spill] sm:$0xff]  ;;  %v6293_v12 = vld [vmem:[#allocation143_spill] sm:$0xff] }
 0x3c8   :  { %v1782_v23 = vadd.f32 %v1781_v51, %v1780_v60  ;;  %v2110_v28 = vadd.f32 %v2109_v50, %v2108_v5  ;;  %v1904_v47 = vsub.f32 1.0, %v5406_v9  ;;  %v1785_v36 = vsel %vm1743_vm12, %v1700_v14, 0.0 }
 0x3c9   :  { %v1506_v1 = vpop.xlane.xlu1 %1505  ;;  %v1701_v4 = vmul.f32 %v6287_v21, %v1637_v54  ;;  %v2030_v17 = vmul.f32 %v6287_v21, %v1966_v34  ;;  %v1638_v7 = vsub.f32 %v6288_v0, %v5391_v26  ;;  %v1967_v3 = vmul.f32 %v1903_v46, %v1903_v46  ;;  %v6294_v54 = vld [vmem:[#allocation71_spill] sm:$0xff] }
 0x3ca   :  { %v1784_v29 = vadd.f32 %v1783_v33, %v1782_v23  ;;  %v1639_v48 = vsub.f32 %v6289_v43, %v5406_v9  ;;  %v1905_v32 = vsub.f32 1.0, %v5423_v8  ;;  %v2113_v2 = vsel %vm1743_vm12, %v2029_v18, 0.0  ;;  %v6295_v18 = vld [vmem:[#allocation144_spill] sm:$0xff]  ;;  %v6299_v43 = vld [vmem:[#allocation73_spill] sm:$0xff] }
 0x3cb   :  { %v1709_v10 = vmul.f32 %v6290_v31, %v1645_v15  ;;  %v2038_v40 = vmul.f32 %v6290_v31, %v1974_v42  ;;  %v5465_v35 = vadd.f32 %v5371_v20, %v5322_v63  ;;  %v2112_v39 = vadd.f32 %v2111_v58, %v2110_v28  ;;  %v6296_v58 = vld [vmem:[#allocation114_spill] sm:$0xff] }
 0x3cc   :  { %v1786_v38 = vadd.f32 %v1785_v36, %v1784_v29  ;;  %v1968_v26 = vmul.f32 %v1904_v47, %v1904_v47  ;;  %v1640_v16 = vsub.f32 %v6291_v52, %v5423_v8  ;;  %v1787_v9 = vsel %vm1743_vm12, %v1701_v4, 0.0  ;;  %v1542_v8 = vpop.xlane.xlu0 %1541 }
 0x3cd   :  { %v1509_v37 = vpop.xlane.xlu1 %1508  ;;  %v2115_v6 = vsel %vm1743_vm12, %v2030_v17, 0.0  ;;  %v1702_v56 = vmul.f32 %v6292_v45, %v1638_v7  ;;  %v1906_v51 = vsub.f32 1.0, %v1503_v24  ;;  %v2114_v13 = vadd.f32 %v2113_v2, %v2112_v39  ;;  %v6297_v17 = vld [vmem:[#allocation29_spill] sm:$0xff] }
 0x3ce   :  { %v2031_v50 = vmul.f32 %v6292_v45, %v1967_v3  ;;  %v1703_v63 = vmul.f32 %v6293_v12, %v1639_v48  ;;  %v1969_v20 = vmul.f32 %v1905_v32, %v1905_v32  ;;  %v5475_v14 = vsel %vm1743_vm12, %v1709_v10, 0.0  ;;  %v6298_v7 = vld [vmem:[#allocation145_spill] sm:$0xff] }
 0x3cf   :  { %v5478_v59 = vsel %vm1743_vm12, %v2038_v40, 0.0  ;;  %v1641_v34 = vsub.f32 %v6294_v54, %v1503_v24  ;;  %v1907_v60 = vsub.f32 1.0, %v1506_v1  ;;  %v1788_v5 = vadd.f32 %v1787_v9, %v1786_v38  ;;  %v6301_v9 = vld [vmem:[#allocation23_spill] sm:$0xff] }
 0x3d0   :  { %v2116_v46 = vadd.f32 %v2115_v6, %v2114_v13  ;;  %v2032_v33 = vmul.f32 %v6293_v12, %v1968_v26  ;;  %v1704_v15 = vmul.f32 %v6295_v18, %v1640_v16  ;;  %v1789_v23 = vsel %vm1743_vm12, %v1702_v56, 0.0  ;;  %v1548_v39 = vpop.xlane.xlu0 %1547  ;;  %v6300_v26 = vld [vmem:[#allocation146_spill] sm:$0xff] }
 0x3d1   :  { %v1512_v42 = vpop.xlane.xlu1 %1511  ;;  %v1970_v28 = vmul.f32 %v1906_v51, %v1906_v51  ;;  %v1642_v47 = vsub.f32 %v6296_v58, %v1506_v1  ;;  %v1908_v36 = vsub.f32 1.0, %v1509_v37  ;;  %v2117_v21 = vsel %vm1743_vm12, %v2031_v50, 0.0  ;;  %v6302_v51 = vld [vmem:[#allocation68_spill] sm:$0xff] }
 0x3d2   :  { %v1791_v4 = vsel %vm1743_vm12, %v1703_v63, 0.0  ;;  %v1654_v24 = vsub.f32 %v6297_v17, %v1542_v8  ;;  %v2033_v0 = vmul.f32 %v6295_v18, %v1969_v20  ;;  %v1705_v29 = vmul.f32 %v6298_v7, %v1641_v34  ;;  %v6303_v63 = vld [vmem:[#allocation147_spill] sm:$0xff] }
 0x3d3   :  { %v1971_v3 = vmul.f32 %v1907_v60, %v1907_v60  ;;  %v1643_v48 = vsub.f32 %v6299_v43, %v1509_v37  ;;  %v1909_v32 = vsub.f32 1.0, %v1512_v42  ;;  %v1790_v2 = vadd.f32 %v1789_v23, %v1788_v5 }
 0x3d4   :  { %v2119_v31 = vsel %vm1743_vm12, %v2032_v33, 0.0  ;;  %v1919_v10 = vsub.f32 1.0, %v1542_v8  ;;  %v1793_v1 = vsel %vm1743_vm12, %v1704_v15, 0.0  ;;  %v2034_v38 = vmul.f32 %v6298_v7, %v1970_v28 }
 0x3d5   :  { %v1518_v40 = vpop.xlane.xlu1 %1517  ;;  %v1706_v52 = vmul.f32 %v6300_v26, %v1642_v47  ;;  %v1972_v16 = vmul.f32 %v1908_v36, %v1908_v36  ;;  %v1644_v6 = vsub.f32 %v6301_v9, %v1512_v42  ;;  %v2118_v45 = vadd.f32 %v2117_v21, %v2116_v46  ;;  %v6304_v42 = vld [vmem:[#allocation148_spill] sm:$0xff] }
 0x3d6   :  { %v1792_v56 = vadd.f32 %v1791_v4, %v1790_v2  ;;  %v1718_v37 = vmul.f32 %v6302_v51, %v1654_v24  ;;  %v2121_v13 = vsel %vm1743_vm12, %v2033_v0, 0.0  ;;  %v1795_v50 = vsel %vm1743_vm12, %v1705_v29, 0.0  ;;  %v6305_v47 = vld [vmem:[#allocation32_spill] sm:$0xff]  ;;  %v1554_v4 = vpop.xlane.xlu0 %1553 }
 0x3d7   :  { %v2035_v12 = vmul.f32 %v6300_v26, %v1971_v3  ;;  %v1707_v20 = vmul.f32 %v6303_v63, %v1643_v48  ;;  %v1973_v8 = vmul.f32 %v1909_v32, %v1909_v32  ;;  %v2120_v54 = vadd.f32 %v2119_v31, %v2118_v45 }
 0x3d8   :  { %v1983_v34 = vmul.f32 %v1919_v10, %v1919_v10  ;;  %v1794_v60 = vadd.f32 %v1793_v1, %v1792_v56  ;;  %v1921_v5 = vsub.f32 1.0, %v1548_v39  ;;  %v2123_v18 = vsel %vm1743_vm12, %v2034_v38, 0.0  ;;  %v6306_v1 = vld [vmem:[#allocation24_spill] sm:$0xff] }
 0x3d9   :  { %v1521_v33 = vpop.xlane.xlu1 %1520  ;;  %v1797_v46 = vsel %vm1743_vm12, %v1706_v52, 0.0  ;;  %v2036_v15 = vmul.f32 %v6303_v63, %v1972_v16  ;;  %v1708_v23 = vmul.f32 %v6304_v42, %v1644_v6  ;;  %v5506_v28 = vsel %vm1743_vm12, %v1718_v37, 0.0  ;;  %v6307_v38 = vld [vmem:[#allocation80_spill] sm:$0xff]  ;;  %v6308_v6 = vld [vmem:[#allocation69_spill] sm:$0xff] }
 0x3da   :  { %v2122_v58 = vadd.f32 %v2121_v13, %v2120_v54  ;;  %v1656_v36 = vsub.f32 %v6305_v47, %v1548_v39  ;;  %v1796_v21 = vadd.f32 %v1795_v50, %v1794_v60  ;;  %v2125_v17 = vsel %vm1743_vm12, %v2035_v12, 0.0  ;;  %v6309_v13 = vld [vmem:[#allocation25_spill] sm:$0xff]  ;;  %v6310_v54 = vld [vmem:[#allocation150_spill] sm:$0xff]  ;;  %v6311_v60 = vld [vmem:[#allocation27_spill] sm:$0xff] }
 0x3db   :  { %v1799_v24 = vsel %vm1743_vm12, %v1707_v20, 0.0  ;;  %v2037_v0 = vmul.f32 %v6304_v42, %v1973_v8  ;;  %v1911_v7 = vsub.f32 1.0, %v1518_v40  ;;  %v1985_v29 = vmul.f32 %v1921_v5, %v1921_v5 }
 0x3dc   :  { %v2124_v3 = vadd.f32 %v2123_v18, %v2122_v58  ;;  %v1798_v43 = vadd.f32 %v1797_v46, %v1796_v21  ;;  %v1912_v48 = vsub.f32 1.0, %v1521_v33  ;;  %v2047_v2 = vmul.f32 %v6302_v51, %v1983_v34  ;;  %v6312_v46 = vld [vmem:[#allocation72_spill] sm:$0xff] }
 0x3dd   :  { %v1524_v32 = vpop.xlane.xlu1 %1523  ;;  %v2127_v31 = vsel %vm1743_vm12, %v2036_v15, 0.0  ;;  %v1801_v10 = vsel %vm1743_vm12, %v1708_v23, 0.0  ;;  %v1646_v39 = vsub.f32 %v6306_v1, %v1518_v40  ;;  %v1658_v26 = vsub.f32 %v6307_v38, %v1554_v4 }
 0x3de   :  { %v2126_v52 = vadd.f32 %v2125_v17, %v2124_v3  ;;  %v1800_v16 = vadd.f32 %v1799_v24, %v1798_v43  ;;  %v1913_v9 = vsub.f32 1.0, %v1524_v32  ;;  %v1720_v45 = vmul.f32 %v6308_v6, %v1656_v36  ;;  %v6313_v36 = vld [vmem:[#allocation151_spill] sm:$0xff]  ;;  %v6314_v17 = vld [vmem:[#allocation28_spill] sm:$0xff]  ;;  %v1560_v43 = vpop.xlane.xlu0 %1559 }
 0x3df   :  { %v2129_v56 = vsel %vm1743_vm12, %v2037_v0, 0.0  ;;  %v1975_v37 = vmul.f32 %v1911_v7, %v1911_v7  ;;  %v1647_v50 = vsub.f32 %v6309_v13, %v1521_v33  ;;  %v2049_v51 = vmul.f32 %v6308_v6, %v1985_v29 }
 0x3e0   :  { %v2128_v12 = vadd.f32 %v2127_v31, %v2126_v52  ;;  %v1802_v63 = vadd.f32 %v1801_v10, %v1800_v16  ;;  %v1976_v20 = vmul.f32 %v1912_v48, %v1912_v48  ;;  %v5522_v40 = vsel %vm1743_vm12, %v2047_v2, 0.0  ;;  %v6316_v31 = vld [vmem:[#allocation75_spill] sm:$0xff] }
 0x3e1   :  { %v1527_v8 = vpop.xlane.xlu1 %1526  ;;  %v1710_v34 = vmul.f32 %v6310_v54, %v1646_v39  ;;  %v1648_v5 = vsub.f32 %v6311_v60, %v1524_v32  ;;  %v1722_v15 = vmul.f32 %v6312_v46, %v1658_v26  ;;  %v1923_v42 = vsub.f32 1.0, %v1554_v4  ;;  %v6315_v32 = vld [vmem:[#allocation17_spill] sm:$0xff] }
 0x3e2   :  { %v1914_v18 = vsub.f32 1.0, %v1527_v8  ;;  %v2130_v23 = vadd.f32 %v2129_v56, %v2128_v12  ;;  %v1977_v58 = vmul.f32 %v1913_v9, %v1913_v9  ;;  %v5528_v33 = vsel %vm1743_vm12, %v1720_v45, 0.0  ;;  %v6317_v9 = vld [vmem:[#allocation18_spill] sm:$0xff] }
 0x3e3   :  { %v2039_v47 = vmul.f32 %v6310_v54, %v1975_v37  ;;  %v1711_v21 = vmul.f32 %v6313_v36, %v1647_v50  ;;  %v1649_v24 = vsub.f32 %v6314_v17, %v1527_v8  ;;  %v5534_v0 = vsel %vm1743_vm12, %v2049_v51, 0.0  ;;  %v6318_v56 = vld [vmem:[#allocation34_spill] sm:$0xff]  ;;  %v6320_v8 = vld [vmem:[#allocation76_spill] sm:$0xff] }
 0x3e4   :  { %v1804_v7 = vadd.f32 %v5475_v14, %v1802_v63  ;;  %v2040_v29 = vmul.f32 %v6313_v36, %v1976_v20  ;;  %v1978_v3 = vmul.f32 %v1914_v18, %v1914_v18  ;;  %v1805_v48 = vsel %vm1743_vm12, %v1710_v34, 0.0 }
 0x3e5   :  { %v1530_v4 = vpop.xlane.xlu1 %1529  ;;  %v1712_v2 = vmul.f32 %v6315_v32, %v1648_v5  ;;  %v5542_v39 = vsel %vm1743_vm12, %v1722_v15, 0.0  ;;  %v1987_v38 = vmul.f32 %v1923_v42, %v1923_v42  ;;  %v2132_v26 = vadd.f32 %v5478_v59, %v2130_v23  ;;  %v6319_v59 = vld [vmem:[#allocation15_spill] sm:$0xff] }
 0x3e6   :  { %v1650_v10 = vsub.f32 %v6316_v31, %v1530_v4  ;;  %v1915_v1 = vsub.f32 1.0, %v1530_v4  ;;  %v2041_v14 = vmul.f32 %v6315_v32, %v1977_v58  ;;  %v2133_v52 = vsel %vm1743_vm12, %v2039_v47, 0.0  ;;  %v6321_v58 = vld [vmem:[#allocation16_spill] sm:$0xff]  ;;  %v6323_v31 = vld [vmem:[#allocation74_spill] sm:$0xff] }
 0x3e7   :  { %v1807_v16 = vsel %vm1743_vm12, %v1711_v21, 0.0  ;;  %v1713_v6 = vmul.f32 %v6317_v9, %v1649_v24  ;;  %v1660_v37 = vsub.f32 %v6318_v56, %v1560_v43  ;;  %v1806_v13 = vadd.f32 %v1805_v48, %v1804_v7  ;;  %v6322_v48 = vld [vmem:[#allocation77_spill] sm:$0xff] }
 0x3e8   :  { %v1979_v45 = vmul.f32 %v1915_v1, %v1915_v1  ;;  %v2135_v50 = vsel %vm1743_vm12, %v2040_v29, 0.0  ;;  %v2042_v51 = vmul.f32 %v6317_v9, %v1978_v3  ;;  %v1809_v63 = vsel %vm1743_vm12, %v1712_v2, 0.0  ;;  %v1566_v3 = vpop.xlane.xlu0 %1565 }
 0x3e9   :  { %v1533_v12 = vpop.xlane.xlu1 %1532  ;;  %v1714_v20 = vmul.f32 %v6319_v59, %v1650_v10  ;;  %v1925_v60 = vsub.f32 1.0, %v1560_v43  ;;  %v2134_v5 = vadd.f32 %v2133_v52, %v2132_v26  ;;  %v1808_v18 = vadd.f32 %v1807_v16, %v1806_v13  ;;  %v6324_v52 = vld [vmem:[#allocation67_spill] sm:$0xff] }
 0x3ea   :  { %v1651_v54 = vsub.f32 %v6320_v8, %v1533_v12  ;;  %v1916_v34 = vsub.f32 1.0, %v1533_v12  ;;  %v2137_v15 = vsel %vm1743_vm12, %v2041_v14, 0.0  ;;  %v1811_v42 = vsel %vm1743_vm12, %v1713_v6, 0.0  ;;  %v6325_v6 = vld [vmem:[#allocation35_spill] sm:$0xff] }
 0x3eb   :  { %v2043_v23 = vmul.f32 %v6319_v59, %v1979_v45  ;;  %v2051_v21 = vmul.f32 %v6312_v46, %v1987_v38  ;;  %v2136_v17 = vadd.f32 %v2135_v50, %v2134_v5  ;;  %v1810_v24 = vadd.f32 %v1809_v63, %v1808_v18  ;;  %v6326_v63 = vld [vmem:[#allocation122_spill] sm:$0xff] }
 0x3ec   :  { %v1715_v47 = vmul.f32 %v6321_v58, %v1651_v54  ;;  %v1980_v36 = vmul.f32 %v1916_v34, %v1916_v34  ;;  %v2139_v7 = vsel %vm1743_vm12, %v2042_v51, 0.0  ;;  %v1813_v4 = vsel %vm1743_vm12, %v1714_v20, 0.0  ;;  %v1572_v18 = vpop.xlane.xlu0 %1571 }
 0x3ed   :  { %v1536_v29 = vpop.xlane.xlu1 %1535  ;;  %v1724_v10 = vmul.f32 %v6323_v31, %v1660_v37  ;;  %v1989_v1 = vmul.f32 %v1925_v60, %v1925_v60  ;;  %v2138_v26 = vadd.f32 %v2137_v15, %v2136_v17  ;;  %v1812_v14 = vadd.f32 %v1811_v42, %v1810_v24  ;;  %v6327_v42 = vld [vmem:[#allocation120_spill] sm:$0xff] }
 0x3ee   :  { %v2044_v43 = vmul.f32 %v6321_v58, %v1980_v36  ;;  %v1652_v32 = vsub.f32 %v6322_v48, %v1536_v29  ;;  %v1917_v2 = vsub.f32 1.0, %v1536_v29  ;;  %v2141_v46 = vsel %vm1743_vm12, %v2043_v23, 0.0  ;;  %v6328_v36 = vld [vmem:[#allocation78_spill] sm:$0xff] }
 0x3ef   :  { %v1815_v38 = vsel %vm1743_vm12, %v1715_v47, 0.0  ;;  %v1662_v45 = vsub.f32 %v6325_v6, %v1566_v3  ;;  %v2140_v56 = vadd.f32 %v2139_v7, %v2138_v26  ;;  %v1814_v13 = vadd.f32 %v1813_v4, %v1812_v14  ;;  %v6329_v4 = vld [vmem:[#allocation30_spill] sm:$0xff] }
 0x3f0   :  { %v1716_v16 = vmul.f32 %v6324_v52, %v1652_v32  ;;  %v1981_v9 = vmul.f32 %v1917_v2, %v1917_v2  ;;  %v2143_v50 = vsel %vm1743_vm12, %v2044_v43, 0.0  ;;  %v5574_v8 = vsel %vm1743_vm12, %v2051_v21, 0.0 }
 0x3f1   :  { %v1539_v51 = vpop.xlane.xlu1 %1538  ;;  %v1927_v54 = vsub.f32 1.0, %v1566_v3  ;;  %v2142_v34 = vadd.f32 %v2141_v46, %v2140_v56  ;;  %v1816_v60 = vadd.f32 %v1815_v38, %v1814_v13  ;;  %v5577_v5 = vsel %vm1743_vm12, %v1724_v10, 0.0  ;;  %v1578_v56 = vpop.xlane.xlu0 %1577 }
 0x3f2   :  { %v1817_v12 = vsel %vm1743_vm12, %v1716_v16, 0.0  ;;  %v2045_v37 = vmul.f32 %v6324_v52, %v1981_v9  ;;  %v1653_v59 = vsub.f32 %v6326_v63, %v1539_v51  ;;  %v1918_v20 = vsub.f32 1.0, %v1539_v51  ;;  %v6332_v63 = vld [vmem:[#allocation81_spill] sm:$0xff] }
 0x3f3   :  { %v2053_v47 = vmul.f32 %v6323_v31, %v1989_v1  ;;  %v1726_v17 = vmul.f32 %v6328_v36, %v1662_v45  ;;  %v2144_v24 = vadd.f32 %v2143_v50, %v2142_v34  ;;  %v1818_v7 = vadd.f32 %v1817_v12, %v1816_v60  ;;  %v6330_v1 = vld [vmem:[#allocation19_spill] sm:$0xff] }
 0x3f4   :  { %v2145_v15 = vsel %vm1743_vm12, %v2045_v37, 0.0  ;;  %v1717_v23 = vmul.f32 %v6327_v42, %v1653_v59  ;;  %v1982_v58 = vmul.f32 %v1918_v20, %v1918_v20  ;;  %v1991_v32 = vmul.f32 %v1927_v54, %v1927_v54  ;;  %v6331_v50 = vld [vmem:[#allocation79_spill] sm:$0xff] }
 0x3f5   :  { %v1545_v21 = vpop.xlane.xlu1 %1544  ;;  %v1664_v2 = vsub.f32 %v5083_v61, %v1572_v18  ;;  %v2146_v10 = vadd.f32 %v2145_v15, %v2144_v24  ;;  %v1929_v14 = vsub.f32 1.0, %v1572_v18  ;;  %v5590_v52 = vsel %vm1743_vm12, %v2053_v47, 0.0 }
 0x3f6   :  { %v1819_v29 = vsel %vm1743_vm12, %v1717_v23, 0.0  ;;  %v2046_v3 = vmul.f32 %v6327_v42, %v1982_v58  ;;  %v1655_v43 = vsub.f32 %v6329_v4, %v1545_v21  ;;  %v1920_v48 = vsub.f32 1.0, %v1545_v21 }
 0x3f7   :  { %v1820_v26 = vadd.f32 %v1819_v29, %v1818_v7  ;;  %v5593_v16 = vsel %vm1743_vm12, %v1726_v17, 0.0  ;;  %v2055_v37 = vmul.f32 %v6328_v36, %v1991_v32  ;;  %v1728_v59 = vmul.f32 %v6332_v63, %v1664_v2  ;;  %v6334_v7 = vld [vmem:[#allocation82_spill] sm:$0xff] }
 0x3f8   :  { %v2147_v31 = vsel %vm1743_vm12, %v2046_v3, 0.0  ;;  %v1719_v46 = vmul.f32 %v6330_v1, %v1655_v43  ;;  %v1984_v38 = vmul.f32 %v1920_v48, %v1920_v48  ;;  %v1993_v34 = vmul.f32 %v1929_v14, %v1929_v14  ;;  %v1584_v48 = vpop.xlane.xlu0 %1583  ;;  %v6335_v32 = vld [vmem:[#allocation26_spill] sm:$0xff] }
 0x3f9   :  { %v2148_v9 = vadd.f32 %v2147_v31, %v2146_v10  ;;  %v1822_v6 = vadd.f32 %v5506_v28, %v1820_v26  ;;  %v1551_v45 = vpop.xlane.xlu1 %1550  ;;  %v6333_v28 = vld [vmem:[#allocation121_spill] sm:$0xff]  ;;  %v1666_v42 = vsub.f32 %v5090_v41, %v1578_v56  ;;  %v1931_v23 = vsub.f32 1.0, %v1578_v56  ;;  %v6336_v26 = vld [vmem:[#allocation83_spill] sm:$0xff] }
 0x3fa   :  { %v1823_v61 = vsel %vm1743_vm12, %v1719_v46, 0.0  ;;  %v2048_v13 = vmul.f32 %v6330_v1, %v1984_v38  ;;  %v1657_v51 = vsub.f32 %v6331_v50, %v1551_v45  ;;  %v1922_v12 = vsub.f32 1.0, %v1551_v45 }
 0x3fb   :  { %v1824_v20 = vadd.f32 %v1823_v61, %v1822_v6  ;;  %v2150_v54 = vadd.f32 %v5522_v40, %v2148_v9  ;;  %v2165_v29 = vsel %vm1743_vm12, %v2055_v37, 0.0  ;;  %v5611_v3 = vsel %vm1743_vm12, %v1728_v59, 0.0 }
 0x3fc   :  { %v2151_v60 = vsel %vm1743_vm12, %v2048_v13, 0.0  ;;  %v1721_v18 = vmul.f32 %v6333_v28, %v1657_v51  ;;  %v1986_v15 = vmul.f32 %v1922_v12, %v1922_v12  ;;  %v2057_v43 = vmul.f32 %v6332_v63, %v1993_v34  ;;  %v6338_v63 = vld [vmem:[#allocation115_spill] sm:$0xff]  ;;  %v1590_v34 = vpop.xlane.xlu0 %1589 }
 0x3fd   :  { %v2152_v58 = vadd.f32 %v2151_v60, %v2150_v54  ;;  %v1826_v47 = vadd.f32 %v5528_v33, %v1824_v20  ;;  %v1557_v17 = vpop.xlane.xlu1 %1556  ;;  %v1730_v14 = vmul.f32 %v6336_v26, %v1666_v42  ;;  %v1995_v31 = vmul.f32 %v1931_v23, %v1931_v23 }
 0x3fe   :  { %v1827_v36 = vsel %vm1743_vm12, %v1721_v18, 0.0  ;;  %v2050_v24 = vmul.f32 %v6333_v28, %v1986_v15  ;;  %v1659_v21 = vsub.f32 %v6334_v7, %v1557_v17  ;;  %v1924_v40 = vsub.f32 1.0, %v1557_v17  ;;  %v6339_v15 = vld [vmem:[#allocation37_spill] sm:$0xff] }
 0x3ff   :  { %v1828_v4 = vadd.f32 %v1827_v36, %v1826_v47  ;;  %v2154_v41 = vadd.f32 %v5534_v0, %v2152_v58  ;;  %v6337_v0 = vld [vmem:[#allocation36_spill] sm:$0xff]  ;;  %v1668_v61 = vsub.f32 %v5129_v11, %v1584_v48  ;;  %v1933_v13 = vsub.f32 1.0, %v1584_v48  ;;  %v6341_v7 = vld [vmem:[#allocation89_spill] sm:$0xff] }
 0x400   :  { %v2155_v33 = vsel %vm1743_vm12, %v2050_v24, 0.0  ;;  %v1723_v2 = vmul.f32 %v6335_v32, %v1659_v21  ;;  %v1988_v10 = vmul.f32 %v1924_v40, %v1924_v40  ;;  %v2169_v12 = vsel %vm1743_vm12, %v2057_v43, 0.0  ;;  %v6340_v58 = vld [vmem:[#allocation88_spill] sm:$0xff] }
 0x401   :  { %v2156_v1 = vadd.f32 %v2155_v33, %v2154_v41  ;;  %v1830_v46 = vadd.f32 %v5542_v39, %v1828_v4  ;;  %v1563_v38 = vpop.xlane.xlu1 %1562  ;;  %v1845_v20 = vsel %vm1743_vm12, %v1730_v14, 0.0  ;;  %v2059_v54 = vmul.f32 %v6336_v26, %v1995_v31  ;;  %v6342_v4 = vld [vmem:[#allocation31_spill] sm:$0xff] }
 0x402   :  { %v1831_v9 = vsel %vm1743_vm12, %v1723_v2, 0.0  ;;  %v2052_v6 = vmul.f32 %v6335_v32, %v1988_v10  ;;  %v1661_v45 = vsub.f32 %v6337_v0, %v1563_v38  ;;  %v1926_v56 = vsub.f32 1.0, %v1563_v38  ;;  %v1596_v10 = vpop.xlane.xlu0 %1595 }
 0x403   :  { %v1832_v50 = vadd.f32 %v1831_v9, %v1830_v46  ;;  %v2158_v51 = vadd.f32 %v5574_v8, %v2156_v1  ;;  %v1732_v47 = vmul.f32 %v6340_v58, %v1668_v61  ;;  %v1997_v17 = vmul.f32 %v1933_v13, %v1933_v13 }
 0x404   :  { %v2159_v37 = vsel %vm1743_vm12, %v2052_v6, 0.0  ;;  %v1725_v39 = vmul.f32 %v6338_v63, %v1661_v45  ;;  %v1990_v59 = vmul.f32 %v1926_v56, %v1926_v56  ;;  %v1670_v21 = vsub.f32 %v6341_v7, %v1590_v34 }
 0x405   :  { %v2160_v60 = vadd.f32 %v2159_v37, %v2158_v51  ;;  %v1834_v28 = vadd.f32 %v5577_v5, %v1832_v50  ;;  %v1569_v11 = vpop.xlane.xlu1 %1568  ;;  %v2173_v43 = vsel %vm1743_vm12, %v2059_v54, 0.0  ;;  %v1935_v48 = vsub.f32 1.0, %v1590_v34  ;;  %v6345_v54 = vld [vmem:[#allocation86_spill] sm:$0xff] }
 0x406   :  { %v1835_v18 = vsel %vm1743_vm12, %v1725_v39, 0.0  ;;  %v2054_v8 = vmul.f32 %v6338_v63, %v1990_v59  ;;  %v1663_v42 = vsub.f32 %v6339_v15, %v1569_v11  ;;  %v1928_v23 = vsub.f32 1.0, %v1569_v11 }
 0x407   :  { %v1836_v36 = vadd.f32 %v1835_v18, %v1834_v28  ;;  %v2162_v24 = vadd.f32 %v5590_v52, %v2160_v60  ;;  %v6343_v52 = vld [vmem:[#allocation84_spill] sm:$0xff]  ;;  %v1849_v46 = vsel %vm1743_vm12, %v1732_v47, 0.0  ;;  %v2061_v38 = vmul.f32 %v6340_v58, %v1997_v17  ;;  %v6346_v28 = vld [vmem:[#allocation39_spill] sm:$0xff] }
 0x408   :  { %v2163_v40 = vsel %vm1743_vm12, %v2054_v8, 0.0  ;;  %v1727_v5 = vmul.f32 %v6342_v4, %v1663_v42  ;;  %v1992_v41 = vmul.f32 %v1928_v23, %v1928_v23  ;;  %v1734_v0 = vmul.f32 %v5198_v53, %v1670_v21  ;;  %v1602_v42 = vpop.xlane.xlu0 %1601 }
 0x409   :  { %v2164_v33 = vadd.f32 %v2163_v40, %v2162_v24  ;;  %v1838_v32 = vadd.f32 %v5593_v16, %v1836_v36  ;;  %v1575_v2 = vpop.xlane.xlu1 %1574  ;;  %v6344_v16 = vld [vmem:[#allocation33_spill] sm:$0xff]  ;;  %v1999_v13 = vmul.f32 %v1935_v48, %v1935_v48  ;;  %v1937_v50 = vsub.f32 1.0, %v1596_v10 }
 0x40a   :  { %v1839_v26 = vsel %vm1743_vm12, %v1727_v5, 0.0  ;;  %v2056_v14 = vmul.f32 %v6342_v4, %v1992_v41  ;;  %v1665_v31 = vsub.f32 %v6343_v52, %v1575_v2  ;;  %v1930_v1 = vsub.f32 1.0, %v1575_v2  ;;  %v6348_v5 = vld [vmem:[#allocation87_spill] sm:$0xff] }
 0x40b   :  { %v1840_v9 = vadd.f32 %v1839_v26, %v1838_v32  ;;  %v2166_v6 = vadd.f32 %v2165_v29, %v2164_v33  ;;  %v2177_v60 = vsel %vm1743_vm12, %v2061_v38, 0.0  ;;  %v1672_v11 = vsub.f32 %v6346_v28, %v1596_v10  ;;  %v6349_v10 = vld [vmem:[#allocation42_spill] sm:$0xff] }
 0x40c   :  { %v2167_v45 = vsel %vm1743_vm12, %v2056_v14, 0.0  ;;  %v1729_v56 = vmul.f32 %v6344_v16, %v1665_v31  ;;  %v1994_v61 = vmul.f32 %v1930_v1, %v1930_v1  ;;  %v1853_v15 = vsel %vm1743_vm12, %v1734_v0, 0.0  ;;  %v6350_v14 = vld [vmem:[#allocation40_spill] sm:$0xff] }
 0x40d   :  { %v2168_v51 = vadd.f32 %v2167_v45, %v2166_v6  ;;  %v1842_v37 = vadd.f32 %v5611_v3, %v1840_v9  ;;  %v1581_v63 = vpop.xlane.xlu1 %1580  ;;  %v6347_v3 = vld [vmem:[#allocation85_spill] sm:$0xff]  ;;  %v2063_v17 = vmul.f32 %v5198_v53, %v1999_v13  ;;  %v2001_v36 = vmul.f32 %v1937_v50, %v1937_v50  ;;  %v1608_v0 = vpop.xlane.xlu0 %1607 }
 0x40e   :  { %v1843_v39 = vsel %vm1743_vm12, %v1729_v56, 0.0  ;;  %v2058_v59 = vmul.f32 %v6344_v16, %v1994_v61  ;;  %v1667_v34 = vsub.f32 %v6345_v54, %v1581_v63  ;;  %v1932_v29 = vsub.f32 1.0, %v1581_v63 }
 0x40f   :  { %v1844_v18 = vadd.f32 %v1843_v39, %v1842_v37  ;;  %v2170_v8 = vadd.f32 %v2169_v12, %v2168_v51  ;;  %v1736_v48 = vmul.f32 %v5240_v49, %v1672_v11  ;;  %v1939_v33 = vsub.f32 1.0, %v1602_v42  ;;  %v6352_v39 = vld [vmem:[#allocation44_spill] sm:$0xff] }
 0x410   :  { %v2171_v23 = vsel %vm1743_vm12, %v2058_v59, 0.0  ;;  %v1731_v58 = vmul.f32 %v6347_v3, %v1667_v34  ;;  %v1996_v47 = vmul.f32 %v1932_v29, %v1932_v29  ;;  %v1674_v26 = vsub.f32 %v6349_v10, %v1602_v42 }
 0x411   :  { %v2172_v24 = vadd.f32 %v2171_v23, %v2170_v8  ;;  %v1846_v7 = vadd.f32 %v1845_v20, %v1844_v18  ;;  %v1587_v21 = vpop.xlane.xlu1 %1586  ;;  %v2181_v31 = vsel %vm1743_vm12, %v2063_v17, 0.0  ;;  %v2065_v1 = vmul.f32 %v5240_v49, %v2001_v36  ;;  %v6353_v23 = vld [vmem:[#allocation41_spill] sm:$0xff] }
 0x412   :  { %v1847_v40 = vsel %vm1743_vm12, %v1731_v58, 0.0  ;;  %v2060_v4 = vmul.f32 %v6347_v3, %v1996_v47  ;;  %v1669_v12 = vsub.f32 %v6348_v5, %v1587_v21  ;;  %v1934_v41 = vsub.f32 1.0, %v1587_v21 }
 0x413   :  { %v1848_v32 = vadd.f32 %v1847_v40, %v1846_v7  ;;  %v2174_v2 = vadd.f32 %v2173_v43, %v2172_v24  ;;  %v6351_v43 = vld [vmem:[#allocation38_spill] sm:$0xff]  ;;  %v1857_v13 = vsel %vm1743_vm12, %v1736_v48, 0.0  ;;  %v2003_v50 = vmul.f32 %v1939_v33, %v1939_v33  ;;  %v6354_v33 = vld [vmem:[#allocation43_spill] sm:$0xff] }
 0x414   :  { %v2175_v53 = vsel %vm1743_vm12, %v2060_v4, 0.0  ;;  %v1733_v52 = vmul.f32 %v6350_v14, %v1669_v12  ;;  %v1998_v20 = vmul.f32 %v1934_v41, %v1934_v41  ;;  %v1738_v63 = vmul.f32 %v5278_v27, %v1674_v26 }
 0x415   :  { %v2176_v38 = vadd.f32 %v2175_v53, %v2174_v2  ;;  %v1850_v9 = vadd.f32 %v1849_v46, %v1848_v32  ;;  %v1593_v6 = vpop.xlane.xlu1 %1592  ;;  %v2185_v54 = vsel %vm1743_vm12, %v2065_v1, 0.0  ;;  %v1941_v34 = vsub.f32 1.0, %v1608_v0  ;;  %v1614_v42 = vpop.xlane.xlu0 %1613 }
 0x416   :  { %v1851_v45 = vsel %vm1743_vm12, %v1733_v52, 0.0  ;;  %v2062_v16 = vmul.f32 %v6350_v14, %v1998_v20  ;;  %v1671_v56 = vsub.f32 %v6351_v43, %v1593_v6  ;;  %v1936_v61 = vsub.f32 1.0, %v1593_v6 }
 0x417   :  { %v1852_v51 = vadd.f32 %v1851_v45, %v1850_v9  ;;  %v2178_v37 = vadd.f32 %v2177_v60, %v2176_v38  ;;  %v2067_v58 = vmul.f32 %v5278_v27, %v2003_v50  ;;  %v1676_v47 = vsub.f32 %v5236_v44, %v1608_v0 }
 0x418   :  { %v2179_v49 = vsel %vm1743_vm12, %v2062_v16, 0.0  ;;  %v1735_v46 = vmul.f32 %v6352_v39, %v1671_v56  ;;  %v2000_v59 = vmul.f32 %v1936_v61, %v1936_v61  ;;  %v1861_v24 = vsel %vm1743_vm12, %v1738_v63, 0.0 }
 0x419   :  { %v2180_v29 = vadd.f32 %v2179_v49, %v2178_v37  ;;  %v1854_v28 = vadd.f32 %v1853_v15, %v1852_v51  ;;  %v1599_v11 = vpop.xlane.xlu1 %1598  ;;  %v2005_v40 = vmul.f32 %v1941_v34, %v1941_v34  ;;  %v1943_v5 = vsub.f32 1.0, %v1614_v42 }
 0x41a   :  { %v1855_v18 = vsel %vm1743_vm12, %v1735_v46, 0.0  ;;  %v2064_v8 = vmul.f32 %v6352_v39, %v2000_v59  ;;  %v1673_v60 = vsub.f32 %v6353_v23, %v1599_v11  ;;  %v1938_v3 = vsub.f32 1.0, %v1599_v11 }
 0x41b   :  { %v1856_v17 = vadd.f32 %v1855_v18, %v1854_v28  ;;  %v2182_v36 = vadd.f32 %v2181_v31, %v2180_v29  ;;  %v2189_v2 = vsel %vm1743_vm12, %v2067_v58, 0.0  ;;  %v1740_v10 = vmul.f32 %v5334_v25, %v1676_v47 }
 0x41c   :  { %v2183_v7 = vsel %vm1743_vm12, %v2064_v8, 0.0  ;;  %v1737_v15 = vmul.f32 %v5261_v22, %v1673_v60  ;;  %v2002_v21 = vmul.f32 %v1938_v3, %v1938_v3  ;;  %v1678_v14 = vsub.f32 %v5291_v30, %v1614_v42 }
 0x41d   :  { %v2184_v4 = vadd.f32 %v2183_v7, %v2182_v36  ;;  %v1858_v12 = vadd.f32 %v1857_v13, %v1856_v17  ;;  %v1605_v41 = vpop.xlane.xlu1 %1604  ;;  %v2069_v1 = vmul.f32 %v5334_v25, %v2005_v40  ;;  %v2007_v38 = vmul.f32 %v1943_v5, %v1943_v5 }
 0x41e   :  { %v1859_v48 = vsel %vm1743_vm12, %v1737_v15, 0.0  ;;  %v2066_v27 = vmul.f32 %v5261_v22, %v2002_v21  ;;  %v1675_v44 = vsub.f32 %v6354_v33, %v1605_v41  ;;  %v1940_v32 = vsub.f32 1.0, %v1605_v41 }
 0x41f   :  { %v1860_v26 = vadd.f32 %v1859_v48, %v1858_v12  ;;  %v2186_v53 = vadd.f32 %v2185_v54, %v2184_v4  ;;  %v1865_v30 = vsel %vm1743_vm12, %v1740_v10, 0.0  ;;  %v2331_v13 = vsel %vm1743_vm12, %v5410_v19, 0.0 }
 0x420   :  { %v2187_v52 = vsel %vm1743_vm12, %v2066_v27, 0.0  ;;  %v1739_v20 = vmul.f32 %v5299_v55, %v1675_v44  ;;  %v2004_v31 = vmul.f32 %v1940_v32, %v1940_v32  ;;  %v1742_v25 = vmul.f32 %v5444_v62, %v1678_v14  ;;  %v6355_v32 = vld [vmem:[#allocation113_spill] sm:$0xff] }
 0x421   :  { %v2188_v22 = vadd.f32 %v2187_v52, %v2186_v53  ;;  %v1862_v9 = vadd.f32 %v1861_v24, %v1860_v26  ;;  %v1611_v6 = vpop.xlane.xlu1 %1610  ;;  %v2332_v34 = vadd.f32 %v2331_v13, %v5465_v35  ;;  %v2333_v11 = vsel %vm1743_vm12, %v5444_v62, 0.0 }
 0x422   :  { %v1863_v0 = vsel %vm1743_vm12, %v1739_v20, 0.0  ;;  %v2068_v45 = vmul.f32 %v5299_v55, %v2004_v31  ;;  %v1677_v16 = vsub.f32 %v5245_v57, %v1611_v6  ;;  %v1942_v43 = vsub.f32 1.0, %v1611_v6 }
 0x423   :  { %v1864_v56 = vadd.f32 %v1863_v0, %v1862_v9  ;;  %v2190_v61 = vadd.f32 %v2189_v2, %v2188_v22  ;;  %v2193_v55 = vsel %vm1743_vm12, %v2069_v1, 0.0  ;;  %v2071_v57 = vmul.f32 %v5444_v62, %v2007_v38 }
 0x424   :  { %v2191_v50 = vsel %vm1743_vm12, %v2068_v45, 0.0  ;;  %v1741_v51 = vmul.f32 %v5410_v19, %v1677_v16  ;;  %v2006_v37 = vmul.f32 %v1942_v43, %v1942_v43  ;;  %v1869_v28 = vsel %vm1743_vm12, %v1742_v25, 0.0 }
 0x425   :  { %v2192_v63 = vadd.f32 %v2191_v50, %v2190_v61  ;;  %v1866_v49 = vadd.f32 %v1865_v30, %v1864_v56  ;;  %v2197_v42 = vsel %vm1743_vm12, %v2071_v57, 0.0  ;;  %v2334_v60 = vadd.f32 %v2333_v11, %v2332_v34 }
 0x426   :  { %v1867_v39 = vsel %vm1743_vm12, %v1741_v51, 0.0  ;;  %v2070_v46 = vmul.f32 %v5410_v19, %v2006_v37  ;;  %vm2345_vm2 = vcmp.eq.s32.totalorder %v6355_v32, 1  ;;  %vm2344_vm3 = vcmp.eq.s32.totalorder %v6355_v32, 0 }
 0x427   :  { %v1868_v59 = vadd.f32 %v1867_v39, %v1866_v49  ;;  %v2194_v54 = vadd.f32 %v2193_v55, %v2192_v63 }
 0x428   :  { %v2195_v29 = vsel %vm1743_vm12, %v2070_v46, 0.0  ;;  %vm2346_vm12 = vcmp.eq.s32.totalorder %v6355_v32, 2 }
 0x429   :  { %v1870_v18 = vadd.f32 %v1869_v28, %v1868_v59  ;;  %v2196_v8 = vadd.f32 %v2195_v29, %v2194_v54 }
 0x42b   :  { %1871 = vadd.xlane.f32.xlu1 %v1870_v18  ;;  %v2198_v23 = vadd.f32 %v2197_v42, %v2196_v8 }
 0x42d   :  { %2199 = vadd.xlane.f32.xlu0 %v2198_v23 }
 0x42f   :  { %2335 = vadd.xlane.f32.xlu1 %v2334_v60 }
 0x4b8   :  { %v1872_v19 = vpop.xlane.xlu1 %1871 }
 0x4b9   :  { %v1873_v3 = vrot.slane %v1872_v19, 4 }
 0x4ba   :  { %v2200_v58 = vpop.xlane.xlu0 %2199 }
 0x4bb   :  { %v1874_v35 = vadd.f32 %v1873_v3, %v1872_v19  ;;  %v2201_v47 = vrot.slane %v2200_v58, 4 }
 0x4bc   :  { %v2336_v17 = vpop.xlane.xlu1 %2335 }
 0x4bd   :  { %v1875_v36 = vrot.slane %v1874_v35, 2  ;;  %v2202_v24 = vadd.f32 %v2201_v47, %v2200_v58  ;;  %v2337_v7 = vrot.slane %v2336_v17, 4 }
 0x4bf   :  { %v2203_v15 = vrot.slane %v2202_v24, 2  ;;  %v2338_v62 = vadd.f32 %v2337_v7, %v2336_v17  ;;  %v1876_v21 = vadd.f32 %v1875_v36, %v1874_v35 }
 0x4c1   :  { %v2204_v40 = vadd.f32 %v2203_v15, %v2202_v24  ;;  %v2339_v4 = vrot.slane %v2338_v62, 2  ;;  %v1877_v5 = vrot.slane %v1876_v21, 1 }
 0x4c3   :  { %v2340_v12 = vadd.f32 %v2339_v4, %v2338_v62  ;;  %v1878_v41 = vadd.f32 %v1877_v5, %v1876_v21  ;;  %v2205_v48 = vrot.slane %v2204_v40, 1 }
 0x4c5   :  { %2432 = vpush %v1878_v41  ;;  %v2206_v27 = vadd.f32 %v2205_v48, %v2204_v40  ;;  %v2341_v33 = vrot.slane %v2340_v12, 1 }
 0x4c7   :  { %2434 = vpush %v2206_v27  ;;  %v2342_v44 = vadd.f32 %v2341_v33, %v2340_v12 }
 0x4c9   :  { %2436 = vpush %v2342_v44 }
 0x4f6   :  { %s2433_s1 = spop %2432 }
 0x4f7   :  { %v2351_v53 = vstv %s2433_s1 }
 0x4f8   :  { %s2435_s20 = spop %2434 }
 0x4f9   :  { %v2349_v10 = vstv %s2435_s20 }
 0x4fa   :  { %s2437_s21 = spop %2436 }
 0x4fb   :  { %v2347_v2 = vstv %s2437_s21 }
 0x4fc   :  { %v2348_v26 = vsel %vm2346_vm12, %v2347_v2, 0.0 }
 0x4fd   :  { %v2350_v14 = vsel %vm2345_vm2, %v2349_v10, %v2348_v26 }
 0x4fe   :  { %v2352_v52 = vsel %vm2344_vm3, %v2351_v53, %v2350_v14 }
 0x4ff   :  { %2353 = vst [vmem:[#allocation2] sm:$0xff] %v2352_v52 }
 0x500   :  { %2798 = shalt.err (!%p2795_p4)
}
 0x501   :  { %s2799_s27 = scalar_lea.hbm %s5728_s2, 128 }
 0x502   :  { %p2800_p5 = scmp.ne.s32.totalorder %s5728_s2, %s2799_s27  ;;  %p2803_p6 = scmp.lt.u32.totalorder %s2799_s27, %s5728_s2 }
 0x504   :  { %p2805_p7 = pnand %p2803_p6, %p2800_p5 }
 0x506   :  { %2808 = shalt.err (!%p2805_p7)
}
 0x507   :  { %2363 = dma.vmem_to_hbm [thread:$0]  %s2361_s23, 128, %s5728_s2, [#allocation3]  }
 0x508   :  { %2809 = dma.done.wait [#allocation3], 128  }
 0x509   :  { %2810 = vsyncadd [#allocation3], 4294967168 }
 0x50a   :  { %2367 = vsyncpa [#allocation3], 1 }

</bundles_post_ra>
